<compile_context>
chip_gen: v5e
topology: v5e:2x2
jax: 0.10.0
libtpu: 0.0.40
codegen_flags: <defaults>
</compile_context>

<pallas_src>
import functools

import jax
import jax.numpy as jnp
from jax import lax
from jax.experimental import pallas as pl
from jax.experimental.pallas import tpu as pltpu

_G = 128  # per-gate lane padding (vreg lane width)


def _gru_ae_kernel(x_ref, w_ref, b_ref, out_ref, *, seq_len, in_size, reverse):
    """Whole encoder + decoder recurrence in one kernel call (all in VMEM)."""
    G = _G

    # ---- unpack the two slabs (3 DMAs total: x, weights, biases) ----------
    wih_e = w_ref[0:in_size, :]                     # (in, 3G)
    whh_e = w_ref[in_size:in_size + G, :]           # (G, 3G), rows H:G are 0
    whh_d = w_ref[in_size + G:in_size + 2 * G, :]   # (G, 3G)

    bx_e = b_ref[0:1, :]                            # (1, 3G)
    bhn_e = b_ref[1:2, 2 * G:]                      # (1, G)
    bx_d = b_ref[2:3, :]                            # (1, 3G)
    bhn_d = b_ref[3:4, 2 * G:]                      # (1, G)

    # ---- hoisted encoder input projection (off the serial chain) ----------
    # (seq, 3G) = inputs @ [Wir|Wiz|Win] + [bir+bhr | biz+bhz | bin]
    # HIGHEST here is cheap (one tiny matmul) and keeps the x-projection exact.
    xproj = jnp.dot(x_ref[...], wih_e, preferred_element_type=jnp.float32,
                    precision=lax.Precision.HIGHEST) + bx_e

    def step(h, pre, whh, bhn):
        # PyTorch GRU cell, gate order [r, z, n]:
        #   r = sigmoid(x Wir + bir + h Whr + bhr)
        #   z = sigmoid(x Wiz + biz + h Whz + bhz)
        #   n = tanh   (x Win + bin + r * (h Whn + bhn))
        #   h' = (1 - z) * n + z * h
        # `pre` already holds the x-projection plus the foldable biases.
        # DEFAULT precision: single bf16 MXU pass per step (serial chain).
        hw = jnp.dot(h, whh, preferred_element_type=jnp.float32)  # (1, 3G)
        rz = jax.nn.sigmoid(pre[:, :2 * G] + hw[:, :2 * G])       # lane-aligned
        r = rz[:, :G]
        z = rz[:, G:]
        n = jnp.tanh(pre[:, 2 * G:] + r * (hw[:, 2 * G:] + bhn))
        return (1.0 - z) * n + z * h        # padding lanes stay exactly 0

    # ---------------- encoder: z_codes, enc_state = encoder(inputs) --------
    h = jnp.zeros((1, G), jnp.float32)
    enc_hs = []
    for t in range(seq_len):                 # fully unrolled (static seq_len)
        h = step(h, xproj[t:t + 1, :], whh_e, bhn_e)
        enc_hs.append(h)

    # ---------------- decoder: zero inputs, seeded with enc_state ----------
    # dec_input = zeros -> x @ W_ih_d == 0, so only the decoder biases enter
    # the pre-activation (bx_d); wih_d is therefore not passed at all.
    dec_hs = []
    for _ in range(seq_len):
        h = step(h, bx_d, whh_d, bhn_d)
        dec_hs.append(h)
    if reverse:
        dec_hs = dec_hs[::-1]

    # One lane-dense (2*seq, 128) slab store (no masked partial stores).
    out_ref[...] = jnp.concatenate(enc_hs + dec_hs, axis=0)


def _pack_gate_cols(w3):
    """(3, K, H) -> (K, 3G) with gate g occupying lanes [g*G, g*G+H)."""
    K, H = w3.shape[1], w3.shape[2]
    out = jnp.zeros((K, 3 * _G), jnp.float32)
    for g in range(3):
        out = out.at[:, g * _G:g * _G + H].set(w3[g])
    return out


def _pack_bx(bih, bhh):
    """(3,1,H) x2 -> (1, 3G); r/z get bih+bhh folded, n gets bih only."""
    H = bih.shape[-1]
    vals = [bih[0] + bhh[0], bih[1] + bhh[1], bih[2]]
    out = jnp.zeros((1, 3 * _G), jnp.float32)
    for g in range(3):
        out = out.at[:, g * _G:g * _G + H].set(vals[g])
    return out


def _pack_bhn(bhh):
    """(3,1,H) -> (1, 3G) with bhh_n placed in the n-gate lane block."""
    H = bhh.shape[-1]
    return jnp.zeros((1, 3 * _G), jnp.float32).at[:, 2 * _G:2 * _G + H].set(bhh[2])


def gru_autoencoder(inputs, params, *, reverse=True):
    """inputs: (seq_len, input_size) f32.  Returns (z_codes, enc_state, dec_out)
    with PyTorch batch_first conventions: (1, seq, H), (1, 1, H), (1, seq, H)."""
    seq_len, in_size = inputs.shape
    hidden = params["whh_e"].shape[-1]
    assert hidden <= _G, "hidden_num must fit in one 128-lane gate block"
    assert in_size % 8 == 0, "input_size must be sublane (8) aligned"

    # ---- one weight slab: [wih_e ; whh_e (K-padded) ; whh_d (K-padded)] ----
    pad_k = lambda w: jnp.pad(w, ((0, _G - w.shape[0]), (0, 0)))
    w_slab = jnp.concatenate(
        [_pack_gate_cols(params["wih_e"]),
         pad_k(_pack_gate_cols(params["whh_e"])),
         pad_k(_pack_gate_cols(params["whh_d"]))], axis=0)   # (in+2G, 3G)

    # ---- one bias slab: [bx_e ; bhn_e ; bx_d ; bhn_d] ---------------------
    b_slab = jnp.concatenate(
        [_pack_bx(params["bih_e"], params["bhh_e"]),
         _pack_bhn(params["bhh_e"]),
         _pack_bx(params["bih_d"], params["bhh_d"]),
         _pack_bhn(params["bhh_d"])], axis=0)                # (4, 3G)
    # NOTE: params["wih_d"] never contributes (decoder input is all zeros),
    # so it is intentionally not packed at all.

    kernel = functools.partial(_gru_ae_kernel, seq_len=seq_len,
                               in_size=in_size, reverse=reverse)
    vmem = pl.BlockSpec(memory_space=pltpu.MemorySpace.VMEM)

    out = pl.pallas_call(
        kernel,
        out_shape=jax.ShapeDtypeStruct((2 * seq_len, _G), jnp.float32),
        in_specs=[vmem, vmem, vmem],
        out_specs=vmem,
        compiler_params=pltpu.CompilerParams(
            vmem_limit_bytes=4 * 1024 * 1024),   # working set is < 500 KiB
    )(inputs, w_slab, b_slab)

    z_codes = out[:seq_len, :hidden]
    dec_out = out[seq_len:, :hidden]
    enc_state = z_codes[seq_len - 1:seq_len]     # redundant output removed
    return z_codes[None], enc_state[None], dec_out[None]


# ----------------------------- pure-JAX reference ----------------------------
def _hdot(a, b):
    return jnp.dot(a, b, preferred_element_type=jnp.float32,
                   precision=lax.Precision.HIGHEST)


def _ref_gru_ae(inputs, params, reverse=True):
    def cell(h, x, wih, whh, bih, bhh):
        r = jax.nn.sigmoid(_hdot(x, wih[0]) + bih[0] + _hdot(h, whh[0]) + bhh[0])
        z = jax.nn.sigmoid(_hdot(x, wih[1]) + bih[1] + _hdot(h, whh[1]) + bhh[1])
        n = jnp.tanh(_hdot(x, wih[2]) + bih[2] + r * (_hdot(h, whh[2]) + bhh[2]))
        return (1.0 - z) * n + z * h

    seq_len, input_size = inputs.shape
    hidden = params["whh_e"].shape[-1]
    h = jnp.zeros((1, hidden), jnp.float32)
    zc = []
    for t in range(seq_len):
        h = cell(h, inputs[t:t + 1], params["wih_e"], params["whh_e"],
                 params["bih_e"], params["bhh_e"])
        zc.append(h)
    z_codes = jnp.concatenate(zc, axis=0)
    enc_state = h

    x0 = jnp.zeros((1, input_size), jnp.float32)
    dh = enc_state
    dec = []
    for _ in range(seq_len):
        dh = cell(dh, x0, params["wih_d"], params["whh_d"],
                  params["bih_d"], params["bhh_d"])
        dec.append(dh)
    dec_out = jnp.concatenate(dec, axis=0)
    if reverse:
        dec_out = dec_out[::-1]
    return z_codes[None], enc_state[None], dec_out[None]


if __name__ == "__main__":
    SEQ, INPUT_SIZE, HIDDEN = 8, 32, 32          # input_size == hidden_num

    key = jax.random.PRNGKey(0)
    keys = jax.random.split(key, 9)
    bound = 1.0 / (HIDDEN ** 0.5)                # PyTorch GRU init: U(-1/sqrt(H), 1/sqrt(H))

    def u(k, shape):
        return jax.random.uniform(k, shape, jnp.float32, -bound, bound)

    params = {
        "wih_e": u(keys[0], (3, INPUT_SIZE, HIDDEN)),
        "whh_e": u(keys[1], (3, HIDDEN, HIDDEN)),
        "bih_e": u(keys[2], (3, 1, HIDDEN)),
        "bhh_e": u(keys[3], (3, 1, HIDDEN)),
        "wih_d": u(keys[4], (3, INPUT_SIZE, HIDDEN)),
        "whh_d": u(keys[5], (3, HIDDEN, HIDDEN)),
        "bih_d": u(keys[6], (3, 1, HIDDEN)),
        "bhh_d": u(keys[7], (3, 1, HIDDEN)),
    }
    inputs = jax.random.normal(keys[8], (SEQ, INPUT_SIZE), jnp.float32)

    z_codes, enc_state, dec_out = gru_autoencoder(inputs, params, reverse=True)
    jax.block_until_ready((z_codes, enc_state, dec_out))

    z_ref, s_ref, d_ref = _ref_gru_ae(inputs, params, reverse=True)
    assert z_codes.shape == (1, SEQ, HIDDEN)
    assert enc_state.shape == (1, 1, HIDDEN)
    assert dec_out.shape == (1, SEQ, HIDDEN)
    # Tolerance covers the single-bf16-pass (DEFAULT precision) recurrent
    # matmuls in the kernel vs the exact f32 (HIGHEST) reference; the
    # accumulated divergence over the 16-step recurrence is ~1e-3.
    TOL = dict(atol=5e-3, rtol=5e-3)
    assert bool(jnp.allclose(z_codes, z_ref, **TOL))
    assert bool(jnp.allclose(enc_state, s_ref, **TOL))
    assert bool(jnp.allclose(dec_out, d_ref, **TOL))

    print("KERNEL_OK")
</pallas_src>

<mosaic_0001>
module attributes {stable_mosaic.version = 11 : i64} {
  func.func @_gru_ae_kernel(%arg0: memref<8x32xf32, #tpu.memory_space<vmem>>, %arg1: memref<288x384xf32, #tpu.memory_space<vmem>>, %arg2: memref<4x384xf32, #tpu.memory_space<vmem>>, %arg3: memref<16x128xf32, #tpu.memory_space<vmem>>) attributes {dimension_semantics = [], scalar_prefetch = 0 : i64, scratch_operands = 0 : i64, tpu.core_type = #tpu.core_type<tc>} {
    %c0 = arith.constant 0 : index
    %c0_0 = arith.constant 0 : index
    %0 = vector.load %arg1[%c0, %c0_0] : memref<288x384xf32, #tpu.memory_space<vmem>>, vector<32x384xf32>
    %c32 = arith.constant 32 : index
    %c0_1 = arith.constant 0 : index
    %1 = vector.load %arg1[%c32, %c0_1] : memref<288x384xf32, #tpu.memory_space<vmem>>, vector<128x384xf32>
    %c160 = arith.constant 160 : index
    %c0_2 = arith.constant 0 : index
    %2 = vector.load %arg1[%c160, %c0_2] : memref<288x384xf32, #tpu.memory_space<vmem>>, vector<128x384xf32>
    %c0_3 = arith.constant 0 : index
    %c0_4 = arith.constant 0 : index
    %3 = vector.load %arg2[%c0_3, %c0_4] : memref<4x384xf32, #tpu.memory_space<vmem>>, vector<1x384xf32>
    %c1 = arith.constant 1 : index
    %c256 = arith.constant 256 : index
    %4 = vector.load %arg2[%c1, %c256] : memref<4x384xf32, #tpu.memory_space<vmem>>, vector<1x128xf32>
    %c2 = arith.constant 2 : index
    %c0_5 = arith.constant 0 : index
    %5 = vector.load %arg2[%c2, %c0_5] : memref<4x384xf32, #tpu.memory_space<vmem>>, vector<1x384xf32>
    %c3 = arith.constant 3 : index
    %c256_6 = arith.constant 256 : index
    %6 = vector.load %arg2[%c3, %c256_6] : memref<4x384xf32, #tpu.memory_space<vmem>>, vector<1x128xf32>
    %c0_7 = arith.constant 0 : index
    %c0_8 = arith.constant 0 : index
    %7 = vector.load %arg0[%c0_7, %c0_8] : memref<8x32xf32, #tpu.memory_space<vmem>>, vector<8x32xf32>
    %cst = arith.constant dense<0.000000e+00> : vector<8x384xf32>
    %8 = tpu.matmul %7, %0, %cst {dimension_numbers = #tpu.dot_dimension_numbers<[1], [0], [0], [1], [0, 0, 1, 1], [], []>, precision = #tpu.contract_precision<fp32>} : vector<8x32xf32>, vector<32x384xf32>, vector<8x384xf32> -> vector<8x384xf32>
    %9 = vector.broadcast %3 : vector<1x384xf32> to vector<8x384xf32>
    %10 = arith.addf %8, %9 : vector<8x384xf32>
    %cst_9 = arith.constant 0.000000e+00 : f32
    %11 = vector.broadcast %cst_9 : f32 to vector<1x128xf32>
    %12 = vector.extract_strided_slice %10 {offsets = [0, 0], sizes = [1, 384], strides = [1, 1]} : vector<8x384xf32> to vector<1x384xf32>
    %cst_10 = arith.constant dense<0.000000e+00> : vector<1x384xf32>
    %13 = tpu.matmul %11, %1, %cst_10 {dimension_numbers = #tpu.dot_dimension_numbers<[1], [0], [0], [1], [0, 0, 1, 1], [], []>} : vector<1x128xf32>, vector<128x384xf32>, vector<1x384xf32> -> vector<1x384xf32>
    %14 = vector.extract_strided_slice %12 {offsets = [0, 0], sizes = [1, 256], strides = [1, 1]} : vector<1x384xf32> to vector<1x256xf32>
    %15 = vector.extract_strided_slice %13 {offsets = [0, 0], sizes = [1, 256], strides = [1, 1]} : vector<1x384xf32> to vector<1x256xf32>
    %16 = arith.addf %14, %15 : vector<1x256xf32>
    %17 = arith.negf %16 : vector<1x256xf32>
    %18 = math.exp %17 : vector<1x256xf32>
    %cst_11 = arith.constant 1.000000e+00 : f32
    %19 = vector.broadcast %cst_11 : f32 to vector<1x256xf32>
    %20 = arith.addf %19, %18 : vector<1x256xf32>
    %21 = arith.divf %19, %20 : vector<1x256xf32>
    %22 = vector.extract_strided_slice %21 {offsets = [0, 0], sizes = [1, 128], strides = [1, 1]} : vector<1x256xf32> to vector<1x128xf32>
    %23 = vector.extract_strided_slice %21 {offsets = [0, 128], sizes = [1, 128], strides = [1, 1]} : vector<1x256xf32> to vector<1x128xf32>
    %24 = vector.extract_strided_slice %12 {offsets = [0, 256], sizes = [1, 128], strides = [1, 1]} : vector<1x384xf32> to vector<1x128xf32>
    %25 = vector.extract_strided_slice %13 {offsets = [0, 256], sizes = [1, 128], strides = [1, 1]} : vector<1x384xf32> to vector<1x128xf32>
    %26 = arith.addf %25, %4 : vector<1x128xf32>
    %27 = arith.mulf %22, %26 : vector<1x128xf32>
    %28 = arith.addf %24, %27 : vector<1x128xf32>
    %29 = math.tanh %28 : vector<1x128xf32>
    %cst_12 = arith.constant 1.000000e+00 : f32
    %30 = vector.broadcast %cst_12 : f32 to vector<1x128xf32>
    %31 = arith.subf %30, %23 : vector<1x128xf32>
    %32 = arith.mulf %31, %29 : vector<1x128xf32>
    %33 = arith.mulf %23, %11 : vector<1x128xf32>
    %34 = arith.addf %32, %33 : vector<1x128xf32>
    %35 = vector.extract_strided_slice %10 {offsets = [1, 0], sizes = [1, 384], strides = [1, 1]} : vector<8x384xf32> to vector<1x384xf32>
    %cst_13 = arith.constant dense<0.000000e+00> : vector<1x384xf32>
    %36 = tpu.matmul %34, %1, %cst_13 {dimension_numbers = #tpu.dot_dimension_numbers<[1], [0], [0], [1], [0, 0, 1, 1], [], []>} : vector<1x128xf32>, vector<128x384xf32>, vector<1x384xf32> -> vector<1x384xf32>
    %37 = vector.extract_strided_slice %35 {offsets = [0, 0], sizes = [1, 256], strides = [1, 1]} : vector<1x384xf32> to vector<1x256xf32>
    %38 = vector.extract_strided_slice %36 {offsets = [0, 0], sizes = [1, 256], strides = [1, 1]} : vector<1x384xf32> to vector<1x256xf32>
    %39 = arith.addf %37, %38 : vector<1x256xf32>
    %40 = arith.negf %39 : vector<1x256xf32>
    %41 = math.exp %40 : vector<1x256xf32>
    %cst_14 = arith.constant 1.000000e+00 : f32
    %42 = vector.broadcast %cst_14 : f32 to vector<1x256xf32>
    %43 = arith.addf %42, %41 : vector<1x256xf32>
    %44 = arith.divf %42, %43 : vector<1x256xf32>
    %45 = vector.extract_strided_slice %44 {offsets = [0, 0], sizes = [1, 128], strides = [1, 1]} : vector<1x256xf32> to vector<1x128xf32>
    %46 = vector.extract_strided_slice %44 {offsets = [0, 128], sizes = [1, 128], strides = [1, 1]} : vector<1x256xf32> to vector<1x128xf32>
    %47 = vector.extract_strided_slice %35 {offsets = [0, 256], sizes = [1, 128], strides = [1, 1]} : vector<1x384xf32> to vector<1x128xf32>
    %48 = vector.extract_strided_slice %36 {offsets = [0, 256], sizes = [1, 128], strides = [1, 1]} : vector<1x384xf32> to vector<1x128xf32>
    %49 = arith.addf %48, %4 : vector<1x128xf32>
    %50 = arith.mulf %45, %49 : vector<1x128xf32>
    %51 = arith.addf %47, %50 : vector<1x128xf32>
    %52 = math.tanh %51 : vector<1x128xf32>
    %cst_15 = arith.constant 1.000000e+00 : f32
    %53 = vector.broadcast %cst_15 : f32 to vector<1x128xf32>
    %54 = arith.subf %53, %46 : vector<1x128xf32>
    %55 = arith.mulf %54, %52 : vector<1x128xf32>
    %56 = arith.mulf %46, %34 : vector<1x128xf32>
    %57 = arith.addf %55, %56 : vector<1x128xf32>
    %58 = vector.extract_strided_slice %10 {offsets = [2, 0], sizes = [1, 384], strides = [1, 1]} : vector<8x384xf32> to vector<1x384xf32>
    %cst_16 = arith.constant dense<0.000000e+00> : vector<1x384xf32>
    %59 = tpu.matmul %57, %1, %cst_16 {dimension_numbers = #tpu.dot_dimension_numbers<[1], [0], [0], [1], [0, 0, 1, 1], [], []>} : vector<1x128xf32>, vector<128x384xf32>, vector<1x384xf32> -> vector<1x384xf32>
    %60 = vector.extract_strided_slice %58 {offsets = [0, 0], sizes = [1, 256], strides = [1, 1]} : vector<1x384xf32> to vector<1x256xf32>
    %61 = vector.extract_strided_slice %59 {offsets = [0, 0], sizes = [1, 256], strides = [1, 1]} : vector<1x384xf32> to vector<1x256xf32>
    %62 = arith.addf %60, %61 : vector<1x256xf32>
    %63 = arith.negf %62 : vector<1x256xf32>
    %64 = math.exp %63 : vector<1x256xf32>
    %cst_17 = arith.constant 1.000000e+00 : f32
    %65 = vector.broadcast %cst_17 : f32 to vector<1x256xf32>
    %66 = arith.addf %65, %64 : vector<1x256xf32>
    %67 = arith.divf %65, %66 : vector<1x256xf32>
    %68 = vector.extract_strided_slice %67 {offsets = [0, 0], sizes = [1, 128], strides = [1, 1]} : vector<1x256xf32> to vector<1x128xf32>
    %69 = vector.extract_strided_slice %67 {offsets = [0, 128], sizes = [1, 128], strides = [1, 1]} : vector<1x256xf32> to vector<1x128xf32>
    %70 = vector.extract_strided_slice %58 {offsets = [0, 256], sizes = [1, 128], strides = [1, 1]} : vector<1x384xf32> to vector<1x128xf32>
    %71 = vector.extract_strided_slice %59 {offsets = [0, 256], sizes = [1, 128], strides = [1, 1]} : vector<1x384xf32> to vector<1x128xf32>
    %72 = arith.addf %71, %4 : vector<1x128xf32>
    %73 = arith.mulf %68, %72 : vector<1x128xf32>
    %74 = arith.addf %70, %73 : vector<1x128xf32>
    %75 = math.tanh %74 : vector<1x128xf32>
    %cst_18 = arith.constant 1.000000e+00 : f32
    %76 = vector.broadcast %cst_18 : f32 to vector<1x128xf32>
    %77 = arith.subf %76, %69 : vector<1x128xf32>
    %78 = arith.mulf %77, %75 : vector<1x128xf32>
    %79 = arith.mulf %69, %57 : vector<1x128xf32>
    %80 = arith.addf %78, %79 : vector<1x128xf32>
    %81 = vector.extract_strided_slice %10 {offsets = [3, 0], sizes = [1, 384], strides = [1, 1]} : vector<8x384xf32> to vector<1x384xf32>
    %cst_19 = arith.constant dense<0.000000e+00> : vector<1x384xf32>
    %82 = tpu.matmul %80, %1, %cst_19 {dimension_numbers = #tpu.dot_dimension_numbers<[1], [0], [0], [1], [0, 0, 1, 1], [], []>} : vector<1x128xf32>, vector<128x384xf32>, vector<1x384xf32> -> vector<1x384xf32>
    %83 = vector.extract_strided_slice %81 {offsets = [0, 0], sizes = [1, 256], strides = [1, 1]} : vector<1x384xf32> to vector<1x256xf32>
    %84 = vector.extract_strided_slice %82 {offsets = [0, 0], sizes = [1, 256], strides = [1, 1]} : vector<1x384xf32> to vector<1x256xf32>
    %85 = arith.addf %83, %84 : vector<1x256xf32>
    %86 = arith.negf %85 : vector<1x256xf32>
    %87 = math.exp %86 : vector<1x256xf32>
    %cst_20 = arith.constant 1.000000e+00 : f32
    %88 = vector.broadcast %cst_20 : f32 to vector<1x256xf32>
    %89 = arith.addf %88, %87 : vector<1x256xf32>
    %90 = arith.divf %88, %89 : vector<1x256xf32>
    %91 = vector.extract_strided_slice %90 {offsets = [0, 0], sizes = [1, 128], strides = [1, 1]} : vector<1x256xf32> to vector<1x128xf32>
    %92 = vector.extract_strided_slice %90 {offsets = [0, 128], sizes = [1, 128], strides = [1, 1]} : vector<1x256xf32> to vector<1x128xf32>
    %93 = vector.extract_strided_slice %81 {offsets = [0, 256], sizes = [1, 128], strides = [1, 1]} : vector<1x384xf32> to vector<1x128xf32>
    %94 = vector.extract_strided_slice %82 {offsets = [0, 256], sizes = [1, 128], strides = [1, 1]} : vector<1x384xf32> to vector<1x128xf32>
    %95 = arith.addf %94, %4 : vector<1x128xf32>
    %96 = arith.mulf %91, %95 : vector<1x128xf32>
    %97 = arith.addf %93, %96 : vector<1x128xf32>
    %98 = math.tanh %97 : vector<1x128xf32>
    %cst_21 = arith.constant 1.000000e+00 : f32
    %99 = vector.broadcast %cst_21 : f32 to vector<1x128xf32>
    %100 = arith.subf %99, %92 : vector<1x128xf32>
    %101 = arith.mulf %100, %98 : vector<1x128xf32>
    %102 = arith.mulf %92, %80 : vector<1x128xf32>
    %103 = arith.addf %101, %102 : vector<1x128xf32>
    %104 = vector.extract_strided_slice %10 {offsets = [4, 0], sizes = [1, 384], strides = [1, 1]} : vector<8x384xf32> to vector<1x384xf32>
    %cst_22 = arith.constant dense<0.000000e+00> : vector<1x384xf32>
    %105 = tpu.matmul %103, %1, %cst_22 {dimension_numbers = #tpu.dot_dimension_numbers<[1], [0], [0], [1], [0, 0, 1, 1], [], []>} : vector<1x128xf32>, vector<128x384xf32>, vector<1x384xf32> -> vector<1x384xf32>
    %106 = vector.extract_strided_slice %104 {offsets = [0, 0], sizes = [1, 256], strides = [1, 1]} : vector<1x384xf32> to vector<1x256xf32>
    %107 = vector.extract_strided_slice %105 {offsets = [0, 0], sizes = [1, 256], strides = [1, 1]} : vector<1x384xf32> to vector<1x256xf32>
    %108 = arith.addf %106, %107 : vector<1x256xf32>
    %109 = arith.negf %108 : vector<1x256xf32>
    %110 = math.exp %109 : vector<1x256xf32>
    %cst_23 = arith.constant 1.000000e+00 : f32
    %111 = vector.broadcast %cst_23 : f32 to vector<1x256xf32>
    %112 = arith.addf %111, %110 : vector<1x256xf32>
    %113 = arith.divf %111, %112 : vector<1x256xf32>
    %114 = vector.extract_strided_slice %113 {offsets = [0, 0], sizes = [1, 128], strides = [1, 1]} : vector<1x256xf32> to vector<1x128xf32>
    %115 = vector.extract_strided_slice %113 {offsets = [0, 128], sizes = [1, 128], strides = [1, 1]} : vector<1x256xf32> to vector<1x128xf32>
    %116 = vector.extract_strided_slice %104 {offsets = [0, 256], sizes = [1, 128], strides = [1, 1]} : vector<1x384xf32> to vector<1x128xf32>
    %117 = vector.extract_strided_slice %105 {offsets = [0, 256], sizes = [1, 128], strides = [1, 1]} : vector<1x384xf32> to vector<1x128xf32>
    %118 = arith.addf %117, %4 : vector<1x128xf32>
    %119 = arith.mulf %114, %118 : vector<1x128xf32>
    %120 = arith.addf %116, %119 : vector<1x128xf32>
    %121 = math.tanh %120 : vector<1x128xf32>
    %cst_24 = arith.constant 1.000000e+00 : f32
    %122 = vector.broadcast %cst_24 : f32 to vector<1x128xf32>
    %123 = arith.subf %122, %115 : vector<1x128xf32>
    %124 = arith.mulf %123, %121 : vector<1x128xf32>
    %125 = arith.mulf %115, %103 : vector<1x128xf32>
    %126 = arith.addf %124, %125 : vector<1x128xf32>
    %127 = vector.extract_strided_slice %10 {offsets = [5, 0], sizes = [1, 384], strides = [1, 1]} : vector<8x384xf32> to vector<1x384xf32>
    %cst_25 = arith.constant dense<0.000000e+00> : vector<1x384xf32>
    %128 = tpu.matmul %126, %1, %cst_25 {dimension_numbers = #tpu.dot_dimension_numbers<[1], [0], [0], [1], [0, 0, 1, 1], [], []>} : vector<1x128xf32>, vector<128x384xf32>, vector<1x384xf32> -> vector<1x384xf32>
    %129 = vector.extract_strided_slice %127 {offsets = [0, 0], sizes = [1, 256], strides = [1, 1]} : vector<1x384xf32> to vector<1x256xf32>
    %130 = vector.extract_strided_slice %128 {offsets = [0, 0], sizes = [1, 256], strides = [1, 1]} : vector<1x384xf32> to vector<1x256xf32>
    %131 = arith.addf %129, %130 : vector<1x256xf32>
    %132 = arith.negf %131 : vector<1x256xf32>
    %133 = math.exp %132 : vector<1x256xf32>
    %cst_26 = arith.constant 1.000000e+00 : f32
    %134 = vector.broadcast %cst_26 : f32 to vector<1x256xf32>
    %135 = arith.addf %134, %133 : vector<1x256xf32>
    %136 = arith.divf %134, %135 : vector<1x256xf32>
    %137 = vector.extract_strided_slice %136 {offsets = [0, 0], sizes = [1, 128], strides = [1, 1]} : vector<1x256xf32> to vector<1x128xf32>
    %138 = vector.extract_strided_slice %136 {offsets = [0, 128], sizes = [1, 128], strides = [1, 1]} : vector<1x256xf32> to vector<1x128xf32>
    %139 = vector.extract_strided_slice %127 {offsets = [0, 256], sizes = [1, 128], strides = [1, 1]} : vector<1x384xf32> to vector<1x128xf32>
    %140 = vector.extract_strided_slice %128 {offsets = [0, 256], sizes = [1, 128], strides = [1, 1]} : vector<1x384xf32> to vector<1x128xf32>
    %141 = arith.addf %140, %4 : vector<1x128xf32>
    %142 = arith.mulf %137, %141 : vector<1x128xf32>
    %143 = arith.addf %139, %142 : vector<1x128xf32>
    %144 = math.tanh %143 : vector<1x128xf32>
    %cst_27 = arith.constant 1.000000e+00 : f32
    %145 = vector.broadcast %cst_27 : f32 to vector<1x128xf32>
    %146 = arith.subf %145, %138 : vector<1x128xf32>
    %147 = arith.mulf %146, %144 : vector<1x128xf32>
    %148 = arith.mulf %138, %126 : vector<1x128xf32>
    %149 = arith.addf %147, %148 : vector<1x128xf32>
    %150 = vector.extract_strided_slice %10 {offsets = [6, 0], sizes = [1, 384], strides = [1, 1]} : vector<8x384xf32> to vector<1x384xf32>
    %cst_28 = arith.constant dense<0.000000e+00> : vector<1x384xf32>
    %151 = tpu.matmul %149, %1, %cst_28 {dimension_numbers = #tpu.dot_dimension_numbers<[1], [0], [0], [1], [0, 0, 1, 1], [], []>} : vector<1x128xf32>, vector<128x384xf32>, vector<1x384xf32> -> vector<1x384xf32>
    %152 = vector.extract_strided_slice %150 {offsets = [0, 0], sizes = [1, 256], strides = [1, 1]} : vector<1x384xf32> to vector<1x256xf32>
    %153 = vector.extract_strided_slice %151 {offsets = [0, 0], sizes = [1, 256], strides = [1, 1]} : vector<1x384xf32> to vector<1x256xf32>
    %154 = arith.addf %152, %153 : vector<1x256xf32>
    %155 = arith.negf %154 : vector<1x256xf32>
    %156 = math.exp %155 : vector<1x256xf32>
    %cst_29 = arith.constant 1.000000e+00 : f32
    %157 = vector.broadcast %cst_29 : f32 to vector<1x256xf32>
    %158 = arith.addf %157, %156 : vector<1x256xf32>
    %159 = arith.divf %157, %158 : vector<1x256xf32>
    %160 = vector.extract_strided_slice %159 {offsets = [0, 0], sizes = [1, 128], strides = [1, 1]} : vector<1x256xf32> to vector<1x128xf32>
    %161 = vector.extract_strided_slice %159 {offsets = [0, 128], sizes = [1, 128], strides = [1, 1]} : vector<1x256xf32> to vector<1x128xf32>
    %162 = vector.extract_strided_slice %150 {offsets = [0, 256], sizes = [1, 128], strides = [1, 1]} : vector<1x384xf32> to vector<1x128xf32>
    %163 = vector.extract_strided_slice %151 {offsets = [0, 256], sizes = [1, 128], strides = [1, 1]} : vector<1x384xf32> to vector<1x128xf32>
    %164 = arith.addf %163, %4 : vector<1x128xf32>
    %165 = arith.mulf %160, %164 : vector<1x128xf32>
    %166 = arith.addf %162, %165 : vector<1x128xf32>
    %167 = math.tanh %166 : vector<1x128xf32>
    %cst_30 = arith.constant 1.000000e+00 : f32
    %168 = vector.broadcast %cst_30 : f32 to vector<1x128xf32>
    %169 = arith.subf %168, %161 : vector<1x128xf32>
    %170 = arith.mulf %169, %167 : vector<1x128xf32>
    %171 = arith.mulf %161, %149 : vector<1x128xf32>
    %172 = arith.addf %170, %171 : vector<1x128xf32>
    %173 = vector.extract_strided_slice %10 {offsets = [7, 0], sizes = [1, 384], strides = [1, 1]} : vector<8x384xf32> to vector<1x384xf32>
    %cst_31 = arith.constant dense<0.000000e+00> : vector<1x384xf32>
    %174 = tpu.matmul %172, %1, %cst_31 {dimension_numbers = #tpu.dot_dimension_numbers<[1], [0], [0], [1], [0, 0, 1, 1], [], []>} : vector<1x128xf32>, vector<128x384xf32>, vector<1x384xf32> -> vector<1x384xf32>
    %175 = vector.extract_strided_slice %173 {offsets = [0, 0], sizes = [1, 256], strides = [1, 1]} : vector<1x384xf32> to vector<1x256xf32>
    %176 = vector.extract_strided_slice %174 {offsets = [0, 0], sizes = [1, 256], strides = [1, 1]} : vector<1x384xf32> to vector<1x256xf32>
    %177 = arith.addf %175, %176 : vector<1x256xf32>
    %178 = arith.negf %177 : vector<1x256xf32>
    %179 = math.exp %178 : vector<1x256xf32>
    %cst_32 = arith.constant 1.000000e+00 : f32
    %180 = vector.broadcast %cst_32 : f32 to vector<1x256xf32>
    %181 = arith.addf %180, %179 : vector<1x256xf32>
    %182 = arith.divf %180, %181 : vector<1x256xf32>
    %183 = vector.extract_strided_slice %182 {offsets = [0, 0], sizes = [1, 128], strides = [1, 1]} : vector<1x256xf32> to vector<1x128xf32>
    %184 = vector.extract_strided_slice %182 {offsets = [0, 128], sizes = [1, 128], strides = [1, 1]} : vector<1x256xf32> to vector<1x128xf32>
    %185 = vector.extract_strided_slice %173 {offsets = [0, 256], sizes = [1, 128], strides = [1, 1]} : vector<1x384xf32> to vector<1x128xf32>
    %186 = vector.extract_strided_slice %174 {offsets = [0, 256], sizes = [1, 128], strides = [1, 1]} : vector<1x384xf32> to vector<1x128xf32>
    %187 = arith.addf %186, %4 : vector<1x128xf32>
    %188 = arith.mulf %183, %187 : vector<1x128xf32>
    %189 = arith.addf %185, %188 : vector<1x128xf32>
    %190 = math.tanh %189 : vector<1x128xf32>
    %cst_33 = arith.constant 1.000000e+00 : f32
    %191 = vector.broadcast %cst_33 : f32 to vector<1x128xf32>
    %192 = arith.subf %191, %184 : vector<1x128xf32>
    %193 = arith.mulf %192, %190 : vector<1x128xf32>
    %194 = arith.mulf %184, %172 : vector<1x128xf32>
    %195 = arith.addf %193, %194 : vector<1x128xf32>
    %cst_34 = arith.constant dense<0.000000e+00> : vector<1x384xf32>
    %196 = tpu.matmul %195, %2, %cst_34 {dimension_numbers = #tpu.dot_dimension_numbers<[1], [0], [0], [1], [0, 0, 1, 1], [], []>} : vector<1x128xf32>, vector<128x384xf32>, vector<1x384xf32> -> vector<1x384xf32>
    %197 = vector.extract_strided_slice %5 {offsets = [0, 0], sizes = [1, 256], strides = [1, 1]} : vector<1x384xf32> to vector<1x256xf32>
    %198 = vector.extract_strided_slice %196 {offsets = [0, 0], sizes = [1, 256], strides = [1, 1]} : vector<1x384xf32> to vector<1x256xf32>
    %199 = arith.addf %197, %198 : vector<1x256xf32>
    %200 = arith.negf %199 : vector<1x256xf32>
    %201 = math.exp %200 : vector<1x256xf32>
    %cst_35 = arith.constant 1.000000e+00 : f32
    %202 = vector.broadcast %cst_35 : f32 to vector<1x256xf32>
    %203 = arith.addf %202, %201 : vector<1x256xf32>
    %204 = arith.divf %202, %203 : vector<1x256xf32>
    %205 = vector.extract_strided_slice %204 {offsets = [0, 0], sizes = [1, 128], strides = [1, 1]} : vector<1x256xf32> to vector<1x128xf32>
    %206 = vector.extract_strided_slice %204 {offsets = [0, 128], sizes = [1, 128], strides = [1, 1]} : vector<1x256xf32> to vector<1x128xf32>
    %207 = vector.extract_strided_slice %5 {offsets = [0, 256], sizes = [1, 128], strides = [1, 1]} : vector<1x384xf32> to vector<1x128xf32>
    %208 = vector.extract_strided_slice %196 {offsets = [0, 256], sizes = [1, 128], strides = [1, 1]} : vector<1x384xf32> to vector<1x128xf32>
    %209 = arith.addf %208, %6 : vector<1x128xf32>
    %210 = arith.mulf %205, %209 : vector<1x128xf32>
    %211 = arith.addf %207, %210 : vector<1x128xf32>
    %212 = math.tanh %211 : vector<1x128xf32>
    %cst_36 = arith.constant 1.000000e+00 : f32
    %213 = vector.broadcast %cst_36 : f32 to vector<1x128xf32>
    %214 = arith.subf %213, %206 : vector<1x128xf32>
    %215 = arith.mulf %214, %212 : vector<1x128xf32>
    %216 = arith.mulf %206, %195 : vector<1x128xf32>
    %217 = arith.addf %215, %216 : vector<1x128xf32>
    %cst_37 = arith.constant dense<0.000000e+00> : vector<1x384xf32>
    %218 = tpu.matmul %217, %2, %cst_37 {dimension_numbers = #tpu.dot_dimension_numbers<[1], [0], [0], [1], [0, 0, 1, 1], [], []>} : vector<1x128xf32>, vector<128x384xf32>, vector<1x384xf32> -> vector<1x384xf32>
    %219 = vector.extract_strided_slice %5 {offsets = [0, 0], sizes = [1, 256], strides = [1, 1]} : vector<1x384xf32> to vector<1x256xf32>
    %220 = vector.extract_strided_slice %218 {offsets = [0, 0], sizes = [1, 256], strides = [1, 1]} : vector<1x384xf32> to vector<1x256xf32>
    %221 = arith.addf %219, %220 : vector<1x256xf32>
    %222 = arith.negf %221 : vector<1x256xf32>
    %223 = math.exp %222 : vector<1x256xf32>
    %cst_38 = arith.constant 1.000000e+00 : f32
    %224 = vector.broadcast %cst_38 : f32 to vector<1x256xf32>
    %225 = arith.addf %224, %223 : vector<1x256xf32>
    %226 = arith.divf %224, %225 : vector<1x256xf32>
    %227 = vector.extract_strided_slice %226 {offsets = [0, 0], sizes = [1, 128], strides = [1, 1]} : vector<1x256xf32> to vector<1x128xf32>
    %228 = vector.extract_strided_slice %226 {offsets = [0, 128], sizes = [1, 128], strides = [1, 1]} : vector<1x256xf32> to vector<1x128xf32>
    %229 = vector.extract_strided_slice %5 {offsets = [0, 256], sizes = [1, 128], strides = [1, 1]} : vector<1x384xf32> to vector<1x128xf32>
    %230 = vector.extract_strided_slice %218 {offsets = [0, 256], sizes = [1, 128], strides = [1, 1]} : vector<1x384xf32> to vector<1x128xf32>
    %231 = arith.addf %230, %6 : vector<1x128xf32>
    %232 = arith.mulf %227, %231 : vector<1x128xf32>
    %233 = arith.addf %229, %232 : vector<1x128xf32>
    %234 = math.tanh %233 : vector<1x128xf32>
    %cst_39 = arith.constant 1.000000e+00 : f32
    %235 = vector.broadcast %cst_39 : f32 to vector<1x128xf32>
    %236 = arith.subf %235, %228 : vector<1x128xf32>
    %237 = arith.mulf %236, %234 : vector<1x128xf32>
    %238 = arith.mulf %228, %217 : vector<1x128xf32>
    %239 = arith.addf %237, %238 : vector<1x128xf32>
    %cst_40 = arith.constant dense<0.000000e+00> : vector<1x384xf32>
    %240 = tpu.matmul %239, %2, %cst_40 {dimension_numbers = #tpu.dot_dimension_numbers<[1], [0], [0], [1], [0, 0, 1, 1], [], []>} : vector<1x128xf32>, vector<128x384xf32>, vector<1x384xf32> -> vector<1x384xf32>
    %241 = vector.extract_strided_slice %5 {offsets = [0, 0], sizes = [1, 256], strides = [1, 1]} : vector<1x384xf32> to vector<1x256xf32>
    %242 = vector.extract_strided_slice %240 {offsets = [0, 0], sizes = [1, 256], strides = [1, 1]} : vector<1x384xf32> to vector<1x256xf32>
    %243 = arith.addf %241, %242 : vector<1x256xf32>
    %244 = arith.negf %243 : vector<1x256xf32>
    %245 = math.exp %244 : vector<1x256xf32>
    %cst_41 = arith.constant 1.000000e+00 : f32
    %246 = vector.broadcast %cst_41 : f32 to vector<1x256xf32>
    %247 = arith.addf %246, %245 : vector<1x256xf32>
    %248 = arith.divf %246, %247 : vector<1x256xf32>
    %249 = vector.extract_strided_slice %248 {offsets = [0, 0], sizes = [1, 128], strides = [1, 1]} : vector<1x256xf32> to vector<1x128xf32>
    %250 = vector.extract_strided_slice %248 {offsets = [0, 128], sizes = [1, 128], strides = [1, 1]} : vector<1x256xf32> to vector<1x128xf32>
    %251 = vector.extract_strided_slice %5 {offsets = [0, 256], sizes = [1, 128], strides = [1, 1]} : vector<1x384xf32> to vector<1x128xf32>
    %252 = vector.extract_strided_slice %240 {offsets = [0, 256], sizes = [1, 128], strides = [1, 1]} : vector<1x384xf32> to vector<1x128xf32>
    %253 = arith.addf %252, %6 : vector<1x128xf32>
    %254 = arith.mulf %249, %253 : vector<1x128xf32>
    %255 = arith.addf %251, %254 : vector<1x128xf32>
    %256 = math.tanh %255 : vector<1x128xf32>
    %cst_42 = arith.constant 1.000000e+00 : f32
    %257 = vector.broadcast %cst_42 : f32 to vector<1x128xf32>
    %258 = arith.subf %257, %250 : vector<1x128xf32>
    %259 = arith.mulf %258, %256 : vector<1x128xf32>
    %260 = arith.mulf %250, %239 : vector<1x128xf32>
    %261 = arith.addf %259, %260 : vector<1x128xf32>
    %cst_43 = arith.constant dense<0.000000e+00> : vector<1x384xf32>
    %262 = tpu.matmul %261, %2, %cst_43 {dimension_numbers = #tpu.dot_dimension_numbers<[1], [0], [0], [1], [0, 0, 1, 1], [], []>} : vector<1x128xf32>, vector<128x384xf32>, vector<1x384xf32> -> vector<1x384xf32>
    %263 = vector.extract_strided_slice %5 {offsets = [0, 0], sizes = [1, 256], strides = [1, 1]} : vector<1x384xf32> to vector<1x256xf32>
    %264 = vector.extract_strided_slice %262 {offsets = [0, 0], sizes = [1, 256], strides = [1, 1]} : vector<1x384xf32> to vector<1x256xf32>
    %265 = arith.addf %263, %264 : vector<1x256xf32>
    %266 = arith.negf %265 : vector<1x256xf32>
    %267 = math.exp %266 : vector<1x256xf32>
    %cst_44 = arith.constant 1.000000e+00 : f32
    %268 = vector.broadcast %cst_44 : f32 to vector<1x256xf32>
    %269 = arith.addf %268, %267 : vector<1x256xf32>
    %270 = arith.divf %268, %269 : vector<1x256xf32>
    %271 = vector.extract_strided_slice %270 {offsets = [0, 0], sizes = [1, 128], strides = [1, 1]} : vector<1x256xf32> to vector<1x128xf32>
    %272 = vector.extract_strided_slice %270 {offsets = [0, 128], sizes = [1, 128], strides = [1, 1]} : vector<1x256xf32> to vector<1x128xf32>
    %273 = vector.extract_strided_slice %5 {offsets = [0, 256], sizes = [1, 128], strides = [1, 1]} : vector<1x384xf32> to vector<1x128xf32>
    %274 = vector.extract_strided_slice %262 {offsets = [0, 256], sizes = [1, 128], strides = [1, 1]} : vector<1x384xf32> to vector<1x128xf32>
    %275 = arith.addf %274, %6 : vector<1x128xf32>
    %276 = arith.mulf %271, %275 : vector<1x128xf32>
    %277 = arith.addf %273, %276 : vector<1x128xf32>
    %278 = math.tanh %277 : vector<1x128xf32>
    %cst_45 = arith.constant 1.000000e+00 : f32
    %279 = vector.broadcast %cst_45 : f32 to vector<1x128xf32>
    %280 = arith.subf %279, %272 : vector<1x128xf32>
    %281 = arith.mulf %280, %278 : vector<1x128xf32>
    %282 = arith.mulf %272, %261 : vector<1x128xf32>
    %283 = arith.addf %281, %282 : vector<1x128xf32>
    %cst_46 = arith.constant dense<0.000000e+00> : vector<1x384xf32>
    %284 = tpu.matmul %283, %2, %cst_46 {dimension_numbers = #tpu.dot_dimension_numbers<[1], [0], [0], [1], [0, 0, 1, 1], [], []>} : vector<1x128xf32>, vector<128x384xf32>, vector<1x384xf32> -> vector<1x384xf32>
    %285 = vector.extract_strided_slice %5 {offsets = [0, 0], sizes = [1, 256], strides = [1, 1]} : vector<1x384xf32> to vector<1x256xf32>
    %286 = vector.extract_strided_slice %284 {offsets = [0, 0], sizes = [1, 256], strides = [1, 1]} : vector<1x384xf32> to vector<1x256xf32>
    %287 = arith.addf %285, %286 : vector<1x256xf32>
    %288 = arith.negf %287 : vector<1x256xf32>
    %289 = math.exp %288 : vector<1x256xf32>
    %cst_47 = arith.constant 1.000000e+00 : f32
    %290 = vector.broadcast %cst_47 : f32 to vector<1x256xf32>
    %291 = arith.addf %290, %289 : vector<1x256xf32>
    %292 = arith.divf %290, %291 : vector<1x256xf32>
    %293 = vector.extract_strided_slice %292 {offsets = [0, 0], sizes = [1, 128], strides = [1, 1]} : vector<1x256xf32> to vector<1x128xf32>
    %294 = vector.extract_strided_slice %292 {offsets = [0, 128], sizes = [1, 128], strides = [1, 1]} : vector<1x256xf32> to vector<1x128xf32>
    %295 = vector.extract_strided_slice %5 {offsets = [0, 256], sizes = [1, 128], strides = [1, 1]} : vector<1x384xf32> to vector<1x128xf32>
    %296 = vector.extract_strided_slice %284 {offsets = [0, 256], sizes = [1, 128], strides = [1, 1]} : vector<1x384xf32> to vector<1x128xf32>
    %297 = arith.addf %296, %6 : vector<1x128xf32>
    %298 = arith.mulf %293, %297 : vector<1x128xf32>
    %299 = arith.addf %295, %298 : vector<1x128xf32>
    %300 = math.tanh %299 : vector<1x128xf32>
    %cst_48 = arith.constant 1.000000e+00 : f32
    %301 = vector.broadcast %cst_48 : f32 to vector<1x128xf32>
    %302 = arith.subf %301, %294 : vector<1x128xf32>
    %303 = arith.mulf %302, %300 : vector<1x128xf32>
    %304 = arith.mulf %294, %283 : vector<1x128xf32>
    %305 = arith.addf %303, %304 : vector<1x128xf32>
    %cst_49 = arith.constant dense<0.000000e+00> : vector<1x384xf32>
    %306 = tpu.matmul %305, %2, %cst_49 {dimension_numbers = #tpu.dot_dimension_numbers<[1], [0], [0], [1], [0, 0, 1, 1], [], []>} : vector<1x128xf32>, vector<128x384xf32>, vector<1x384xf32> -> vector<1x384xf32>
    %307 = vector.extract_strided_slice %5 {offsets = [0, 0], sizes = [1, 256], strides = [1, 1]} : vector<1x384xf32> to vector<1x256xf32>
    %308 = vector.extract_strided_slice %306 {offsets = [0, 0], sizes = [1, 256], strides = [1, 1]} : vector<1x384xf32> to vector<1x256xf32>
    %309 = arith.addf %307, %308 : vector<1x256xf32>
    %310 = arith.negf %309 : vector<1x256xf32>
    %311 = math.exp %310 : vector<1x256xf32>
    %cst_50 = arith.constant 1.000000e+00 : f32
    %312 = vector.broadcast %cst_50 : f32 to vector<1x256xf32>
    %313 = arith.addf %312, %311 : vector<1x256xf32>
    %314 = arith.divf %312, %313 : vector<1x256xf32>
    %315 = vector.extract_strided_slice %314 {offsets = [0, 0], sizes = [1, 128], strides = [1, 1]} : vector<1x256xf32> to vector<1x128xf32>
    %316 = vector.extract_strided_slice %314 {offsets = [0, 128], sizes = [1, 128], strides = [1, 1]} : vector<1x256xf32> to vector<1x128xf32>
    %317 = vector.extract_strided_slice %5 {offsets = [0, 256], sizes = [1, 128], strides = [1, 1]} : vector<1x384xf32> to vector<1x128xf32>
    %318 = vector.extract_strided_slice %306 {offsets = [0, 256], sizes = [1, 128], strides = [1, 1]} : vector<1x384xf32> to vector<1x128xf32>
    %319 = arith.addf %318, %6 : vector<1x128xf32>
    %320 = arith.mulf %315, %319 : vector<1x128xf32>
    %321 = arith.addf %317, %320 : vector<1x128xf32>
    %322 = math.tanh %321 : vector<1x128xf32>
    %cst_51 = arith.constant 1.000000e+00 : f32
    %323 = vector.broadcast %cst_51 : f32 to vector<1x128xf32>
    %324 = arith.subf %323, %316 : vector<1x128xf32>
    %325 = arith.mulf %324, %322 : vector<1x128xf32>
    %326 = arith.mulf %316, %305 : vector<1x128xf32>
    %327 = arith.addf %325, %326 : vector<1x128xf32>
    %cst_52 = arith.constant dense<0.000000e+00> : vector<1x384xf32>
    %328 = tpu.matmul %327, %2, %cst_52 {dimension_numbers = #tpu.dot_dimension_numbers<[1], [0], [0], [1], [0, 0, 1, 1], [], []>} : vector<1x128xf32>, vector<128x384xf32>, vector<1x384xf32> -> vector<1x384xf32>
    %329 = vector.extract_strided_slice %5 {offsets = [0, 0], sizes = [1, 256], strides = [1, 1]} : vector<1x384xf32> to vector<1x256xf32>
    %330 = vector.extract_strided_slice %328 {offsets = [0, 0], sizes = [1, 256], strides = [1, 1]} : vector<1x384xf32> to vector<1x256xf32>
    %331 = arith.addf %329, %330 : vector<1x256xf32>
    %332 = arith.negf %331 : vector<1x256xf32>
    %333 = math.exp %332 : vector<1x256xf32>
    %cst_53 = arith.constant 1.000000e+00 : f32
    %334 = vector.broadcast %cst_53 : f32 to vector<1x256xf32>
    %335 = arith.addf %334, %333 : vector<1x256xf32>
    %336 = arith.divf %334, %335 : vector<1x256xf32>
    %337 = vector.extract_strided_slice %336 {offsets = [0, 0], sizes = [1, 128], strides = [1, 1]} : vector<1x256xf32> to vector<1x128xf32>
    %338 = vector.extract_strided_slice %336 {offsets = [0, 128], sizes = [1, 128], strides = [1, 1]} : vector<1x256xf32> to vector<1x128xf32>
    %339 = vector.extract_strided_slice %5 {offsets = [0, 256], sizes = [1, 128], strides = [1, 1]} : vector<1x384xf32> to vector<1x128xf32>
    %340 = vector.extract_strided_slice %328 {offsets = [0, 256], sizes = [1, 128], strides = [1, 1]} : vector<1x384xf32> to vector<1x128xf32>
    %341 = arith.addf %340, %6 : vector<1x128xf32>
    %342 = arith.mulf %337, %341 : vector<1x128xf32>
    %343 = arith.addf %339, %342 : vector<1x128xf32>
    %344 = math.tanh %343 : vector<1x128xf32>
    %cst_54 = arith.constant 1.000000e+00 : f32
    %345 = vector.broadcast %cst_54 : f32 to vector<1x128xf32>
    %346 = arith.subf %345, %338 : vector<1x128xf32>
    %347 = arith.mulf %346, %344 : vector<1x128xf32>
    %348 = arith.mulf %338, %327 : vector<1x128xf32>
    %349 = arith.addf %347, %348 : vector<1x128xf32>
    %cst_55 = arith.constant dense<0.000000e+00> : vector<1x384xf32>
    %350 = tpu.matmul %349, %2, %cst_55 {dimension_numbers = #tpu.dot_dimension_numbers<[1], [0], [0], [1], [0, 0, 1, 1], [], []>} : vector<1x128xf32>, vector<128x384xf32>, vector<1x384xf32> -> vector<1x384xf32>
    %351 = vector.extract_strided_slice %5 {offsets = [0, 0], sizes = [1, 256], strides = [1, 1]} : vector<1x384xf32> to vector<1x256xf32>
    %352 = vector.extract_strided_slice %350 {offsets = [0, 0], sizes = [1, 256], strides = [1, 1]} : vector<1x384xf32> to vector<1x256xf32>
    %353 = arith.addf %351, %352 : vector<1x256xf32>
    %354 = arith.negf %353 : vector<1x256xf32>
    %355 = math.exp %354 : vector<1x256xf32>
    %cst_56 = arith.constant 1.000000e+00 : f32
    %356 = vector.broadcast %cst_56 : f32 to vector<1x256xf32>
    %357 = arith.addf %356, %355 : vector<1x256xf32>
    %358 = arith.divf %356, %357 : vector<1x256xf32>
    %359 = vector.extract_strided_slice %358 {offsets = [0, 0], sizes = [1, 128], strides = [1, 1]} : vector<1x256xf32> to vector<1x128xf32>
    %360 = vector.extract_strided_slice %358 {offsets = [0, 128], sizes = [1, 128], strides = [1, 1]} : vector<1x256xf32> to vector<1x128xf32>
    %361 = vector.extract_strided_slice %5 {offsets = [0, 256], sizes = [1, 128], strides = [1, 1]} : vector<1x384xf32> to vector<1x128xf32>
    %362 = vector.extract_strided_slice %350 {offsets = [0, 256], sizes = [1, 128], strides = [1, 1]} : vector<1x384xf32> to vector<1x128xf32>
    %363 = arith.addf %362, %6 : vector<1x128xf32>
    %364 = arith.mulf %359, %363 : vector<1x128xf32>
    %365 = arith.addf %361, %364 : vector<1x128xf32>
    %366 = math.tanh %365 : vector<1x128xf32>
    %cst_57 = arith.constant 1.000000e+00 : f32
    %367 = vector.broadcast %cst_57 : f32 to vector<1x128xf32>
    %368 = arith.subf %367, %360 : vector<1x128xf32>
    %369 = arith.mulf %368, %366 : vector<1x128xf32>
    %370 = arith.mulf %360, %349 : vector<1x128xf32>
    %371 = arith.addf %369, %370 : vector<1x128xf32>
    %372 = tpu.concatenate %34, %57, %80, %103, %126, %149, %172, %195, %371, %349, %327, %305, %283, %261, %239, %217 in 0 : vector<1x128xf32>, vector<1x128xf32>, vector<1x128xf32>, vector<1x128xf32>, vector<1x128xf32>, vector<1x128xf32>, vector<1x128xf32>, vector<1x128xf32>, vector<1x128xf32>, vector<1x128xf32>, vector<1x128xf32>, vector<1x128xf32>, vector<1x128xf32>, vector<1x128xf32>, vector<1x128xf32>, vector<1x128xf32> -> vector<16x128xf32>
    %c0_58 = arith.constant 0 : index
    %c0_59 = arith.constant 0 : index
    %373 = vector.load %arg3[%c0_58, %c0_59] : memref<16x128xf32, #tpu.memory_space<vmem>>, vector<16x128xf32>
    tpu.vector_store %arg3[%c0_58, %c0_59], %372 {strides = array<i32>} : memref<16x128xf32, #tpu.memory_space<vmem>>, vector<16x128xf32>,
    return
  }
}

</mosaic_0001>

<bundles_post_ra>
// kernel: tpu_custom_call.1
= control target key start
LH: loop header
LB: loop body
LE: loop exit
PB: predicated region body
PF: predicated region fallthrough
CT: control target
= control target key end

     0   :  { %8 = vsyncpa [#allocation3], 0  ;;  %s4369_s0 = inlined_call_operand.hbm [shape: f32[8,32], index: 0, kind: input, shape index: {}]   ;;  %s4370_s1 = inlined_call_operand.hbm [shape: f32[288,384], index: 1, kind: input, shape index: {}]   ;;  %s4371_s2 = inlined_call_operand.hbm [shape: f32[4,384], index: 2, kind: input, shape index: {}]   ;;  %s4372_s3 = inlined_call_operand.hbm [shape: f32[16,128], index: 3, kind: output, shape index: {}]  }
   0x1   :  { %9 = vsyncpa [#allocation6], 0  ;;  %s26_s14 = sshll.u32 %s4370_s1, 4  ;;  %s27_s14 = int_to_ptr.hbm [resolvable:$true] %s26_s14 }
   0x2   :  { %10 = vsyncpa [#allocation4], 0  ;;  %s2900_s15 = smov [#allocation5]   ;;  %s16_s19 = sshll.u32 %s4369_s0, 4  ;;  %s17_s19 = int_to_ptr.hbm [resolvable:$true] %s16_s19 }
   0x3   :  { %s28_s16 = sshll.u32 %s2900_s15, 4  ;;  %s2901_s20 = smov 384   ;;  %s29_s16 = int_to_ptr.vmem [resolvable:$true] %s28_s16 }
   0x4   :  { %s2902_s21 = smov 24   ;;  %s2903_s22 = smov [#allocation2]  }
   0x5   :  { %34 = dma.hbm_to_vmem [thread:$0]  %s27_s14, 13824, %s29_s16, [#allocation6], %s2901_s20, %s2901_s20, %s2902_s21  }
   0x6   :  { %s18_s23 = sshll.u32 %s2903_s22, 4  ;;  %s40_s26 = sshll.u32 %s4371_s2, 4  ;;  %s19_s23 = int_to_ptr.vmem [resolvable:$true] %s18_s23  ;;  %s41_s26 = int_to_ptr.hbm [resolvable:$true] %s40_s26 }
   0x7   :  { %21 = dma.hbm_to_vmem [thread:$0]  %s17_s19, 128, %s19_s23, [#allocation3]  }
   0x8   :  { %s2904_s1 = smov [#allocation7]  }
   0x9   :  { %s42_s27 = sshll.u32 %s2904_s1, 4  ;;  %s43_s27 = int_to_ptr.vmem [resolvable:$true] %s42_s27 }
   0xa   :  { %45 = dma.hbm_to_vmem [thread:$0]  %s41_s26, 192, %s43_s27, [#allocation6]  }
   0xb   :  { %2894 = dma.done.wait [#allocation3], 128  }
   0xc   :  { %2895 = vsyncadd [#allocation3], 4294967168 }
   0xd   :  { %2896 = dma.done.wait [#allocation6], 14016  }
   0xe   :  { %2897 = vsyncadd [#allocation6], 4294953280  ;;  %v67_v0 = vld [vmem:[#allocation5 + $0x48] sm:$0xff]  ;;  %v64_v1 = vld [vmem:[#allocation5 + $0x30] sm:$0xff]  ;;  %vm179_vm0 = vcmask 261120   ;;  %s2906_s0 = smov [#allocation8]  }
   0xf   :  { %v61_v2 = vld [vmem:[#allocation5 + $0x18] sm:$0xff]  ;;  %v2938_v3 = vand.u32 4294901760, %v67_v0  ;;  %v2940_v4 = vand.u32 4294901760, %v64_v1  ;;  %v58_v6 = vld [vmem:[#allocation5] sm:$0xff]  ;;  %v68_v7 = vld [vmem:[#allocation5 + $0x50] sm:$0xff]  ;;  %s2524_s2 = sshll.u32 %s2906_s0, 4  ;;  %s2525_s2 = int_to_ptr.vmem [resolvable:$true] %s2524_s2 }
  0x10   :  { %v2942_v5 = vand.u32 4294901760, %v61_v2  ;;  %v65_v8 = vld [vmem:[#allocation5 + $0x38] sm:$0xff]  ;;  %v2944_v9 = vand.u32 4294901760, %v58_v6  ;;  %v2946_v10 = vand.u32 4294901760, %v68_v7  ;;  %v62_v12 = vld [vmem:[#allocation5 + $0x20] sm:$0xff]  ;;  %v59_v18 = vld [vmem:[#allocation5 + $0x8] sm:$0xff] }
  0x11   :  { %v2948_v11 = vand.u32 4294901760, %v65_v8  ;;  %v171_v13 = vld [vmem:[#allocation2] sm:$0xff]  ;;  %296 = vmatpush.msra.mxu3 %v2938_v3  ;;  %v2952_v14 = vsub.f32 %v67_v0, %v2938_v3  ;;  %v2955_v15 = vsub.f32 %v64_v1, %v2940_v4  ;;  %196 = vmatpush.msra.mxu0 %v2938_v3  ;;  %v2961_v17 = vand.u32 4294901760, %v62_v12  ;;  %v66_v57 = vld [vmem:[#allocation5 + $0x40] sm:$0xff]  ;;  %v63_v58 = vld [vmem:[#allocation5 + $0x28] sm:$0xff]  ;;  %s2526_s30 = sshll.u32 %s4372_s3, 4  ;;  %s2527_s30 = int_to_ptr.hbm [resolvable:$true] %s2526_s30 }
  0x12   :  { %v2958_v16 = vsub.f32 %v61_v2, %v2942_v5  ;;  %v2964_v19 = vsub.f32 %v58_v6, %v2944_v9  ;;  %v2967_v20 = vsub.f32 %v68_v7, %v2946_v10  ;;  %v181_v22 = vsel %vm179_vm0, %v171_v13, 0  ;;  %v69_v55 = vld [vmem:[#allocation5 + $0x58] sm:$0xff]  ;;  %v60_v62 = vld [vmem:[#allocation5 + $0x10] sm:$0xff]  ;;  %v3076_v6 = vld [vmem:[#allocation5 + $0x1c8] sm:$0xff]  ;;  %s2907_s3 = smov 128   ;;  %s2908_s4 = smov 8  }
  0x13   :  { %v2970_v21 = vsub.f32 %v65_v8, %v2948_v11  ;;  %267 = vmatpush.msra.mxu2 %v2952_v14  ;;  %298 = vmatpush.msra.mxu3 %v2940_v4  ;;  %v226_v23 = vand.u32 4294901760, %v2952_v14  ;;  %v2977_v24 = vsub.f32 %v62_v12, %v2961_v17  ;;  %v232_v25 = vand.u32 4294901760, %v2955_v15  ;;  %v3083_v8 = vld [vmem:[#allocation5 + $0x1b8] sm:$0xff] }
  0x14   :  { %v2980_v26 = vand.u32 4294901760, %v181_v22  ;;  %v411_v27 = vand.u32 4294901760, %v2967_v20  ;;  %198 = vmatpush.msra.mxu0 %v2940_v4  ;;  %v2985_v29 = vand.u32 4294901760, %v59_v18  ;;  %v238_v30 = vand.u32 4294901760, %v2958_v16  ;;  %v3099_v13 = vld [vmem:[#allocation5 + $0x198] sm:$0xff] }
  0x15   :  { %v417_v28 = vand.u32 4294901760, %v2970_v21  ;;  %270 = vmatpush.msra.mxu2 %v2955_v15  ;;  %300 = vmatpush.msra.mxu3 %v2942_v5  ;;  %v227_v31 = vsub.f32 %v2952_v14, %v226_v23  ;;  %v423_v32 = vand.u32 4294901760, %v2977_v24  ;;  %v233_v33 = vsub.f32 %v2955_v15, %v232_v25  ;;  %v3103_v15 = vld [vmem:[#allocation5 + $0x188] sm:$0xff] }
  0x16   :  { %v2994_v34 = vsub.f32 %v181_v22, %v2980_v26  ;;  %v412_v35 = vsub.f32 %v2967_v20, %v411_v27  ;;  %200 = vmatpush.msra.mxu0 %v2942_v5  ;;  %v3000_v37 = vsub.f32 %v59_v18, %v2985_v29  ;;  %v239_v38 = vsub.f32 %v2958_v16, %v238_v30  ;;  %v3121_v22 = vld [vmem:[#allocation5 + $0x158] sm:$0xff] }
  0x17   :  { %v418_v36 = vsub.f32 %v2970_v21, %v417_v28  ;;  %273 = vmatpush.msra.mxu2 %v2958_v16  ;;  %302 = vmatpush.msra.mxu3 %v2944_v9  ;;  %v228_v39 = vand.u32 4294901760, %v227_v31  ;;  %v424_v40 = vsub.f32 %v2977_v24, %v423_v32  ;;  %v234_v41 = vand.u32 4294901760, %v233_v33  ;;  %v3141_v31 = vld [vmem:[#allocation5 + $0x120] sm:$0xff]  ;;  %v3148_v33 = vld [vmem:[#allocation5 + $0x108] sm:$0xff] }
  0x18   :  { %v3007_v42 = vand.u32 4294901760, %v2994_v34  ;;  %v413_v43 = vand.u32 4294901760, %v412_v35  ;;  %v429_v45 = vand.u32 4294901760, %v3000_v37  ;;  %202 = vmatpush.msra.mxu0 %v2944_v9  ;;  %v240_v46 = vand.u32 4294901760, %v239_v38  ;;  %v3155_v35 = vld [vmem:[#allocation5 + $0xf0] sm:$0xff]  ;;  %v3169_v38 = vld [vmem:[#allocation5 + $0xc8] sm:$0xff] }
  0x19   :  { %v419_v44 = vand.u32 4294901760, %v418_v36  ;;  %276 = vmatpush.msra.mxu2 %v2964_v19  ;;  %229 = vmatpush.msra.mxu1 %v228_v39  ;;  %v244_v48 = vand.u32 4294901760, %v2964_v19  ;;  %v425_v49 = vand.u32 4294901760, %v424_v40  ;;  %v3028_v56 = vand.u32 4294901760, %v69_v55  ;;  %v3160_v36 = vld [vmem:[#allocation5 + $0xe0] sm:$0xff]  ;;  %4422 = vst [vmem:[#allocation12_spill] sm:$0xff] %v3169_v38 }
  0x1a   :  { %v206_v47 = vsub.f32 %v2994_v34, %v3007_v42  ;;  %414 = vmatpush.msrb.mxu3 %v413_v43  ;;  %v430_v50 = vsub.f32 %v3000_v37, %v429_v45  ;;  %279 = vmatmul.f32.vlgmr.msra.gmra.mxu2 %v2994_v34  ;;  %v3033_v59 = vand.u32 4294901760, %v66_v57  ;;  %v3041_v61 = vand.u32 4294901760, %v63_v58  ;;  %v3173_v39 = vld [vmem:[#allocation5 + $0xc0] sm:$0xff]  ;;  %v3178_v40 = vld [vmem:[#allocation5 + $0xb0] sm:$0xff]  ;;  %v3188_v43 = vld [vmem:[#allocation5 + $0x1d8] sm:$0xff] }
  0x1b   :  { %381 = vmatpush.msrb.mxu2 %v2946_v10  ;;  %235 = vmatpush.msra.mxu1 %v234_v41  ;;  %v245_v52 = vsub.f32 %v2964_v19, %v244_v48  ;;  %v3037_v60 = vsub.f32 %v69_v55, %v3028_v56  ;;  %v3050_v0 = vand.u32 4294901760, %v60_v62  ;;  %v3111_v19 = vld [vmem:[#allocation5 + $0x170] sm:$0xff]  ;;  %4423 = vst [vmem:[#allocation13_spill] sm:$0xff] %v3178_v40  ;;  %v3182_v41 = vld [vmem:[#allocation5 + $0xa8] sm:$0xff] }
  0x1c   :  { %306 = vmatmul.f32.vlgmr.msra.gmra.mxu3 %v3007_v42  ;;  %v3018_v51 = vand.u32 4294901760, %v206_v47  ;;  %v431_v53 = vand.u32 4294901760, %v430_v50  ;;  %325 = vmatpush.msrb.mxu0 %v226_v23  ;;  %v3046_v63 = vsub.f32 %v66_v57, %v3033_v59  ;;  %v3055_v1 = vsub.f32 %v63_v58, %v3041_v61  ;;  %4424 = vst [vmem:[#allocation14_spill] sm:$0xff] %v3182_v41  ;;  %v3201_v47 = vld [vmem:[#allocation5 + $0x78] sm:$0xff]  ;;  %v3211_v50 = vld [vmem:[#allocation5 + $0x60] sm:$0xff]  ;;  %v3238_v55 = vld [vmem:[#allocation5 + $0x130] sm:$0xff] }
  0x1d   :  { %420 = vmatpush.msrb.mxu3 %v419_v44  ;;  %383 = vmatpush.msrb.mxu2 %v2948_v11  ;;  %v246_v54 = vand.u32 4294901760, %v245_v52  ;;  %v596_v2 = vand.u32 4294901760, %v3037_v60  ;;  %v3191_v44 = vld [vmem:[#allocation5 + $0x90] sm:$0xff]  ;;  %4428 = vst [vmem:[#allocation18_spill] sm:$0xff] %v3201_v47  ;;  %v3222_v52 = vld [vmem:[#allocation5 + $0x178] sm:$0xff]  ;;  %v3250_v57 = vld [vmem:[#allocation5 + $0x100] sm:$0xff] }
  0x1e   :  { %241 = vmatpush.msra.mxu1 %v240_v46  ;;  %208 = vmatmul.f32.vlgmr.msra.gmra.mxu0 %v3018_v51  ;;  %v608_v12 = vand.u32 4294901760, %v3055_v1  ;;  %4426 = vst [vmem:[#allocation16_spill] sm:$0xff] %v3191_v44  ;;  %v3198_v46 = vld [vmem:[#allocation5 + $0x1c0] sm:$0xff]  ;;  %v3256_v58 = vld [vmem:[#allocation5 + $0xe8] sm:$0xff] }
  0x1f   :  { %426 = vmatpush.msrb.mxu3 %v425_v49  ;;  %385 = vmatpush.msrb.mxu2 %v2961_v17  ;;  %v597_v7 = vsub.f32 %v3037_v60, %v596_v2  ;;  %v3208_v49 = vld [vmem:[#allocation5 + $0x1a8] sm:$0xff]  ;;  %4430 = vst [vmem:[#allocation20_spill] sm:$0xff] %v3211_v50 }
  0x20   :  { %247 = vmatpush.msra.mxu1 %v246_v54  ;;  %329 = vmatpush.msrb.mxu0 %v232_v25  ;;  %v3129_v25 = vld [vmem:[#allocation5 + $0x140] sm:$0xff]  ;;  %v3232_v54 = vld [vmem:[#allocation5 + $0x148] sm:$0xff] }
  0x21   :  { %432 = vmatpush.msrb.mxu3 %v431_v53  ;;  %387 = vmatpush.msrb.mxu2 %v2985_v29  ;;  %v598_v14 = vand.u32 4294901760, %v597_v7  ;;  %v3226_v53 = vld [vmem:[#allocation5 + $0x160] sm:$0xff] }
  0x22   :  { %249 = vmatmul.f32.vlgmr.msra.gmra.mxu1 %v2980_v26  ;;  %333 = vmatpush.msrb.mxu0 %v238_v30  ;;  %v166_v7 = vld [vmem:[#allocation7] ss:$4 sm:$0x7] }
  0x23   :  { %541 = vmatpush.msra.mxu3 %v2946_v10  ;;  %510 = vmatpush.msra.mxu2 %v411_v27 }
  0x24   :  { %356 = vmatpush.msrb.mxu1 %v2938_v3  ;;  %434 = vmatmul.f32.vlgmr.msrb.gmra.mxu3 %v2980_v26  ;;  %v3065_v3 = vsub.f32 %v60_v62, %v3050_v0  ;;  %v3280_v62 = vld [vmem:[#allocation5 + $0x88] sm:$0xff] }
  0x25   :  { %543 = vmatpush.msra.mxu3 %v2948_v11  ;;  %514 = vmatpush.msra.mxu2 %v417_v28  ;;  %v3133_v28 = vld [vmem:[#allocation5 + $0x138] sm:$0xff]  ;;  %4433 = vst [vmem:[#allocation23_spill] sm:$0xff] %v3280_v62 }
  0x26   :  { %358 = vmatpush.msrb.mxu1 %v2940_v4  ;;  %393 = vmatmul.f32.vlgmr.msrb.gmra.mxu2 %v3018_v51  ;;  %v3069_v4 = vld [vmem:[#allocation5 + $0x1d0] sm:$0xff]  ;;  %v614_v16 = vand.u32 4294901760, %v3065_v3 }
  0x27   :  { %545 = vmatpush.msra.mxu3 %v2961_v17  ;;  %518 = vmatpush.msra.mxu2 %v423_v32  ;;  %v3145_v32 = vld [vmem:[#allocation5 + $0x110] sm:$0xff] }
  0x28   :  { %337 = vmatpush.msrb.mxu0 %v244_v48  ;;  %360 = vmatpush.msrb.mxu1 %v2942_v5  ;;  %v602_v5 = vand.u32 4294901760, %v3046_v63  ;;  %v615_v23 = vsub.f32 %v3065_v3, %v614_v16  ;;  %v3205_v48 = vld [vmem:[#allocation5 + $0x68] sm:$0xff] }
  0x29   :  { %547 = vmatpush.msra.mxu3 %v2985_v29  ;;  %522 = vmatpush.msra.mxu2 %v429_v45  ;;  %v3195_v45 = vld [vmem:[#allocation5 + $0x80] sm:$0xff]  ;;  %4429 = vst [vmem:[#allocation19_spill] sm:$0xff] %v3205_v48 }
  0x2a   :  { %339 = vmatmul.f32.vlgmr.msrb.gmra.mxu0 %v2980_v26  ;;  %362 = vmatpush.msrb.mxu1 %v2944_v9  ;;  %v3087_v9 = vld [vmem:[#allocation5 + $0x1b0] sm:$0xff]  ;;  %v616_v30 = vand.u32 4294901760, %v615_v23  ;;  %4427 = vst [vmem:[#allocation17_spill] sm:$0xff] %v3195_v45 }
  0x2b   :  { %666 = vmatpush.msrb.mxu3 %v3028_v56  ;;  %637 = vmatpush.msrb.mxu2 %v3037_v60  ;;  %v3268_v60 = vld [vmem:[#allocation5 + $0xb8] sm:$0xff] }
  0x2c   :  { %452 = vmatpush.msra.mxu0 %v2967_v20  ;;  %364 = vmatmul.f32.vlgmr.msrb.gmra.mxu1 %v2980_v26  ;;  %v609_v20 = vsub.f32 %v3055_v1, %v608_v12  ;;  %4431 = vst [vmem:[#allocation21_spill] sm:$0xff] %v3268_v60 }
  0x2d   :  { %668 = vmatpush.msrb.mxu3 %v3033_v59  ;;  %640 = vmatpush.msrb.mxu2 %v3046_v63 }
  0x2e   :  { %455 = vmatpush.msra.mxu0 %v2970_v21  ;;  %481 = vmatpush.msra.mxu1 %v2946_v10  ;;  %v603_v10 = vsub.f32 %v3046_v63, %v602_v5  ;;  %v3118_v21 = vld [vmem:[#allocation5 + $0x168] sm:$0xff]  ;;  %v610_v27 = vand.u32 4294901760, %v609_v20  ;;  %v3286_v63 = vld [vmem:[#allocation5 + $0x70] sm:$0xff] }
  0x2f   :  { %670 = vmatpush.msrb.mxu3 %v3041_v61  ;;  %643 = vmatpush.msrb.mxu2 %v3055_v1  ;;  %4434 = vst [vmem:[#allocation24_spill] sm:$0xff] %v3286_v63 }
  0x30   :  { %458 = vmatpush.msra.mxu0 %v2977_v24  ;;  %483 = vmatpush.msra.mxu1 %v2948_v11  ;;  %v3094_v11 = vld [vmem:[#allocation5 + $0x1a0] sm:$0xff]  ;;  %v604_v18 = vand.u32 4294901760, %v603_v10  ;;  %v3126_v24 = vld [vmem:[#allocation5 + $0x150] sm:$0xff] }
  0x31   :  { %672 = vmatpush.msrb.mxu3 %v3050_v0  ;;  %646 = vmatpush.msrb.mxu2 %v3065_v3 }
  0x32   :  { %549 = vmatmul.f32.vlgmr.msra.gmra.mxu3 %v2980_v26  ;;  %524 = vmatmul.f32.vlgmr.msra.gmra.mxu2 %v2980_v26 }
  0x33   :  { %758 = vmatpush.msra.mxu3 %v3069_v4  ;;  %461 = vmatpush.msra.mxu0 %v3000_v37  ;;  %v3164_v37 = vld [vmem:[#allocation5 + $0xd8] sm:$0xff] }
  0x34   :  { %738 = vmatpush.msra.mxu2 %v3076_v6  ;;  %485 = vmatpush.msra.mxu1 %v2961_v17  ;;  %v3108_v17 = vld [vmem:[#allocation5 + $0x180] sm:$0xff] }
  0x35   :  { %759 = vmatpush.msra.mxu3 %v3083_v8  ;;  %464 = vmatmul.f32.vlgmr.msra.gmra.mxu0 %v2994_v34 }
  0x36   :  { %739 = vmatpush.msra.mxu2 %v3087_v9  ;;  %487 = vmatpush.msra.mxu1 %v2985_v29  ;;  %v3137_v29 = vld [vmem:[#allocation5 + $0x128] sm:$0xff] }
  0x37   :  { %760 = vmatpush.msra.mxu3 %v3094_v11  ;;  %491 = vmatmul.f32.vlgmr.msra.gmra.mxu1 %v3007_v42 }
  0x38   :  { %740 = vmatpush.msra.mxu2 %v3099_v13  ;;  %566 = vmatpush.msrb.mxu0 %v3028_v56 }
  0x39   :  { %761 = vmatpush.msra.mxu3 %v3103_v15  ;;  %599 = vmatpush.msrb.mxu1 %v598_v14  ;;  %v174_v14 = vperm.slane %v166_v7, 1 }
  0x3a   :  { %741 = vmatpush.msra.mxu2 %v3108_v17  ;;  %568 = vmatpush.msrb.mxu0 %v3033_v59 }
  0x3b   :  { %762 = vmatpush.msra.mxu3 %v3111_v19  ;;  %605 = vmatpush.msrb.mxu1 %v604_v18 }
  0x3c   :  { %742 = vmatpush.msra.mxu2 %v3118_v21  ;;  %570 = vmatpush.msrb.mxu0 %v3041_v61 }
  0x3d   :  { %763 = vmatpush.msra.mxu3 %v3121_v22  ;;  %649 = vmatmul.f32.vlgmr.msrb.gmra.mxu2 %v2994_v34  ;;  %v3152_v34 = vld [vmem:[#allocation5 + $0xf8] sm:$0xff] }
  0x3e   :  { %743 = vmatpush.msra.mxu2 %v3126_v24  ;;  %676 = vmatmul.f32.vlgmr.msrb.gmra.mxu3 %v3007_v42  ;;  %v3185_v42 = vld [vmem:[#allocation5 + $0x98] sm:$0xff] }
  0x3f   :  { %764 = vmatpush.msra.mxu3 %v3129_v25  ;;  %572 = vmatpush.msrb.mxu0 %v3050_v0  ;;  %4425 = vst [vmem:[#allocation15_spill] sm:$0xff] %v3185_v42 }
  0x40   :  { %744 = vmatpush.msra.mxu2 %v3133_v28  ;;  %611 = vmatpush.msrb.mxu1 %v610_v27 }
  0x41   :  { %765 = vmatpush.msra.mxu3 %v3137_v29  ;;  %578 = vmatmul.f32.vlgmr.msrb.gmra.mxu0 %v3018_v51  ;;  %v3215_v51 = vld [vmem:[#allocation5 + $0x190] sm:$0xff] }
  0x42   :  { %745 = vmatpush.msra.mxu2 %v3141_v31  ;;  %617 = vmatpush.msrb.mxu1 %v616_v30 }
  0x43   :  { %766 = vmatpush.msra.mxu3 %v3145_v32  ;;  %695 = vmatpush.msra.mxu0 %v596_v2 }
  0x44   :  { %746 = vmatpush.msra.mxu2 %v3148_v33  ;;  %619 = vmatmul.f32.vlgmr.msrb.gmra.mxu1 %v2980_v26 }
  0x45   :  { %767 = vmatpush.msra.mxu3 %v3152_v34  ;;  %699 = vmatpush.msra.mxu0 %v602_v5 }
  0x46   :  { %747 = vmatpush.msra.mxu2 %v3155_v35  ;;  %726 = vmatpush.msra.mxu1 %v3028_v56  ;;  %v3244_v56 = vld [vmem:[#allocation5 + $0x118] sm:$0xff] }
  0x47   :  { %768 = vmatpush.msra.mxu3 %v3160_v36  ;;  %703 = vmatpush.msra.mxu0 %v608_v12 }
  0x48   :  { %748 = vmatpush.msra.mxu2 %v3164_v37  ;;  %728 = vmatpush.msra.mxu1 %v3033_v59  ;;  %v3262_v59 = vld [vmem:[#allocation5 + $0xd0] sm:$0xff] }
  0x49   :  { %769 = vmatpush.msra.mxu3 %v3169_v38  ;;  %707 = vmatpush.msra.mxu0 %v614_v16  ;;  %v173_v16 = vperm.slane %v166_v7, 0 }
  0x4a   :  { %749 = vmatpush.msra.mxu2 %v3173_v39  ;;  %730 = vmatpush.msra.mxu1 %v3041_v61  ;;  %v3274_v61 = vld [vmem:[#allocation5 + $0xa0] sm:$0xff] }
  0x4b   :  { %770 = vmatpush.msra.mxu3 %v3178_v40  ;;  %709 = vmatmul.f32.vlgmr.msra.gmra.mxu0 %v2980_v26  ;;  %4432 = vst [vmem:[#allocation22_spill] sm:$0xff] %v3274_v61 }
  0x4c   :  { %750 = vmatpush.msra.mxu2 %v3182_v41  ;;  %732 = vmatpush.msra.mxu1 %v3050_v0 }
  0x4d   :  { %771 = vmatpush.msra.mxu3 %v3185_v42  ;;  %778 = vmatpush.msrb.mxu0 %v3188_v43 }
  0x4e   :  { %751 = vmatpush.msra.mxu2 %v3191_v44  ;;  %734 = vmatmul.f32.vlgmr.msra.gmra.mxu1 %v2980_v26  ;;  %v2905_v26 = vmov 0.0  }
  0x4f   :  { %772 = vmatpush.msra.mxu3 %v3195_v45  ;;  %779 = vmatpush.msrb.mxu0 %v3198_v46 }
  0x50   :  { %752 = vmatpush.msra.mxu2 %v3201_v47  ;;  %846 = vmatpush.msrb.mxu1 %v3076_v6 }
  0x51   :  { %773 = vmatpush.msra.mxu3 %v3205_v48  ;;  %780 = vmatpush.msrb.mxu0 %v3208_v49 }
  0x52   :  { %753 = vmatpush.msra.mxu2 %v3211_v50  ;;  %774 = vmatmul.f32.vlgmr.msra.gmra.mxu3 %v2905_v26 }
  0x53   :  { %754 = vmatmul.f32.vlgmr.msra.gmra.mxu2 %v2905_v26  ;;  %781 = vmatpush.msrb.mxu0 %v3215_v51 }
  0x54   :  { %866 = vmatpush.msrb.mxu2 %v3069_v4  ;;  %886 = vmatpush.msrb.mxu3 %v3188_v43 }
  0x55   :  { %782 = vmatpush.msrb.mxu0 %v3222_v52  ;;  %847 = vmatpush.msrb.mxu1 %v3087_v9 }
  0x56   :  { %867 = vmatpush.msrb.mxu2 %v3083_v8  ;;  %887 = vmatpush.msrb.mxu3 %v3198_v46 }
  0x57   :  { %783 = vmatpush.msrb.mxu0 %v3226_v53  ;;  %848 = vmatpush.msrb.mxu1 %v3099_v13 }
  0x58   :  { %868 = vmatpush.msrb.mxu2 %v3094_v11  ;;  %888 = vmatpush.msrb.mxu3 %v3208_v49 }
  0x59   :  { %784 = vmatpush.msrb.mxu0 %v3232_v54  ;;  %849 = vmatpush.msrb.mxu1 %v3108_v17 }
  0x5a   :  { %869 = vmatpush.msrb.mxu2 %v3103_v15  ;;  %889 = vmatpush.msrb.mxu3 %v3215_v51 }
  0x5b   :  { %785 = vmatpush.msrb.mxu0 %v3238_v55  ;;  %850 = vmatpush.msrb.mxu1 %v3118_v21 }
  0x5c   :  { %870 = vmatpush.msrb.mxu2 %v3111_v19  ;;  %890 = vmatpush.msrb.mxu3 %v3222_v52 }
  0x5d   :  { %786 = vmatpush.msrb.mxu0 %v3244_v56  ;;  %851 = vmatpush.msrb.mxu1 %v3126_v24 }
  0x5e   :  { %871 = vmatpush.msrb.mxu2 %v3121_v22  ;;  %891 = vmatpush.msrb.mxu3 %v3226_v53 }
  0x5f   :  { %787 = vmatpush.msrb.mxu0 %v3250_v57  ;;  %852 = vmatpush.msrb.mxu1 %v3133_v28 }
  0x60   :  { %872 = vmatpush.msrb.mxu2 %v3129_v25  ;;  %892 = vmatpush.msrb.mxu3 %v3232_v54 }
  0x61   :  { %788 = vmatpush.msrb.mxu0 %v3256_v58  ;;  %853 = vmatpush.msrb.mxu1 %v3141_v31 }
  0x62   :  { %873 = vmatpush.msrb.mxu2 %v3137_v29  ;;  %893 = vmatpush.msrb.mxu3 %v3238_v55 }
  0x63   :  { %789 = vmatpush.msrb.mxu0 %v3262_v59  ;;  %854 = vmatpush.msrb.mxu1 %v3148_v33 }
  0x64   :  { %874 = vmatpush.msrb.mxu2 %v3145_v32  ;;  %894 = vmatpush.msrb.mxu3 %v3244_v56 }
  0x65   :  { %790 = vmatpush.msrb.mxu0 %v3268_v60  ;;  %855 = vmatpush.msrb.mxu1 %v3155_v35 }
  0x66   :  { %875 = vmatpush.msrb.mxu2 %v3152_v34  ;;  %895 = vmatpush.msrb.mxu3 %v3250_v57 }
  0x67   :  { %791 = vmatpush.msrb.mxu0 %v3274_v61  ;;  %856 = vmatpush.msrb.mxu1 %v3164_v37 }
  0x68   :  { %876 = vmatpush.msrb.mxu2 %v3160_v36  ;;  %896 = vmatpush.msrb.mxu3 %v3256_v58 }
  0x69   :  { %792 = vmatpush.msrb.mxu0 %v3280_v62  ;;  %857 = vmatpush.msrb.mxu1 %v3173_v39 }
  0x6a   :  { %877 = vmatpush.msrb.mxu2 %v3169_v38  ;;  %897 = vmatpush.msrb.mxu3 %v3262_v59 }
  0x6b   :  { %793 = vmatpush.msrb.mxu0 %v3286_v63  ;;  %858 = vmatpush.msrb.mxu1 %v3182_v41 }
  0x6c   :  { %794 = vmatmul.f32.vlgmr.msrb.gmra.mxu0 %v2905_v26  ;;  %878 = vmatpush.msrb.mxu2 %v3178_v40 }
  0x6d   :  { %898 = vmatpush.msrb.mxu3 %v3268_v60  ;;  %859 = vmatpush.msrb.mxu1 %v3191_v44 }
  0x6e   :  { %879 = vmatpush.msrb.mxu2 %v3185_v42  ;;  %969 = vmatpush.msra.mxu0 %v3076_v6 }
  0x6f   :  { %899 = vmatpush.msrb.mxu3 %v3274_v61  ;;  %860 = vmatpush.msrb.mxu1 %v3201_v47 }
  0x70   :  { %880 = vmatpush.msrb.mxu2 %v3195_v45  ;;  %970 = vmatpush.msra.mxu0 %v3087_v9 }
  0x71   :  { %900 = vmatpush.msrb.mxu3 %v3280_v62  ;;  %861 = vmatpush.msrb.mxu1 %v3211_v50 }
  0x72   :  { %881 = vmatpush.msrb.mxu2 %v3205_v48  ;;  %971 = vmatpush.msra.mxu0 %v3099_v13 }
  0x73   :  { %989 = vmatpush.msra.mxu1 %v3069_v4  ;;  %901 = vmatpush.msrb.mxu3 %v3286_v63 }
  0x74   :  { %1009 = vmatpush.msra.mxu2 %v3188_v43  ;;  %972 = vmatpush.msra.mxu0 %v3108_v17 }
  0x75   :  { %990 = vmatpush.msra.mxu1 %v3083_v8  ;;  %1091 = vmatpush.msra.mxu3 %v3076_v6 }
  0x76   :  { %1010 = vmatpush.msra.mxu2 %v3198_v46  ;;  %973 = vmatpush.msra.mxu0 %v3118_v21 }
  0x77   :  { %991 = vmatpush.msra.mxu1 %v3094_v11  ;;  %1092 = vmatpush.msra.mxu3 %v3087_v9 }
  0x78   :  { %1011 = vmatpush.msra.mxu2 %v3208_v49  ;;  %974 = vmatpush.msra.mxu0 %v3126_v24 }
  0x79   :  { %992 = vmatpush.msra.mxu1 %v3103_v15  ;;  %1093 = vmatpush.msra.mxu3 %v3099_v13 }
  0x7a   :  { %1012 = vmatpush.msra.mxu2 %v3215_v51  ;;  %975 = vmatpush.msra.mxu0 %v3133_v28 }
  0x7b   :  { %993 = vmatpush.msra.mxu1 %v3111_v19  ;;  %1094 = vmatpush.msra.mxu3 %v3108_v17 }
  0x7c   :  { %1013 = vmatpush.msra.mxu2 %v3222_v52  ;;  %976 = vmatpush.msra.mxu0 %v3141_v31 }
  0x7d   :  { %994 = vmatpush.msra.mxu1 %v3121_v22  ;;  %1095 = vmatpush.msra.mxu3 %v3118_v21 }
  0x7e   :  { %1014 = vmatpush.msra.mxu2 %v3226_v53  ;;  %977 = vmatpush.msra.mxu0 %v3148_v33 }
  0x7f   :  { %995 = vmatpush.msra.mxu1 %v3129_v25  ;;  %1096 = vmatpush.msra.mxu3 %v3126_v24 }
  0x80   :  { %1015 = vmatpush.msra.mxu2 %v3232_v54  ;;  %978 = vmatpush.msra.mxu0 %v3155_v35 }
  0x81   :  { %996 = vmatpush.msra.mxu1 %v3137_v29  ;;  %1097 = vmatpush.msra.mxu3 %v3133_v28 }
  0x82   :  { %1016 = vmatpush.msra.mxu2 %v3238_v55  ;;  %979 = vmatpush.msra.mxu0 %v3164_v37 }
  0x83   :  { %997 = vmatpush.msra.mxu1 %v3145_v32  ;;  %1098 = vmatpush.msra.mxu3 %v3141_v31 }
  0x84   :  { %1017 = vmatpush.msra.mxu2 %v3244_v56  ;;  %980 = vmatpush.msra.mxu0 %v3173_v39 }
  0x85   :  { %998 = vmatpush.msra.mxu1 %v3152_v34  ;;  %1099 = vmatpush.msra.mxu3 %v3148_v33 }
  0x86   :  { %1018 = vmatpush.msra.mxu2 %v3250_v57  ;;  %981 = vmatpush.msra.mxu0 %v3182_v41 }
  0x87   :  { %999 = vmatpush.msra.mxu1 %v3160_v36  ;;  %1100 = vmatpush.msra.mxu3 %v3155_v35 }
  0x88   :  { %1019 = vmatpush.msra.mxu2 %v3256_v58  ;;  %982 = vmatpush.msra.mxu0 %v3191_v44 }
  0x89   :  { %1000 = vmatpush.msra.mxu1 %v3169_v38  ;;  %1101 = vmatpush.msra.mxu3 %v3164_v37 }
  0x8a   :  { %1020 = vmatpush.msra.mxu2 %v3262_v59  ;;  %983 = vmatpush.msra.mxu0 %v3201_v47 }
  0x8b   :  { %1001 = vmatpush.msra.mxu1 %v3178_v40  ;;  %1102 = vmatpush.msra.mxu3 %v3173_v39 }
  0x8c   :  { %1021 = vmatpush.msra.mxu2 %v3268_v60  ;;  %984 = vmatpush.msra.mxu0 %v3211_v50 }
  0x8d   :  { %1002 = vmatpush.msra.mxu1 %v3185_v42  ;;  %1103 = vmatpush.msra.mxu3 %v3182_v41 }
  0x8e   :  { %1022 = vmatpush.msra.mxu2 %v3274_v61  ;;  %1111 = vmatpush.msrb.mxu0 %v3069_v4 }
  0x8f   :  { %1003 = vmatpush.msra.mxu1 %v3195_v45  ;;  %1104 = vmatpush.msra.mxu3 %v3191_v44 }
  0x90   :  { %1023 = vmatpush.msra.mxu2 %v3280_v62  ;;  %1112 = vmatpush.msrb.mxu0 %v3083_v8 }
  0x91   :  { %1004 = vmatpush.msra.mxu1 %v3205_v48  ;;  %1105 = vmatpush.msra.mxu3 %v3201_v47 }
  0x92   :  { %1024 = vmatpush.msra.mxu2 %v3286_v63  ;;  %1113 = vmatpush.msrb.mxu0 %v3094_v11 }
  0x93   :  { %1106 = vmatpush.msra.mxu3 %v3211_v50 }
  0x94   :  { %1114 = vmatpush.msrb.mxu0 %v3103_v15 }
  0x96   :  { %1115 = vmatpush.msrb.mxu0 %v3111_v19 }
  0x98   :  { %1116 = vmatpush.msrb.mxu0 %v3121_v22 }
  0x9a   :  { %1117 = vmatpush.msrb.mxu0 %v3129_v25 }
  0x9b   :  { %v209_v2 = vpop.f32.mrf.mxu0 }
  0x9c   :  { %1118 = vmatpush.msrb.mxu0 %v3137_v29  ;;  %v210_v23 = vadd.f32 %v209_v2, %v173_v16 }
  0x9d   :  { %v280_v1 = vpop.f32.mrf.mxu2 }
  0x9e   :  { %1119 = vmatpush.msrb.mxu0 %v3145_v32 }
  0x9f   :  { %v307_v0 = vpop.f32.mrf.mxu3  ;;  %v250_v3 = vpop.f32.mrf.mxu1 }
  0xa0   :  { %1120 = vmatpush.msrb.mxu0 %v3152_v34  ;;  %v251_v50 = vadd.f32 %v250_v3, %v210_v23 }
  0xa2   :  { %1121 = vmatpush.msrb.mxu0 %v3160_v36 }
  0xa4   :  { %1122 = vmatpush.msrb.mxu0 %v3169_v38 }
  0xa6   :  { %1123 = vmatpush.msrb.mxu0 %v3178_v40 }
  0xa7   :  { %v435_v5 = vpop.f32.mrf.mxu3  ;;  %v340_v12 = vpop.f32.mrf.mxu0 }
  0xa8   :  { %1124 = vmatpush.msrb.mxu0 %v3185_v42 }
  0xa9   :  { %v394_v10 = vpop.f32.mrf.mxu2  ;;  %v365_v18 = vpop.f32.mrf.mxu1 }
  0xaa   :  { %1125 = vmatpush.msrb.mxu0 %v3195_v45  ;;  %v395_v20 = vadd.f32 %v394_v10, %v174_v14 }
  0xac   :  { %1126 = vmatpush.msrb.mxu0 %v3205_v48  ;;  %v436_v30 = vadd.f32 %v435_v5, %v395_v20  ;;  %v281_v48 = vadd.f32 %v280_v1, %v251_v50 }
  0xae   :  { %v308_v61 = vadd.f32 %v307_v0, %v281_v48 }
  0xb0   :  { %v341_v41 = vadd.f32 %v340_v12, %v308_v61 }
  0xb2   :  { %v465_v63 = vpop.f32.mrf.mxu0  ;;  %v3390_v38 = vadd.f32 %v365_v18, %v341_v41 }
  0xb3   :  { %v466_v45 = vadd.f32 %v465_v63, %v436_v30 }
  0xb4   :  { %v492_v47 = vpop.f32.mrf.mxu1  ;;  %4436 = vst [vmem:[#allocation26_spill] sm:$0xff] %v3390_v38 }
  0xb5   :  { %v550_v27 = vpop.f32.mrf.mxu3  ;;  %v525_v26 = vpop.f32.mrf.mxu2  ;;  %v493_v42 = vadd.f32 %v492_v47, %v466_v45  ;;  %v175_v45 = vperm.slane %v166_v7, 2 }
  0xb7   :  { %v526_v40 = vadd.f32 %v525_v26, %v493_v42 }
  0xb9   :  { %v3388_v60 = vadd.f32 %v550_v27, %v526_v40 }
  0xbb   :  { %4435 = vst [vmem:[#allocation25_spill] sm:$0xff] %v3388_v60 }
  0xbe   :  { %v579_v50 = vpop.f32.mrf.mxu0 }
  0xbf   :  { %v580_v42 = vadd.f32 %v579_v50, %v175_v45 }
  0xc0   :  { %v650_v44 = vpop.f32.mrf.mxu2 }
  0xc1   :  { %v677_v62 = vpop.f32.mrf.mxu3  ;;  %v620_v40 = vpop.f32.mrf.mxu1 }
  0xc2   :  { %v621_v41 = vadd.f32 %v620_v40, %v580_v42 }
  0xc4   :  { %v651_v16 = vadd.f32 %v650_v44, %v621_v41 }
  0xc6   :  { %v678_v30 = vadd.f32 %v677_v62, %v651_v16 }
  0xc8   :  { %v710_v1 = vpop.f32.mrf.mxu0 }
  0xcb   :  { %v735_v44 = vpop.f32.mrf.mxu1 }
  0xd5   :  { %v775_v10 = vpop.f32.mrf.mxu3 }
  0xd6   :  { %v799_v2 = vadd.f32 %v775_v10, %v3388_v60  ;;  %v755_v5 = vpop.f32.mrf.mxu2  ;;  %v3394_v10 = vld [vmem:[#allocation7 + $0x9] sm:$0x1] }
  0xd7   :  { %v798_v3 = vadd.f32 %v755_v5, %v3390_v38  ;;  %4437 = vst [vmem:[#allocation27_spill] sm:$0xff] %v3394_v10 }
  0xd8   :  { %v2541_v14 = vmul.f32 -1.442695, %v799_v2 }
  0xd9   :  { %v2540_v63 = vmul.f32 -1.442695, %v798_v3 }
  0xda   :  { %2573 = vpow2.f32 %v2541_v14 }
  0xdb   :  { %2575 = vpow2.f32 %v2540_v63  ;;  %v711_v63 = vadd.f32 %v710_v1, %v678_v30 }
  0xdd   :  { %v3397_v40 = vadd.f32 %v735_v44, %v711_v63  ;;  %v4443_v63 = vld [vmem:[#allocation16_spill] sm:$0xff]  ;;  %v4446_v44 = vld [vmem:[#allocation18_spill] sm:$0xff] }
  0xe0   :  { %v2574_v47 = vpop.eup %2573 }
  0xe1   :  { %v2576_v48 = vpop.eup %2575  ;;  %v807_v61 = vadd.f32 1.0, %v2574_v47 }
  0xe2   :  { %v806_v0 = vadd.f32 1.0, %v2576_v48 }
  0xe3   :  { %2577 = vrcp.f32 %v807_v61  ;;  %v834_v41 = vand.u32 2147483648, %v807_v61  ;;  %vm828_vm6 = vweird.f32 %v807_v61 }
  0xe4   :  { %2579 = vrcp.f32 %v806_v0  ;;  %v819_v2 = vand.u32 2147483648, %v806_v0  ;;  %v817_v3 = vand.u32 2147483647, %v806_v0  ;;  %vm813_vm2 = vweird.f32 %v806_v0 }
  0xe6   :  { %v820_v47 = vor.u32 1.1754944e-38, %v819_v2  ;;  %vm818_vm4 = vcmp.eq.f32.partialorder %v817_v3, 8.507059e+37  ;;  %v4441_v3 = vld [vmem:[#allocation13_spill] sm:$0xff] }
  0xe9   :  { %v2578_v12 = vpop.eup %2577  ;;  %v795_v7 = vpop.f32.mrf.mxu0 }
  0xea   :  { %v2580_v18 = vpop.eup %2579  ;;  %v824_v20 = vmul.f32 %v2578_v12, %v807_v61  ;;  %v838_v45 = vadd.f32 %v795_v7, %v3394_v10  ;;  %vm829_vm5 = vweird.f32 %v2578_v12 }
  0xeb   :  { %v809_v23 = vmul.f32 %v2580_v18, %v806_v0  ;;  %vm814_vm1 = vweird.f32 %v2580_v18  ;;  %vm830_vm7 = vmor %vm828_vm6, %vm829_vm5 }
  0xec   :  { %v825_v27 = vsub.f32 1.0, %v824_v20  ;;  %vm815_vm3 = vmor %vm813_vm2, %vm814_vm1  ;;  %v832_v20 = vand.u32 2147483647, %v807_v61  ;;  %v4438_v61 = vld [vmem:[#allocation12_spill] sm:$0xff] }
  0xed   :  { %v810_v26 = vsub.f32 1.0, %v809_v23  ;;  %v835_v23 = vor.u32 1.1754944e-38, %v834_v41 }
  0xee   :  { %v826_v14 = vmul.f32 %v2578_v12, %v825_v27  ;;  %vm833_vm8 = vcmp.eq.f32.partialorder %v832_v20, 8.507059e+37 }
  0xef   :  { %v811_v5 = vmul.f32 %v2580_v18, %v810_v26 }
  0xf0   :  { %v827_v62 = vadd.f32 %v2578_v12, %v826_v14  ;;  %v4442_v14 = vld [vmem:[#allocation22_spill] sm:$0xff] }
  0xf1   :  { %v812_v50 = vadd.f32 %v2580_v18, %v811_v5  ;;  %v4440_v5 = vld [vmem:[#allocation14_spill] sm:$0xff] }
  0xf2   :  { %v831_v0 = vsel %vm830_vm7, %v2578_v12, %v827_v62  ;;  %v4439_v12 = vld [vmem:[#allocation21_spill] sm:$0xff]  ;;  %v4449_v62 = vld [vmem:[#allocation20_spill] sm:$0xff] }
  0xf3   :  { %v816_v48 = vsel %vm815_vm3, %v2580_v18, %v812_v50  ;;  %v836_v27 = vsel %vm833_vm8, %v835_v23, %v831_v0  ;;  %v4444_v50 = vld [vmem:[#allocation15_spill] sm:$0xff] }
  0xf4   :  { %v821_v42 = vsel %vm818_vm4, %v820_v47, %v816_v48  ;;  %v842_v30 = vsub.f32 1.0, %v836_v27  ;;  %v844_v7 = vmul.f32 0.0, %v836_v27  ;;  %v4447_v47 = vld [vmem:[#allocation17_spill] sm:$0xff]  ;;  %v4448_v48 = vld [vmem:[#allocation24_spill] sm:$0xff] }
  0xf5   :  { %v839_v16 = vmul.f32 %v838_v45, %v821_v42  ;;  %v4445_v45 = vld [vmem:[#allocation23_spill] sm:$0xff] }
  0xf6   :  { %v4450_v42 = vld [vmem:[#allocation19_spill] sm:$0xff] }
  0xf7   :  { %v840_v1 = vadd.f32 %v839_v16, %v3397_v40 }
  0xf9   :  { %2581 = vtanh.f32 %v840_v1 }
  0xff   :  { %v2582_v18 = vpop.eup %2581 }
 0x100   :  { %v843_v26 = vmul.f32 %v2582_v18, %v842_v30 }
 0x102   :  { %v3400_v2 = vadd.f32 %v844_v7, %v843_v26 }
 0x104   :  { %862 = vmatmul.f32.vlgmr.msrb.gmra.mxu1 %v3400_v2  ;;  %882 = vmatmul.f32.vlgmr.msrb.gmra.mxu2 %v3400_v2 }
 0x105   :  { %902 = vmatmul.f32.vlgmr.msrb.gmra.mxu3 %v3400_v2  ;;  %1131 = vmatpush.msrb.mxu1 %v3188_v43 }
 0x106   :  { %1213 = vmatpush.msrb.mxu2 %v3076_v6  ;;  %1233 = vmatpush.msrb.mxu3 %v3069_v4 }
 0x107   :  { %1132 = vmatpush.msrb.mxu1 %v3198_v46 }
 0x108   :  { %1214 = vmatpush.msrb.mxu2 %v3087_v9  ;;  %1234 = vmatpush.msrb.mxu3 %v3083_v8 }
 0x109   :  { %1133 = vmatpush.msrb.mxu1 %v3208_v49 }
 0x10a   :  { %1215 = vmatpush.msrb.mxu2 %v3099_v13  ;;  %1235 = vmatpush.msrb.mxu3 %v3094_v11 }
 0x10b   :  { %1134 = vmatpush.msrb.mxu1 %v3215_v51 }
 0x10c   :  { %1216 = vmatpush.msrb.mxu2 %v3108_v17  ;;  %1236 = vmatpush.msrb.mxu3 %v3103_v15 }
 0x10d   :  { %1135 = vmatpush.msrb.mxu1 %v3222_v52 }
 0x10e   :  { %1217 = vmatpush.msrb.mxu2 %v3118_v21  ;;  %1237 = vmatpush.msrb.mxu3 %v3111_v19 }
 0x10f   :  { %1136 = vmatpush.msrb.mxu1 %v3226_v53 }
 0x110   :  { %1218 = vmatpush.msrb.mxu2 %v3126_v24  ;;  %1238 = vmatpush.msrb.mxu3 %v3121_v22 }
 0x111   :  { %1137 = vmatpush.msrb.mxu1 %v3232_v54 }
 0x112   :  { %1219 = vmatpush.msrb.mxu2 %v3133_v28  ;;  %1239 = vmatpush.msrb.mxu3 %v3129_v25 }
 0x113   :  { %1138 = vmatpush.msrb.mxu1 %v3238_v55 }
 0x114   :  { %1220 = vmatpush.msrb.mxu2 %v3141_v31  ;;  %1240 = vmatpush.msrb.mxu3 %v3137_v29 }
 0x115   :  { %1139 = vmatpush.msrb.mxu1 %v3244_v56 }
 0x116   :  { %1221 = vmatpush.msrb.mxu2 %v3148_v33  ;;  %1241 = vmatpush.msrb.mxu3 %v3145_v32 }
 0x117   :  { %1140 = vmatpush.msrb.mxu1 %v3250_v57 }
 0x118   :  { %1222 = vmatpush.msrb.mxu2 %v3155_v35  ;;  %1242 = vmatpush.msrb.mxu3 %v3152_v34 }
 0x119   :  { %1141 = vmatpush.msrb.mxu1 %v3256_v58 }
 0x11a   :  { %1223 = vmatpush.msrb.mxu2 %v3164_v37  ;;  %1243 = vmatpush.msrb.mxu3 %v3160_v36 }
 0x11b   :  { %1142 = vmatpush.msrb.mxu1 %v3262_v59 }
 0x11c   :  { %1224 = vmatpush.msrb.mxu2 %v3173_v39  ;;  %1244 = vmatpush.msrb.mxu3 %v4438_v61 }
 0x11d   :  { %1143 = vmatpush.msrb.mxu1 %v4439_v12 }
 0x11e   :  { %1225 = vmatpush.msrb.mxu2 %v4440_v5  ;;  %1245 = vmatpush.msrb.mxu3 %v4441_v3 }
 0x11f   :  { %1144 = vmatpush.msrb.mxu1 %v4442_v14 }
 0x120   :  { %1226 = vmatpush.msrb.mxu2 %v4443_v63  ;;  %1246 = vmatpush.msrb.mxu3 %v4444_v50 }
 0x121   :  { %1145 = vmatpush.msrb.mxu1 %v4445_v45 }
 0x122   :  { %1227 = vmatpush.msrb.mxu2 %v4446_v44  ;;  %1247 = vmatpush.msrb.mxu3 %v4447_v47 }
 0x123   :  { %1146 = vmatpush.msrb.mxu1 %v4448_v48 }
 0x124   :  { %1228 = vmatpush.msrb.mxu2 %v4449_v62  ;;  %1248 = vmatpush.msrb.mxu3 %v4450_v42 }
 0x181   :  { %v863_v41 = vpop.f32.mrf.mxu1 }
 0x182   :  { %v908_v16 = vrot.slane %v863_v41, 7 }
 0x184   :  { %v912_v20 = vadd.f32 %v908_v16, %v3390_v38 }
 0x186   :  { %v2542_v1 = vmul.f32 -1.442695, %v912_v20 }
 0x187   :  { %v883_v0 = vpop.f32.mrf.mxu2 }
 0x188   :  { %2583 = vpow2.f32 %v2542_v1  ;;  %v909_v23 = vrot.slane %v883_v0, 7  ;;  %v903_v47 = vpop.f32.mrf.mxu3 }
 0x189   :  { %v952_v1 = vadd.f32 %v903_v47, %v3394_v10 }
 0x18a   :  { %v913_v27 = vadd.f32 %v909_v23, %v3388_v60 }
 0x18c   :  { %v2543_v30 = vmul.f32 -1.442695, %v913_v27 }
 0x18e   :  { %v2584_v18 = vpop.eup %2583  ;;  %2585 = vpow2.f32 %v2543_v30 }
 0x18f   :  { %v920_v26 = vadd.f32 1.0, %v2584_v18 }
 0x191   :  { %2587 = vrcp.f32 %v920_v26  ;;  %v933_v44 = vand.u32 2147483648, %v920_v26  ;;  %v931_v20 = vand.u32 2147483647, %v920_v26  ;;  %vm927_vm10 = vweird.f32 %v920_v26 }
 0x193   :  { %v934_v30 = vor.u32 1.1754944e-38, %v933_v44  ;;  %vm932_vm12 = vcmp.eq.f32.partialorder %v931_v20, 8.507059e+37 }
 0x194   :  { %v2586_v7 = vpop.eup %2585 }
 0x195   :  { %v921_v48 = vadd.f32 1.0, %v2586_v7  ;;  %v954_v7 = vrot.slane %v952_v1, 7 }
 0x197   :  { %v2588_v62 = vpop.eup %2587  ;;  %2589 = vrcp.f32 %v921_v48  ;;  %vm942_vm14 = vweird.f32 %v921_v48 }
 0x198   :  { %v923_v42 = vmul.f32 %v2588_v62, %v920_v26  ;;  %vm928_vm9 = vweird.f32 %v2588_v62 }
 0x199   :  { %vm929_vm11 = vmor %vm927_vm10, %vm928_vm9  ;;  %vm1764_vm9 = vcmask 1040384   ;;  %vm2499_vm10 = vcmask 1041408  }
 0x19a   :  { %v924_v41 = vsub.f32 1.0, %v923_v42  ;;  %v948_v42 = vand.u32 2147483648, %v921_v48 }
 0x19c   :  { %v925_v16 = vmul.f32 %v2588_v62, %v924_v41  ;;  %v946_v41 = vand.u32 2147483647, %v921_v48  ;;  %v949_v10 = vor.u32 1.1754944e-38, %v948_v42 }
 0x19d   :  { %v2590_v0 = vpop.eup %2589 }
 0x19e   :  { %v938_v23 = vmul.f32 %v2590_v0, %v921_v48  ;;  %v926_v27 = vadd.f32 %v2588_v62, %v925_v16  ;;  %vm943_vm13 = vweird.f32 %v2590_v0  ;;  %vm947_vm0 = vcmp.eq.f32.partialorder %v946_v41, 8.507059e+37 }
 0x19f   :  { %vm944_vm15 = vmor %vm942_vm14, %vm943_vm13 }
 0x1a0   :  { %v939_v18 = vsub.f32 1.0, %v938_v23  ;;  %v930_v60 = vsel %vm929_vm11, %v2588_v62, %v926_v27  ;;  %v962_v62 = vrot.slane %v3400_v2, 7  ;;  %v4461_v27 = vld [vmem:[#allocation27_spill] sm:$0xff] }
 0x1a1   :  { %v935_v38 = vsel %vm932_vm12, %v934_v30, %v930_v60 }
 0x1a2   :  { %v940_v45 = vmul.f32 %v2590_v0, %v939_v18  ;;  %v956_v50 = vmul.f32 %v954_v7, %v935_v38 }
 0x1a4   :  { %v941_v63 = vadd.f32 %v2590_v0, %v940_v45  ;;  %v957_v47 = vadd.f32 %v956_v50, %v3397_v40 }
 0x1a6   :  { %v945_v16 = vsel %vm944_vm15, %v2590_v0, %v941_v63  ;;  %2591 = vtanh.f32 %v957_v47 }
 0x1a7   :  { %v950_v44 = vsel %vm947_vm0, %v949_v10, %v945_v16 }
 0x1a8   :  { %v959_v26 = vsub.f32 1.0, %v950_v44  ;;  %v964_v1 = vmul.f32 %v962_v62, %v950_v44 }
 0x1ac   :  { %v2592_v20 = vpop.eup %2591 }
 0x1ad   :  { %v960_v60 = vmul.f32 %v2592_v20, %v959_v26 }
 0x1af   :  { %v3458_v23 = vadd.f32 %v964_v1, %v960_v60 }
 0x1b1   :  { %v967_v38 = vrot.slane %v3458_v23, 1 }
 0x1b3   :  { %985 = vmatmul.f32.vlgmr.msra.gmra.mxu0 %v967_v38  ;;  %1005 = vmatmul.f32.vlgmr.msra.gmra.mxu1 %v967_v38 }
 0x1b4   :  { %1025 = vmatmul.f32.vlgmr.msra.gmra.mxu2 %v967_v38  ;;  %1253 = vmatpush.msra.mxu0 %v3188_v43 }
 0x1b5   :  { %1335 = vmatpush.msra.mxu1 %v3076_v6  ;;  %1355 = vmatpush.msra.mxu2 %v3069_v4  ;;  %v4451_v4 = vld [vmem:[#allocation16_spill] sm:$0xff]  ;;  %v4452_v6 = vld [vmem:[#allocation15_spill] sm:$0xff] }
 0x1b6   :  { %1254 = vmatpush.msra.mxu0 %v3198_v46 }
 0x1b7   :  { %1336 = vmatpush.msra.mxu1 %v3087_v9  ;;  %1356 = vmatpush.msra.mxu2 %v3083_v8  ;;  %v4453_v8 = vld [vmem:[#allocation23_spill] sm:$0xff]  ;;  %v4454_v9 = vld [vmem:[#allocation18_spill] sm:$0xff] }
 0x1b8   :  { %1255 = vmatpush.msra.mxu0 %v3208_v49 }
 0x1b9   :  { %1337 = vmatpush.msra.mxu1 %v3099_v13  ;;  %1357 = vmatpush.msra.mxu2 %v3094_v11  ;;  %v4455_v11 = vld [vmem:[#allocation17_spill] sm:$0xff]  ;;  %v4456_v13 = vld [vmem:[#allocation24_spill] sm:$0xff] }
 0x1ba   :  { %1256 = vmatpush.msra.mxu0 %v3215_v51 }
 0x1bb   :  { %1338 = vmatpush.msra.mxu1 %v3108_v17  ;;  %1358 = vmatpush.msra.mxu2 %v3103_v15  ;;  %v4457_v15 = vld [vmem:[#allocation20_spill] sm:$0xff]  ;;  %v4458_v17 = vld [vmem:[#allocation19_spill] sm:$0xff] }
 0x1bc   :  { %1257 = vmatpush.msra.mxu0 %v3222_v52 }
 0x1bd   :  { %1339 = vmatpush.msra.mxu1 %v3118_v21  ;;  %1359 = vmatpush.msra.mxu2 %v3111_v19 }
 0x1be   :  { %1258 = vmatpush.msra.mxu0 %v3226_v53 }
 0x1bf   :  { %1340 = vmatpush.msra.mxu1 %v3126_v24  ;;  %1360 = vmatpush.msra.mxu2 %v3121_v22 }
 0x1c0   :  { %1259 = vmatpush.msra.mxu0 %v3232_v54 }
 0x1c1   :  { %1341 = vmatpush.msra.mxu1 %v3133_v28  ;;  %1361 = vmatpush.msra.mxu2 %v3129_v25  ;;  %v4459_v25 = vld [vmem:[#allocation26_spill] sm:$0xff] }
 0x1c2   :  { %1260 = vmatpush.msra.mxu0 %v3238_v55 }
 0x1c3   :  { %1342 = vmatpush.msra.mxu1 %v3141_v31  ;;  %1362 = vmatpush.msra.mxu2 %v3137_v29  ;;  %v4460_v29 = vld [vmem:[#allocation25_spill] sm:$0xff] }
 0x1c4   :  { %1261 = vmatpush.msra.mxu0 %v3244_v56 }
 0x1c5   :  { %1343 = vmatpush.msra.mxu1 %v3148_v33  ;;  %1363 = vmatpush.msra.mxu2 %v3145_v32 }
 0x1c6   :  { %1262 = vmatpush.msra.mxu0 %v3250_v57 }
 0x1c7   :  { %1344 = vmatpush.msra.mxu1 %v3155_v35  ;;  %1364 = vmatpush.msra.mxu2 %v3152_v34 }
 0x1c8   :  { %1263 = vmatpush.msra.mxu0 %v3256_v58 }
 0x1c9   :  { %1345 = vmatpush.msra.mxu1 %v3164_v37  ;;  %1365 = vmatpush.msra.mxu2 %v3160_v36 }
 0x1ca   :  { %1264 = vmatpush.msra.mxu0 %v3262_v59 }
 0x1cb   :  { %1346 = vmatpush.msra.mxu1 %v3173_v39  ;;  %1366 = vmatpush.msra.mxu2 %v4438_v61 }
 0x1cc   :  { %1265 = vmatpush.msra.mxu0 %v4439_v12 }
 0x1cd   :  { %1347 = vmatpush.msra.mxu1 %v4440_v5  ;;  %1367 = vmatpush.msra.mxu2 %v4441_v3 }
 0x1ce   :  { %1266 = vmatpush.msra.mxu0 %v4442_v14 }
 0x1cf   :  { %1348 = vmatpush.msra.mxu1 %v4451_v4  ;;  %1368 = vmatpush.msra.mxu2 %v4452_v6 }
 0x1d0   :  { %1267 = vmatpush.msra.mxu0 %v4453_v8 }
 0x1d1   :  { %1349 = vmatpush.msra.mxu1 %v4454_v9  ;;  %1369 = vmatpush.msra.mxu2 %v4455_v11  ;;  %v1084_v9 = vrot.slane %v3458_v23, 7 }
 0x1d2   :  { %1268 = vmatpush.msra.mxu0 %v4456_v13 }
 0x1d3   :  { %1350 = vmatpush.msra.mxu1 %v4457_v15  ;;  %1370 = vmatpush.msra.mxu2 %v4458_v17 }
 0x230   :  { %v986_v19 = vpop.f32.mrf.mxu0  ;;  %v1006_v21 = vpop.f32.mrf.mxu1 }
 0x231   :  { %v1031_v22 = vrot.slane %v986_v19, 6  ;;  %v1032_v24 = vrot.slane %v1006_v21, 6  ;;  %v2498_v21 = vsel %vm1764_vm9, %v3400_v2, %v3458_v23  ;;  %v3532_v2 = vld [vmem:[#allocation5 + $0x1b0] sm:$0xff]  ;;  %v3535_v23 = vld [vmem:[#allocation5 + $0x1b8] sm:$0xff] }
 0x233   :  { %v1035_v28 = vadd.f32 %v1031_v22, %v4459_v25  ;;  %v1036_v31 = vadd.f32 %v1032_v24, %v4460_v29 }
 0x235   :  { %v2544_v32 = vmul.f32 -1.442695, %v1035_v28  ;;  %v2545_v33 = vmul.f32 -1.442695, %v1036_v31  ;;  %v3525_v28 = vld [vmem:[#allocation5 + $0x1c8] sm:$0xff]  ;;  %v3528_v31 = vld [vmem:[#allocation5 + $0x1d0] sm:$0xff] }
 0x237   :  { %2593 = vpow2.f32 %v2544_v32  ;;  %v1026_v3 = vpop.f32.mrf.mxu2  ;;  %v3542_v32 = vld [vmem:[#allocation5 + $0x1a0] sm:$0xff] }
 0x238   :  { %2595 = vpow2.f32 %v2545_v33  ;;  %v1075_v30 = vadd.f32 %v1026_v3, %v4461_v27  ;;  %v3549_v33 = vld [vmem:[#allocation5 + $0x188] sm:$0xff]  ;;  %v3612_v3 = vld [vmem:[#allocation5 + $0xb0] sm:$0xff] }
 0x23a   :  { %v1077_v47 = vrot.slane %v1075_v30, 6 }
 0x23d   :  { %v2594_v34 = vpop.eup %2593 }
 0x23e   :  { %v2596_v35 = vpop.eup %2595  ;;  %v1043_v36 = vadd.f32 1.0, %v2594_v34  ;;  %v3556_v34 = vld [vmem:[#allocation5 + $0x170] sm:$0xff] }
 0x23f   :  { %v1044_v37 = vadd.f32 1.0, %v2596_v35  ;;  %v3563_v35 = vld [vmem:[#allocation5 + $0x158] sm:$0xff] }
 0x240   :  { %2597 = vrcp.f32 %v1043_v36  ;;  %v1056_v45 = vand.u32 2147483648, %v1043_v36  ;;  %v1054_v0 = vand.u32 2147483647, %v1043_v36  ;;  %vm1050_vm2 = vweird.f32 %v1043_v36 }
 0x241   :  { %2599 = vrcp.f32 %v1044_v37  ;;  %v1071_v26 = vand.u32 2147483648, %v1044_v37  ;;  %vm1065_vm6 = vweird.f32 %v1044_v37  ;;  %v1069_v20 = vand.u32 2147483647, %v1044_v37 }
 0x242   :  { %v1057_v42 = vor.u32 1.1754944e-38, %v1056_v45  ;;  %vm1055_vm4 = vcmp.eq.f32.partialorder %v1054_v0, 8.507059e+37  ;;  %v3633_v45 = vld [vmem:[#allocation5 + $0x68] sm:$0xff] }
 0x243   :  { %v1072_v38 = vor.u32 1.1754944e-38, %v1071_v26  ;;  %vm1070_vm8 = vcmp.eq.f32.partialorder %v1069_v20, 8.507059e+37 }
 0x246   :  { %v2598_v39 = vpop.eup %2597 }
 0x247   :  { %v2600_v10 = vpop.eup %2599  ;;  %v1046_v61 = vmul.f32 %v2598_v39, %v1043_v36  ;;  %vm1051_vm1 = vweird.f32 %v2598_v39  ;;  %v3570_v36 = vld [vmem:[#allocation5 + $0x140] sm:$0xff] }
 0x248   :  { %v1061_v5 = vmul.f32 %v2600_v10, %v1044_v37  ;;  %vm1052_vm3 = vmor %vm1050_vm2, %vm1051_vm1  ;;  %vm1066_vm5 = vweird.f32 %v2600_v10  ;;  %v3577_v37 = vld [vmem:[#allocation5 + $0x128] sm:$0xff] }
 0x249   :  { %v1047_v63 = vsub.f32 1.0, %v1046_v61  ;;  %vm1067_vm7 = vmor %vm1065_vm6, %vm1066_vm5  ;;  %v3598_v61 = vld [vmem:[#allocation5 + $0xe0] sm:$0xff] }
 0x24a   :  { %v1062_v50 = vsub.f32 1.0, %v1061_v5  ;;  %v3605_v5 = vld [vmem:[#allocation5 + $0xc8] sm:$0xff] }
 0x24b   :  { %v1048_v48 = vmul.f32 %v2598_v39, %v1047_v63  ;;  %v3619_v63 = vld [vmem:[#allocation5 + $0x98] sm:$0xff] }
 0x24c   :  { %v1063_v18 = vmul.f32 %v2600_v10, %v1062_v50  ;;  %v3626_v50 = vld [vmem:[#allocation5 + $0x80] sm:$0xff] }
 0x24d   :  { %v1049_v7 = vadd.f32 %v2598_v39, %v1048_v48 }
 0x24e   :  { %v1064_v44 = vadd.f32 %v2600_v10, %v1063_v18 }
 0x24f   :  { %v1053_v41 = vsel %vm1052_vm3, %v2598_v39, %v1049_v7  ;;  %v3584_v39 = vld [vmem:[#allocation5 + $0x110] sm:$0xff]  ;;  %vm2501_vm3 = vcmask 1042432  }
 0x250   :  { %v1058_v16 = vsel %vm1055_vm4, %v1057_v42, %v1053_v41  ;;  %v1068_v1 = vsel %vm1067_vm7, %v2600_v10, %v1064_v44  ;;  %v3591_v10 = vld [vmem:[#allocation5 + $0xf8] sm:$0xff] }
 0x251   :  { %v1079_v62 = vmul.f32 %v1077_v47, %v1058_v16  ;;  %v1073_v4 = vsel %vm1070_vm8, %v1072_v38, %v1068_v1 }
 0x252   :  { %v1082_v6 = vsub.f32 1.0, %v1073_v4  ;;  %v1086_v17 = vmul.f32 %v1084_v9, %v1073_v4 }
 0x253   :  { %v1080_v60 = vadd.f32 %v1079_v62, %v3397_v40 }
 0x255   :  { %2601 = vtanh.f32 %v1080_v60 }
 0x25b   :  { %v2602_v11 = vpop.eup %2601 }
 0x25c   :  { %v1083_v15 = vmul.f32 %v2602_v11, %v1082_v6 }
 0x25e   :  { %v3514_v19 = vadd.f32 %v1086_v17, %v1083_v15 }
 0x260   :  { %v1089_v22 = vrot.slane %v3514_v19, 2  ;;  %v3522_v24 = vsel %vm2499_vm10, %v2498_v21, %v3514_v19 }
 0x262   :  { %1107 = vmatmul.f32.vlgmr.msra.gmra.mxu3 %v1089_v22  ;;  %1127 = vmatmul.f32.vlgmr.msrb.gmra.mxu0 %v1089_v22 }
 0x263   :  { %1147 = vmatmul.f32.vlgmr.msrb.gmra.mxu1 %v1089_v22  ;;  %1375 = vmatpush.msra.mxu3 %v3188_v43  ;;  %v3539_v43 = vld [vmem:[#allocation5 + $0x198] sm:$0xff] }
 0x264   :  { %1457 = vmatpush.msrb.mxu0 %v3525_v28  ;;  %1477 = vmatpush.msrb.mxu1 %v3528_v31 }
 0x265   :  { %1376 = vmatpush.msra.mxu3 %v3198_v46  ;;  %v3546_v46 = vld [vmem:[#allocation5 + $0x180] sm:$0xff] }
 0x266   :  { %1458 = vmatpush.msrb.mxu0 %v3532_v2  ;;  %1478 = vmatpush.msrb.mxu1 %v3535_v23 }
 0x267   :  { %1377 = vmatpush.msra.mxu3 %v3208_v49  ;;  %v3553_v49 = vld [vmem:[#allocation5 + $0x168] sm:$0xff] }
 0x268   :  { %1459 = vmatpush.msrb.mxu0 %v3539_v43  ;;  %1479 = vmatpush.msrb.mxu1 %v3542_v32 }
 0x269   :  { %1378 = vmatpush.msra.mxu3 %v3215_v51  ;;  %v3560_v51 = vld [vmem:[#allocation5 + $0x150] sm:$0xff] }
 0x26a   :  { %1460 = vmatpush.msrb.mxu0 %v3546_v46  ;;  %1480 = vmatpush.msrb.mxu1 %v3549_v33 }
 0x26b   :  { %1379 = vmatpush.msra.mxu3 %v3222_v52  ;;  %v3567_v52 = vld [vmem:[#allocation5 + $0x138] sm:$0xff] }
 0x26c   :  { %1461 = vmatpush.msrb.mxu0 %v3553_v49  ;;  %1481 = vmatpush.msrb.mxu1 %v3556_v34 }
 0x26d   :  { %1380 = vmatpush.msra.mxu3 %v3226_v53  ;;  %v3574_v53 = vld [vmem:[#allocation5 + $0x120] sm:$0xff] }
 0x26e   :  { %1462 = vmatpush.msrb.mxu0 %v3560_v51  ;;  %1482 = vmatpush.msrb.mxu1 %v3563_v35 }
 0x26f   :  { %1381 = vmatpush.msra.mxu3 %v3232_v54  ;;  %v3581_v54 = vld [vmem:[#allocation5 + $0x108] sm:$0xff] }
 0x270   :  { %1463 = vmatpush.msrb.mxu0 %v3567_v52  ;;  %1483 = vmatpush.msrb.mxu1 %v3570_v36 }
 0x271   :  { %1382 = vmatpush.msra.mxu3 %v3238_v55  ;;  %v3588_v55 = vld [vmem:[#allocation5 + $0xf0] sm:$0xff] }
 0x272   :  { %1464 = vmatpush.msrb.mxu0 %v3574_v53  ;;  %1484 = vmatpush.msrb.mxu1 %v3577_v37 }
 0x273   :  { %1383 = vmatpush.msra.mxu3 %v3244_v56  ;;  %v3595_v56 = vld [vmem:[#allocation5 + $0xd8] sm:$0xff] }
 0x274   :  { %1465 = vmatpush.msrb.mxu0 %v3581_v54  ;;  %1485 = vmatpush.msrb.mxu1 %v3584_v39 }
 0x275   :  { %1384 = vmatpush.msra.mxu3 %v3250_v57  ;;  %v3602_v57 = vld [vmem:[#allocation5 + $0xc0] sm:$0xff] }
 0x276   :  { %1466 = vmatpush.msrb.mxu0 %v3588_v55  ;;  %1486 = vmatpush.msrb.mxu1 %v3591_v10 }
 0x277   :  { %1385 = vmatpush.msra.mxu3 %v3256_v58  ;;  %v3609_v58 = vld [vmem:[#allocation5 + $0xa8] sm:$0xff] }
 0x278   :  { %1467 = vmatpush.msrb.mxu0 %v3595_v56  ;;  %1487 = vmatpush.msrb.mxu1 %v3598_v61 }
 0x279   :  { %1386 = vmatpush.msra.mxu3 %v3262_v59  ;;  %v3616_v59 = vld [vmem:[#allocation5 + $0x90] sm:$0xff] }
 0x27a   :  { %1468 = vmatpush.msrb.mxu0 %v3602_v57  ;;  %1488 = vmatpush.msrb.mxu1 %v3605_v5 }
 0x27b   :  { %1387 = vmatpush.msra.mxu3 %v4439_v12  ;;  %v3623_v12 = vld [vmem:[#allocation5 + $0x78] sm:$0xff] }
 0x27c   :  { %1469 = vmatpush.msrb.mxu0 %v3609_v58  ;;  %1489 = vmatpush.msrb.mxu1 %v3612_v3 }
 0x27d   :  { %1388 = vmatpush.msra.mxu3 %v4442_v14  ;;  %v3630_v14 = vld [vmem:[#allocation5 + $0x60] sm:$0xff] }
 0x27e   :  { %1470 = vmatpush.msrb.mxu0 %v3616_v59  ;;  %1490 = vmatpush.msrb.mxu1 %v3619_v63 }
 0x27f   :  { %1389 = vmatpush.msra.mxu3 %v4453_v8 }
 0x280   :  { %1471 = vmatpush.msrb.mxu0 %v3623_v12  ;;  %1491 = vmatpush.msrb.mxu1 %v3626_v50 }
 0x281   :  { %1390 = vmatpush.msra.mxu3 %v4456_v13 }
 0x282   :  { %1472 = vmatpush.msrb.mxu0 %v3630_v14  ;;  %1492 = vmatpush.msrb.mxu1 %v3633_v45 }
 0x2df   :  { %v1128_v48 = vpop.f32.mrf.mxu0 }
 0x2e0   :  { %v1154_v8 = vrot.slane %v1128_v48, 5  ;;  %v1148_v38 = vpop.f32.mrf.mxu1 }
 0x2e1   :  { %v1197_v9 = vadd.f32 %v1148_v38, %v4461_v27 }
 0x2e2   :  { %v1158_v0 = vadd.f32 %v1154_v8, %v4460_v29 }
 0x2e3   :  { %v1199_v48 = vrot.slane %v1197_v9, 5  ;;  %v3664_v9 = vld [vmem:[#allocation5 + $0x190] sm:$0xff] }
 0x2e4   :  { %v2547_v30 = vmul.f32 -1.442695, %v1158_v0 }
 0x2e5   :  { %v1108_v18 = vpop.f32.mrf.mxu3 }
 0x2e6   :  { %2603 = vpow2.f32 %v2547_v30  ;;  %v1153_v7 = vrot.slane %v1108_v18, 5 }
 0x2e8   :  { %v1157_v42 = vadd.f32 %v1153_v7, %v4459_v25 }
 0x2ea   :  { %v2546_v41 = vmul.f32 -1.442695, %v1157_v42 }
 0x2ec   :  { %v2604_v13 = vpop.eup %2603  ;;  %2605 = vpow2.f32 %v2546_v41 }
 0x2ed   :  { %v1166_v47 = vadd.f32 1.0, %v2604_v13 }
 0x2ef   :  { %2607 = vrcp.f32 %v1166_v47  ;;  %v1193_v18 = vand.u32 2147483648, %v1166_v47  ;;  %vm1187_vm0 = vweird.f32 %v1166_v47  ;;  %v1191_v42 = vand.u32 2147483647, %v1166_v47 }
 0x2f1   :  { %vm1192_vm2 = vcmp.eq.f32.partialorder %v1191_v42, 8.507059e+37 }
 0x2f2   :  { %v2606_v16 = vpop.eup %2605 }
 0x2f3   :  { %v1165_v44 = vadd.f32 1.0, %v2606_v16  ;;  %v1194_v16 = vor.u32 1.1754944e-38, %v1193_v18 }
 0x2f5   :  { %2609 = vrcp.f32 %v1165_v44  ;;  %v2608_v26 = vpop.eup %2607  ;;  %v1178_v6 = vand.u32 2147483648, %v1165_v44  ;;  %v1176_v15 = vand.u32 2147483647, %v1165_v44  ;;  %vm1172_vm12 = vweird.f32 %v1165_v44 }
 0x2f6   :  { %v1183_v62 = vmul.f32 %v2608_v26, %v1166_v47  ;;  %vm1188_vm15 = vweird.f32 %v2608_v26 }
 0x2f7   :  { %v1179_v22 = vor.u32 1.1754944e-38, %v1178_v6  ;;  %vm1177_vm14 = vcmp.eq.f32.partialorder %v1176_v15, 8.507059e+37  ;;  %vm1189_vm1 = vmor %vm1187_vm0, %vm1188_vm15 }
 0x2f8   :  { %v1184_v1 = vsub.f32 1.0, %v1183_v62 }
 0x2fa   :  { %v1185_v17 = vmul.f32 %v2608_v26, %v1184_v1 }
 0x2fb   :  { %v2610_v20 = vpop.eup %2609 }
 0x2fc   :  { %v1168_v60 = vmul.f32 %v2610_v20, %v1165_v44  ;;  %vm1173_vm11 = vweird.f32 %v2610_v20  ;;  %v1186_v30 = vadd.f32 %v2608_v26, %v1185_v17 }
 0x2fd   :  { %vm1174_vm13 = vmor %vm1172_vm12, %vm1173_vm11 }
 0x2fe   :  { %v1169_v4 = vsub.f32 1.0, %v1168_v60  ;;  %v1190_v13 = vsel %vm1189_vm1, %v2608_v26, %v1186_v30  ;;  %v1206_v60 = vrot.slane %v3514_v19, 7  ;;  %v3649_v26 = vld [vmem:[#allocation5 + $0x1d8] sm:$0xff]  ;;  %v3654_v19 = vld [vmem:[#allocation5 + $0x1c0] sm:$0xff] }
 0x2ff   :  { %v1195_v44 = vsel %vm1192_vm2, %v1194_v16, %v1190_v13 }
 0x300   :  { %v1170_v11 = vmul.f32 %v2610_v20, %v1169_v4  ;;  %v1204_v62 = vsub.f32 1.0, %v1195_v44  ;;  %v1208_v38 = vmul.f32 %v1206_v60, %v1195_v44 }
 0x302   :  { %v1171_v21 = vadd.f32 %v2610_v20, %v1170_v11 }
 0x304   :  { %v1175_v8 = vsel %vm1174_vm13, %v2610_v20, %v1171_v21 }
 0x305   :  { %v1180_v0 = vsel %vm1177_vm14, %v1179_v22, %v1175_v8  ;;  %vm2503_vm14 = vcmask 1043456  }
 0x306   :  { %v1201_v7 = vmul.f32 %v1199_v48, %v1180_v0 }
 0x308   :  { %v1202_v41 = vadd.f32 %v1201_v7, %v3397_v40 }
 0x30a   :  { %2611 = vtanh.f32 %v1202_v41 }
 0x310   :  { %v2612_v20 = vpop.eup %2611 }
 0x311   :  { %v1205_v1 = vmul.f32 %v2612_v20, %v1204_v62 }
 0x313   :  { %v3641_v4 = vadd.f32 %v1208_v38, %v1205_v1 }
 0x315   :  { %v1211_v6 = vrot.slane %v3641_v4, 3  ;;  %v3647_v47 = vsel %vm2501_vm3, %v3522_v24, %v3641_v4  ;;  %v3659_v24 = vld [vmem:[#allocation5 + $0x1a8] sm:$0xff]  ;;  %v1328_v60 = vrot.slane %v3641_v4, 7 }
 0x317   :  { %1229 = vmatmul.f32.vlgmr.msrb.gmra.mxu2 %v1211_v6  ;;  %1249 = vmatmul.f32.vlgmr.msrb.gmra.mxu3 %v1211_v6 }
 0x318   :  { %1269 = vmatmul.f32.vlgmr.msra.gmra.mxu0 %v1211_v6  ;;  %1497 = vmatpush.msrb.mxu2 %v3649_v26 }
 0x319   :  { %1579 = vmatpush.msrb.mxu3 %v3525_v28  ;;  %1599 = vmatpush.msra.mxu0 %v3528_v31  ;;  %v3669_v28 = vld [vmem:[#allocation5 + $0x178] sm:$0xff]  ;;  %v3674_v31 = vld [vmem:[#allocation5 + $0x160] sm:$0xff] }
 0x31a   :  { %1498 = vmatpush.msrb.mxu2 %v3654_v19 }
 0x31b   :  { %1580 = vmatpush.msrb.mxu3 %v3532_v2  ;;  %1600 = vmatpush.msra.mxu0 %v3535_v23  ;;  %v3679_v2 = vld [vmem:[#allocation5 + $0x148] sm:$0xff]  ;;  %v3684_v23 = vld [vmem:[#allocation5 + $0x130] sm:$0xff] }
 0x31c   :  { %1499 = vmatpush.msrb.mxu2 %v3659_v24 }
 0x31d   :  { %1581 = vmatpush.msrb.mxu3 %v3539_v43  ;;  %1601 = vmatpush.msra.mxu0 %v3542_v32  ;;  %v3689_v43 = vld [vmem:[#allocation5 + $0x118] sm:$0xff]  ;;  %v3694_v32 = vld [vmem:[#allocation5 + $0x100] sm:$0xff] }
 0x31e   :  { %1500 = vmatpush.msrb.mxu2 %v3664_v9 }
 0x31f   :  { %1582 = vmatpush.msrb.mxu3 %v3546_v46  ;;  %1602 = vmatpush.msra.mxu0 %v3549_v33  ;;  %v3699_v46 = vld [vmem:[#allocation5 + $0xe8] sm:$0xff]  ;;  %v3704_v33 = vld [vmem:[#allocation5 + $0xd0] sm:$0xff] }
 0x320   :  { %1501 = vmatpush.msrb.mxu2 %v3669_v28 }
 0x321   :  { %1583 = vmatpush.msrb.mxu3 %v3553_v49  ;;  %1603 = vmatpush.msra.mxu0 %v3556_v34  ;;  %v3709_v49 = vld [vmem:[#allocation5 + $0xb8] sm:$0xff]  ;;  %v3714_v34 = vld [vmem:[#allocation5 + $0xa0] sm:$0xff] }
 0x322   :  { %1502 = vmatpush.msrb.mxu2 %v3674_v31 }
 0x323   :  { %1584 = vmatpush.msrb.mxu3 %v3560_v51  ;;  %1604 = vmatpush.msra.mxu0 %v3563_v35  ;;  %v3719_v51 = vld [vmem:[#allocation5 + $0x88] sm:$0xff]  ;;  %v3724_v35 = vld [vmem:[#allocation5 + $0x70] sm:$0xff] }
 0x324   :  { %1503 = vmatpush.msrb.mxu2 %v3679_v2 }
 0x325   :  { %1585 = vmatpush.msrb.mxu3 %v3567_v52  ;;  %1605 = vmatpush.msra.mxu0 %v3570_v36 }
 0x326   :  { %1504 = vmatpush.msrb.mxu2 %v3684_v23 }
 0x327   :  { %1586 = vmatpush.msrb.mxu3 %v3574_v53  ;;  %1606 = vmatpush.msra.mxu0 %v3577_v37 }
 0x328   :  { %1505 = vmatpush.msrb.mxu2 %v3689_v43 }
 0x329   :  { %1587 = vmatpush.msrb.mxu3 %v3581_v54  ;;  %1607 = vmatpush.msra.mxu0 %v3584_v39 }
 0x32a   :  { %1506 = vmatpush.msrb.mxu2 %v3694_v32 }
 0x32b   :  { %1588 = vmatpush.msrb.mxu3 %v3588_v55  ;;  %1608 = vmatpush.msra.mxu0 %v3591_v10 }
 0x32c   :  { %1507 = vmatpush.msrb.mxu2 %v3699_v46 }
 0x32d   :  { %1589 = vmatpush.msrb.mxu3 %v3595_v56  ;;  %1609 = vmatpush.msra.mxu0 %v3598_v61 }
 0x32e   :  { %1508 = vmatpush.msrb.mxu2 %v3704_v33 }
 0x32f   :  { %1590 = vmatpush.msrb.mxu3 %v3602_v57  ;;  %1610 = vmatpush.msra.mxu0 %v3605_v5 }
 0x330   :  { %1509 = vmatpush.msrb.mxu2 %v3709_v49 }
 0x331   :  { %1591 = vmatpush.msrb.mxu3 %v3609_v58  ;;  %1611 = vmatpush.msra.mxu0 %v3612_v3 }
 0x332   :  { %1510 = vmatpush.msrb.mxu2 %v3714_v34 }
 0x333   :  { %1592 = vmatpush.msrb.mxu3 %v3616_v59  ;;  %1612 = vmatpush.msra.mxu0 %v3619_v63 }
 0x334   :  { %1511 = vmatpush.msrb.mxu2 %v3719_v51 }
 0x335   :  { %1593 = vmatpush.msrb.mxu3 %v3623_v12  ;;  %1613 = vmatpush.msra.mxu0 %v3626_v50 }
 0x336   :  { %1512 = vmatpush.msrb.mxu2 %v3724_v35 }
 0x337   :  { %1594 = vmatpush.msrb.mxu3 %v3630_v14  ;;  %1614 = vmatpush.msra.mxu0 %v3633_v45 }
 0x395   :  { %v1270_v63 = vpop.f32.mrf.mxu0 }
 0x396   :  { %v1319_v11 = vadd.f32 %v1270_v63, %v4461_v27 }
 0x398   :  { %v1321_v8 = vrot.slane %v1319_v11, 4 }
 0x39a   :  { %v1230_v52 = vpop.f32.mrf.mxu2  ;;  %v1250_v36 = vpop.f32.mrf.mxu3 }
 0x39b   :  { %v1275_v53 = vrot.slane %v1230_v52, 4  ;;  %v1276_v37 = vrot.slane %v1250_v36, 4 }
 0x39d   :  { %v1279_v54 = vadd.f32 %v1275_v53, %v4459_v25  ;;  %v1280_v39 = vadd.f32 %v1276_v37, %v4460_v29  ;;  %v3760_v37 = vld [vmem:[#allocation7 + $0x9] sm:$0x1] }
 0x39f   :  { %v2548_v55 = vmul.f32 -1.442695, %v1279_v54  ;;  %v2549_v10 = vmul.f32 -1.442695, %v1280_v39 }
 0x3a1   :  { %2613 = vpow2.f32 %v2548_v55 }
 0x3a2   :  { %2615 = vpow2.f32 %v2549_v10 }
 0x3a7   :  { %v2614_v56 = vpop.eup %2613 }
 0x3a8   :  { %v2616_v61 = vpop.eup %2615  ;;  %v1287_v57 = vadd.f32 1.0, %v2614_v56 }
 0x3a9   :  { %v1288_v5 = vadd.f32 1.0, %v2616_v61 }
 0x3aa   :  { %2617 = vrcp.f32 %v1287_v57  ;;  %v1300_v14 = vand.u32 2147483648, %v1287_v57  ;;  %v1298_v17 = vand.u32 2147483647, %v1287_v57  ;;  %vm1294_vm5 = vweird.f32 %v1287_v57 }
 0x3ab   :  { %2619 = vrcp.f32 %v1288_v5  ;;  %v1315_v42 = vand.u32 2147483648, %v1288_v5  ;;  %vm1309_vm11 = vweird.f32 %v1288_v5  ;;  %v1313_v41 = vand.u32 2147483647, %v1288_v5 }
 0x3ac   :  { %v1301_v48 = vor.u32 1.1754944e-38, %v1300_v14  ;;  %vm1299_vm7 = vcmp.eq.f32.partialorder %v1298_v17, 8.507059e+37 }
 0x3ad   :  { %v1316_v16 = vor.u32 1.1754944e-38, %v1315_v42  ;;  %vm1314_vm13 = vcmp.eq.f32.partialorder %v1313_v41, 8.507059e+37 }
 0x3b0   :  { %v2618_v58 = vpop.eup %2617 }
 0x3b1   :  { %v2620_v3 = vpop.eup %2619  ;;  %v1290_v59 = vmul.f32 %v2618_v58, %v1287_v57  ;;  %vm1295_vm4 = vweird.f32 %v2618_v58 }
 0x3b2   :  { %v1305_v12 = vmul.f32 %v2620_v3, %v1288_v5  ;;  %vm1296_vm6 = vmor %vm1294_vm5, %vm1295_vm4  ;;  %vm1310_vm8 = vweird.f32 %v2620_v3 }
 0x3b3   :  { %v1291_v50 = vsub.f32 1.0, %v1290_v59  ;;  %vm1311_vm12 = vmor %vm1309_vm11, %vm1310_vm8  ;;  %vm2505_vm8 = vcmask 1044480  }
 0x3b4   :  { %v1306_v45 = vsub.f32 1.0, %v1305_v12 }
 0x3b5   :  { %v1292_v15 = vmul.f32 %v2618_v58, %v1291_v50 }
 0x3b6   :  { %v1307_v21 = vmul.f32 %v2620_v3, %v1306_v45 }
 0x3b7   :  { %v1293_v22 = vadd.f32 %v2618_v58, %v1292_v15 }
 0x3b8   :  { %v1308_v18 = vadd.f32 %v2620_v3, %v1307_v21 }
 0x3b9   :  { %v1297_v0 = vsel %vm1296_vm6, %v2618_v58, %v1293_v22 }
 0x3ba   :  { %v1302_v30 = vsel %vm1299_vm7, %v1301_v48, %v1297_v0  ;;  %v1312_v13 = vsel %vm1311_vm12, %v2620_v3, %v1308_v18 }
 0x3bb   :  { %v1323_v7 = vmul.f32 %v1321_v8, %v1302_v30  ;;  %v1317_v44 = vsel %vm1314_vm13, %v1316_v16, %v1312_v13 }
 0x3bc   :  { %v1326_v62 = vsub.f32 1.0, %v1317_v44  ;;  %v1330_v38 = vmul.f32 %v1328_v60, %v1317_v44 }
 0x3bd   :  { %v1324_v27 = vadd.f32 %v1323_v7, %v3397_v40 }
 0x3bf   :  { %2621 = vtanh.f32 %v1324_v27 }
 0x3c5   :  { %v2622_v20 = vpop.eup %2621 }
 0x3c6   :  { %v1327_v1 = vmul.f32 %v2622_v20, %v1326_v62 }
 0x3c8   :  { %v3734_v6 = vadd.f32 %v1330_v38, %v1327_v1 }
 0x3ca   :  { %v1333_v52 = vrot.slane %v3734_v6, 4  ;;  %v3740_v36 = vsel %vm2503_vm14, %v3647_v47, %v3734_v6  ;;  %v1450_v21 = vrot.slane %v3734_v6, 7 }
 0x3cc   :  { %1351 = vmatmul.f32.vlgmr.msra.gmra.mxu1 %v1333_v52  ;;  %1371 = vmatmul.f32.vlgmr.msra.gmra.mxu2 %v1333_v52 }
 0x3cd   :  { %1391 = vmatmul.f32.vlgmr.msra.gmra.mxu3 %v1333_v52  ;;  %1619 = vmatpush.msra.mxu1 %v3649_v26 }
 0x3cf   :  { %1620 = vmatpush.msra.mxu1 %v3654_v19 }
 0x3d1   :  { %1621 = vmatpush.msra.mxu1 %v3659_v24 }
 0x3d3   :  { %1622 = vmatpush.msra.mxu1 %v3664_v9 }
 0x3d5   :  { %1623 = vmatpush.msra.mxu1 %v3669_v28 }
 0x3d7   :  { %1624 = vmatpush.msra.mxu1 %v3674_v31 }
 0x3d9   :  { %1625 = vmatpush.msra.mxu1 %v3679_v2 }
 0x3db   :  { %1626 = vmatpush.msra.mxu1 %v3684_v23 }
 0x3dd   :  { %1627 = vmatpush.msra.mxu1 %v3689_v43 }
 0x3df   :  { %1628 = vmatpush.msra.mxu1 %v3694_v32 }
 0x3e1   :  { %1629 = vmatpush.msra.mxu1 %v3699_v46 }
 0x3e3   :  { %1630 = vmatpush.msra.mxu1 %v3704_v33 }
 0x3e5   :  { %1631 = vmatpush.msra.mxu1 %v3709_v49 }
 0x3e7   :  { %1632 = vmatpush.msra.mxu1 %v3714_v34 }
 0x3e9   :  { %1633 = vmatpush.msra.mxu1 %v3719_v51 }
 0x3eb   :  { %1634 = vmatpush.msra.mxu1 %v3724_v35 }
 0x449   :  { %v1352_v4 = vpop.f32.mrf.mxu1 }
 0x44a   :  { %v1397_v47 = vrot.slane %v1352_v4, 3 }
 0x44c   :  { %v1401_v26 = vadd.f32 %v1397_v47, %v4459_v25 }
 0x44e   :  { %v2550_v19 = vmul.f32 -1.442695, %v1401_v26 }
 0x44f   :  { %v1372_v24 = vpop.f32.mrf.mxu2 }
 0x450   :  { %2623 = vpow2.f32 %v2550_v19  ;;  %v1398_v9 = vrot.slane %v1372_v24, 3  ;;  %v1392_v49 = vpop.f32.mrf.mxu3 }
 0x451   :  { %v1441_v54 = vadd.f32 %v3760_v37, %v1392_v49 }
 0x452   :  { %v1402_v28 = vadd.f32 %v1398_v9, %v4460_v29 }
 0x453   :  { %v1443_v5 = vrot.slane %v1441_v54, 3 }
 0x454   :  { %v2551_v31 = vmul.f32 -1.442695, %v1402_v28 }
 0x456   :  { %v2624_v2 = vpop.eup %2623  ;;  %2625 = vpow2.f32 %v2551_v31 }
 0x457   :  { %v1409_v23 = vadd.f32 1.0, %v2624_v2 }
 0x459   :  { %2627 = vrcp.f32 %v1409_v23  ;;  %v1422_v51 = vand.u32 2147483648, %v1409_v23  ;;  %v1420_v53 = vand.u32 2147483647, %v1409_v23  ;;  %vm1416_vm0 = vweird.f32 %v1409_v23 }
 0x45b   :  { %v1423_v56 = vor.u32 1.1754944e-38, %v1422_v51  ;;  %vm1421_vm2 = vcmp.eq.f32.partialorder %v1420_v53, 8.507059e+37 }
 0x45c   :  { %v2626_v43 = vpop.eup %2625 }
 0x45d   :  { %v1410_v32 = vadd.f32 1.0, %v2626_v43 }
 0x45f   :  { %v2628_v46 = vpop.eup %2627  ;;  %2629 = vrcp.f32 %v1410_v32  ;;  %v1437_v59 = vand.u32 2147483648, %v1410_v32  ;;  %v1435_v12 = vand.u32 2147483647, %v1410_v32  ;;  %vm1431_vm5 = vweird.f32 %v1410_v32 }
 0x460   :  { %v1412_v33 = vmul.f32 %v2628_v46, %v1409_v23  ;;  %vm1417_vm15 = vweird.f32 %v2628_v46 }
 0x461   :  { %vm1418_vm1 = vmor %vm1416_vm0, %vm1417_vm15  ;;  %v1438_v45 = vor.u32 1.1754944e-38, %v1437_v59  ;;  %vm1436_vm7 = vcmp.eq.f32.partialorder %v1435_v12, 8.507059e+37  ;;  %v3783_v12 = vld [vmem:[#allocation5 + $0x350] sm:$0xff] }
 0x462   :  { %v1413_v34 = vsub.f32 1.0, %v1412_v33  ;;  %1721 = vmatpush.msra.mxu3 %v3783_v12 }
 0x464   :  { %v1414_v35 = vmul.f32 %v2628_v46, %v1413_v34 }
 0x465   :  { %v2630_v39 = vpop.eup %2629 }
 0x466   :  { %v1427_v55 = vmul.f32 %v2630_v39, %v1410_v32  ;;  %v1415_v10 = vadd.f32 %v2628_v46, %v1414_v35  ;;  %vm1432_vm4 = vweird.f32 %v2630_v39 }
 0x467   :  { %vm1433_vm6 = vmor %vm1431_vm5, %vm1432_vm4  ;;  %vm2507_vm5 = vcmask 1045504  }
 0x468   :  { %v1428_v61 = vsub.f32 1.0, %v1427_v55  ;;  %v1419_v57 = vsel %vm1418_vm1, %v2628_v46, %v1415_v10 }
 0x469   :  { %v1424_v58 = vsel %vm1421_vm2, %v1423_v56, %v1419_v57 }
 0x46a   :  { %v1429_v3 = vmul.f32 %v2630_v39, %v1428_v61  ;;  %v1445_v63 = vmul.f32 %v1443_v5, %v1424_v58 }
 0x46c   :  { %v1430_v50 = vadd.f32 %v2630_v39, %v1429_v3  ;;  %v1446_v14 = vadd.f32 %v1445_v63, %v3397_v40  ;;  %v3781_v63 = vld [vmem:[#allocation5 + $0x348] sm:$0xff] }
 0x46d   :  { %1701 = vmatpush.msra.mxu2 %v3781_v63 }
 0x46e   :  { %v1434_v11 = vsel %vm1433_vm6, %v2630_v39, %v1430_v50  ;;  %2631 = vtanh.f32 %v1446_v14  ;;  %v3785_v50 = vld [vmem:[#allocation5 + $0x358] sm:$0xff]  ;;  %v3790_v14 = vld [vmem:[#allocation5 + $0x330] sm:$0xff] }
 0x46f   :  { %v1439_v15 = vsel %vm1436_vm7, %v1438_v45, %v1434_v11  ;;  %v3792_v45 = vld [vmem:[#allocation5 + $0x338] sm:$0xff]  ;;  %v3794_v11 = vld [vmem:[#allocation5 + $0x340] sm:$0xff]  ;;  %1702 = vmatpush.msra.mxu2 %v3790_v14 }
 0x470   :  { %v1448_v17 = vsub.f32 1.0, %v1439_v15  ;;  %v1452_v8 = vmul.f32 %v1450_v21, %v1439_v15  ;;  %1722 = vmatpush.msra.mxu3 %v3792_v45  ;;  %v3800_v15 = vld [vmem:[#allocation5 + $0x318] sm:$0xff]  ;;  %v3804_v21 = vld [vmem:[#allocation5 + $0x328] sm:$0xff] }
 0x471   :  { %4462 = vst [vmem:[#allocation12_spill] sm:$0xff] %v3800_v15  ;;  %1703 = vmatpush.msra.mxu2 %v3800_v15 }
 0x474   :  { %v2632_v22 = vpop.eup %2631 }
 0x475   :  { %v1449_v48 = vmul.f32 %v2632_v22, %v1448_v17  ;;  %v3802_v17 = vld [vmem:[#allocation5 + $0x320] sm:$0xff] }
 0x476   :  { %1723 = vmatpush.msra.mxu3 %v3802_v17  ;;  %v3810_v22 = vld [vmem:[#allocation5 + $0x300] sm:$0xff] }
 0x477   :  { %v1453_v0 = vadd.f32 %v1452_v8, %v1449_v48  ;;  %v3812_v48 = vld [vmem:[#allocation5 + $0x308] sm:$0xff]  ;;  %v3814_v8 = vld [vmem:[#allocation5 + $0x310] sm:$0xff]  ;;  %1704 = vmatpush.msra.mxu2 %v3810_v22 }
 0x478   :  { %1724 = vmatpush.msra.mxu3 %v3812_v48 }
 0x479   :  { %v1455_v30 = vrot.slane %v1453_v0, 5  ;;  %v3767_v18 = vsel %vm2505_vm8, %v3740_v36, %v1453_v0  ;;  %v1572_v56 = vrot.slane %v1453_v0, 7 }
 0x47b   :  { %1473 = vmatmul.f32.vlgmr.msrb.gmra.mxu0 %v1455_v30  ;;  %1493 = vmatmul.f32.vlgmr.msrb.gmra.mxu1 %v1455_v30 }
 0x47c   :  { %1513 = vmatmul.f32.vlgmr.msrb.gmra.mxu2 %v1455_v30  ;;  %1741 = vmatpush.msrb.mxu0 %v3785_v50 }
 0x47d   :  { %1805 = vmatpush.msrb.mxu1 %v3781_v63 }
 0x47e   :  { %1742 = vmatpush.msrb.mxu0 %v3794_v11 }
 0x47f   :  { %1806 = vmatpush.msrb.mxu1 %v3790_v14 }
 0x480   :  { %1743 = vmatpush.msrb.mxu0 %v3804_v21 }
 0x481   :  { %1807 = vmatpush.msrb.mxu1 %v3800_v15 }
 0x482   :  { %1744 = vmatpush.msrb.mxu0 %v3814_v8 }
 0x483   :  { %1808 = vmatpush.msrb.mxu1 %v3810_v22 }
 0x4f8   :  { %v1474_v7 = vpop.f32.mrf.mxu0  ;;  %v1494_v42 = vpop.f32.mrf.mxu1 }
 0x4f9   :  { %v1519_v41 = vrot.slane %v1474_v7, 2  ;;  %v1520_v27 = vrot.slane %v1494_v42, 2  ;;  %v3822_v7 = vld [vmem:[#allocation5 + $0x2f0] sm:$0xff]  ;;  %v3824_v42 = vld [vmem:[#allocation5 + $0x2f8] sm:$0xff] }
 0x4fa   :  { %1725 = vmatpush.msra.mxu3 %v3822_v7  ;;  %1745 = vmatpush.msrb.mxu0 %v3824_v42 }
 0x4fb   :  { %v1523_v13 = vadd.f32 %v1519_v41, %v4459_v25  ;;  %v1524_v16 = vadd.f32 %v1520_v27, %v4460_v29  ;;  %v3831_v27 = vld [vmem:[#allocation5 + $0x2d0] sm:$0xff] }
 0x4fd   :  { %v2552_v44 = vmul.f32 -1.442695, %v1523_v13  ;;  %v2553_v62 = vmul.f32 -1.442695, %v1524_v16  ;;  %v3833_v13 = vld [vmem:[#allocation5 + $0x2d8] sm:$0xff]  ;;  %v3835_v16 = vld [vmem:[#allocation5 + $0x2e0] sm:$0xff] }
 0x4fe   :  { %1726 = vmatpush.msra.mxu3 %v3833_v13  ;;  %1746 = vmatpush.msrb.mxu0 %v3835_v16 }
 0x4ff   :  { %2633 = vpow2.f32 %v2552_v44  ;;  %v1514_v47 = vpop.f32.mrf.mxu2 }
 0x500   :  { %2635 = vpow2.f32 %v2553_v62  ;;  %v1563_v31 = vadd.f32 %v3760_v37, %v1514_v47  ;;  %v3841_v62 = vld [vmem:[#allocation5 + $0x2b8] sm:$0xff] }
 0x501   :  { %v3864_v47 = vld [vmem:[#allocation5 + $0x298] sm:$0xff] }
 0x502   :  { %v1565_v46 = vrot.slane %v1563_v31, 2  ;;  %v3878_v31 = vld [vmem:[#allocation5 + $0x258] sm:$0xff] }
 0x505   :  { %v2634_v60 = vpop.eup %2633 }
 0x506   :  { %v2636_v20 = vpop.eup %2635  ;;  %v1531_v1 = vadd.f32 1.0, %v2634_v60  ;;  %v3845_v60 = vld [vmem:[#allocation5 + $0x2c8] sm:$0xff] }
 0x507   :  { %v1532_v38 = vadd.f32 1.0, %v2636_v20  ;;  %1747 = vmatpush.msrb.mxu0 %v3845_v60 }
 0x508   :  { %2637 = vrcp.f32 %v1531_v1  ;;  %v1544_v24 = vand.u32 2147483648, %v1531_v1  ;;  %v1542_v28 = vand.u32 2147483647, %v1531_v1  ;;  %vm1538_vm12 = vweird.f32 %v1531_v1 }
 0x509   :  { %2639 = vrcp.f32 %v1532_v38  ;;  %v1559_v34 = vand.u32 2147483648, %v1532_v38  ;;  %vm1553_vm1 = vweird.f32 %v1532_v38  ;;  %v1557_v35 = vand.u32 2147483647, %v1532_v38 }
 0x50a   :  { %v1545_v43 = vor.u32 1.1754944e-38, %v1544_v24  ;;  %vm1543_vm15 = vcmp.eq.f32.partialorder %v1542_v28, 8.507059e+37  ;;  %v3870_v24 = vld [vmem:[#allocation5 + $0x278] sm:$0xff] }
 0x50b   :  { %v1560_v39 = vor.u32 1.1754944e-38, %v1559_v34  ;;  %vm1558_vm4 = vcmp.eq.f32.partialorder %v1557_v35, 8.507059e+37  ;;  %v3902_v34 = vld [vmem:[#allocation5 + $0x230] sm:$0xff] }
 0x50c   :  { %v3911_v35 = vld [vmem:[#allocation5 + $0x210] sm:$0xff] }
 0x50e   :  { %v2638_v6 = vpop.eup %2637 }
 0x50f   :  { %v2640_v52 = vpop.eup %2639  ;;  %v1534_v36 = vmul.f32 %v2638_v6, %v1531_v1  ;;  %vm1539_vm11 = vweird.f32 %v2638_v6 }
 0x510   :  { %v1549_v4 = vmul.f32 %v2640_v52, %v1532_v38  ;;  %vm1540_vm13 = vmor %vm1538_vm12, %vm1539_vm11  ;;  %vm1554_vm0 = vweird.f32 %v2640_v52  ;;  %v3851_v38 = vld [vmem:[#allocation5 + $0x2a0] sm:$0xff] }
 0x511   :  { %v1535_v26 = vsub.f32 1.0, %v1534_v36  ;;  %vm1555_vm2 = vmor %vm1553_vm1, %vm1554_vm0  ;;  %v3860_v36 = vld [vmem:[#allocation5 + $0x288] sm:$0xff] }
 0x512   :  { %v1550_v19 = vsub.f32 1.0, %v1549_v4  ;;  %v3862_v4 = vld [vmem:[#allocation5 + $0x290] sm:$0xff] }
 0x513   :  { %v1536_v9 = vmul.f32 %v2638_v6, %v1535_v26 }
 0x514   :  { %v1551_v2 = vmul.f32 %v2640_v52, %v1550_v19  ;;  %v3868_v19 = vld [vmem:[#allocation5 + $0x270] sm:$0xff] }
 0x515   :  { %v1537_v23 = vadd.f32 %v2638_v6, %v1536_v9  ;;  %v3875_v9 = vld [vmem:[#allocation5 + $0x280] sm:$0xff] }
 0x516   :  { %v1552_v49 = vadd.f32 %v2640_v52, %v1551_v2  ;;  %v3885_v2 = vld [vmem:[#allocation5 + $0x268] sm:$0xff] }
 0x517   :  { %v1541_v32 = vsel %vm1540_vm13, %v2638_v6, %v1537_v23  ;;  %v3853_v6 = vld [vmem:[#allocation5 + $0x2a8] sm:$0xff] }
 0x518   :  { %v1546_v33 = vsel %vm1543_vm15, %v1545_v43, %v1541_v32  ;;  %v1556_v54 = vsel %vm1555_vm2, %v2640_v52, %v1552_v49  ;;  %v3855_v52 = vld [vmem:[#allocation5 + $0x2b0] sm:$0xff]  ;;  %v3888_v43 = vld [vmem:[#allocation5 + $0x240] sm:$0xff]  ;;  %v3890_v32 = vld [vmem:[#allocation5 + $0x248] sm:$0xff]  ;;  %vm2509_vm2 = vcmask 1046528  }
 0x519   :  { %v1567_v51 = vmul.f32 %v1565_v46, %v1546_v33  ;;  %v1561_v55 = vsel %vm1558_vm4, %v1560_v39, %v1556_v54  ;;  %1748 = vmatpush.msrb.mxu0 %v3855_v52  ;;  %v3897_v33 = vld [vmem:[#allocation5 + $0x250] sm:$0xff]  ;;  %v3900_v49 = vld [vmem:[#allocation5 + $0x228] sm:$0xff]  ;;  %v3918_v54 = vld [vmem:[#allocation5 + $0x220] sm:$0xff] }
 0x51a   :  { %v1570_v10 = vsub.f32 1.0, %v1561_v55  ;;  %v1574_v5 = vmul.f32 %v1572_v56, %v1561_v55  ;;  %v3921_v55 = vld [vmem:[#allocation5 + $0x1f8] sm:$0xff] }
 0x51b   :  { %v1568_v53 = vadd.f32 %v1567_v51, %v3397_v40  ;;  %1749 = vmatpush.msrb.mxu0 %v3864_v47  ;;  %v3907_v51 = vld [vmem:[#allocation5 + $0x238] sm:$0xff]  ;;  %4463 = vst [vmem:[#allocation21_spill] sm:$0xff] %v3921_v55 }
 0x51d   :  { %2641 = vtanh.f32 %v1568_v53  ;;  %1750 = vmatpush.msrb.mxu0 %v3875_v9  ;;  %v3913_v53 = vld [vmem:[#allocation5 + $0x218] sm:$0xff] }
 0x51f   :  { %1751 = vmatpush.msrb.mxu0 %v3885_v2 }
 0x521   :  { %1752 = vmatpush.msrb.mxu0 %v3897_v33 }
 0x523   :  { %v2642_v61 = vpop.eup %2641  ;;  %1753 = vmatpush.msrb.mxu0 %v3907_v51 }
 0x524   :  { %v1571_v57 = vmul.f32 %v2642_v61, %v1570_v10  ;;  %v3923_v10 = vld [vmem:[#allocation5 + $0x200] sm:$0xff]  ;;  %v3928_v61 = vld [vmem:[#allocation5 + $0x208] sm:$0xff] }
 0x525   :  { %4464 = vst [vmem:[#allocation14_spill] sm:$0xff] %v3923_v10  ;;  %1754 = vmatpush.msrb.mxu0 %v3918_v54 }
 0x526   :  { %v3773_v58 = vadd.f32 %v1574_v5, %v1571_v57  ;;  %4465 = vst [vmem:[#allocation13_spill] sm:$0xff] %v3928_v61  ;;  %v3931_v57 = vld [vmem:[#allocation5 + $0x1e0] sm:$0xff]  ;;  %v3933_v5 = vld [vmem:[#allocation5 + $0x1e8] sm:$0xff] }
 0x527   :  { %4466 = vst [vmem:[#allocation22_spill] sm:$0xff] %v3931_v57  ;;  %1755 = vmatpush.msrb.mxu0 %v3928_v61 }
 0x528   :  { %v1577_v3 = vrot.slane %v3773_v58, 6  ;;  %v3779_v59 = vsel %vm2507_vm5, %v3767_v18, %v3773_v58  ;;  %v3820_v18 = vld [vmem:[#allocation5 + $0x2e8] sm:$0xff]  ;;  %4467 = vst [vmem:[#allocation16_spill] sm:$0xff] %v3933_v5 }
 0x529   :  { %1705 = vmatpush.msra.mxu2 %v3820_v18  ;;  %1809 = vmatpush.msrb.mxu1 %v3820_v18 }
 0x52a   :  { %1595 = vmatmul.f32.vlgmr.msrb.gmra.mxu3 %v1577_v3  ;;  %1615 = vmatmul.f32.vlgmr.msra.gmra.mxu0 %v1577_v3 }
 0x52b   :  { %1635 = vmatmul.f32.vlgmr.msra.gmra.mxu1 %v1577_v3  ;;  %1706 = vmatpush.msra.mxu2 %v3831_v27  ;;  %v3938_v3 = vld [vmem:[#allocation5 + $0x1f0] sm:$0xff] }
 0x52c   :  { %1810 = vmatpush.msrb.mxu1 %v3831_v27  ;;  %4468 = vst [vmem:[#allocation15_spill] sm:$0xff] %v3938_v3  ;;  %1756 = vmatpush.msrb.mxu0 %v3938_v3 }
 0x52d   :  { %1707 = vmatpush.msra.mxu2 %v3841_v62 }
 0x52e   :  { %1811 = vmatpush.msrb.mxu1 %v3841_v62  ;;  %1901 = vmatpush.msra.mxu0 %v3781_v63 }
 0x52f   :  { %1708 = vmatpush.msra.mxu2 %v3851_v38 }
 0x530   :  { %1812 = vmatpush.msrb.mxu1 %v3851_v38  ;;  %1902 = vmatpush.msra.mxu0 %v3790_v14 }
 0x531   :  { %1709 = vmatpush.msra.mxu2 %v3860_v36 }
 0x532   :  { %1813 = vmatpush.msrb.mxu1 %v3860_v36  ;;  %1903 = vmatpush.msra.mxu0 %v3800_v15 }
 0x533   :  { %1710 = vmatpush.msra.mxu2 %v3868_v19 }
 0x534   :  { %1814 = vmatpush.msrb.mxu1 %v3868_v19  ;;  %1904 = vmatpush.msra.mxu0 %v3810_v22 }
 0x535   :  { %1711 = vmatpush.msra.mxu2 %v3878_v31 }
 0x536   :  { %1815 = vmatpush.msrb.mxu1 %v3878_v31  ;;  %1905 = vmatpush.msra.mxu0 %v3820_v18 }
 0x537   :  { %1712 = vmatpush.msra.mxu2 %v3888_v43 }
 0x538   :  { %1816 = vmatpush.msrb.mxu1 %v3888_v43  ;;  %1906 = vmatpush.msra.mxu0 %v3831_v27 }
 0x539   :  { %1713 = vmatpush.msra.mxu2 %v3900_v49 }
 0x53a   :  { %1817 = vmatpush.msrb.mxu1 %v3900_v49  ;;  %1907 = vmatpush.msra.mxu0 %v3841_v62 }
 0x53b   :  { %1714 = vmatpush.msra.mxu2 %v3911_v35 }
 0x53c   :  { %1818 = vmatpush.msrb.mxu1 %v3911_v35  ;;  %1908 = vmatpush.msra.mxu0 %v3851_v38 }
 0x53d   :  { %1715 = vmatpush.msra.mxu2 %v3921_v55 }
 0x53e   :  { %1819 = vmatpush.msrb.mxu1 %v3921_v55  ;;  %1909 = vmatpush.msra.mxu0 %v3860_v36 }
 0x53f   :  { %1716 = vmatpush.msra.mxu2 %v3931_v57 }
 0x540   :  { %1820 = vmatpush.msrb.mxu1 %v3931_v57  ;;  %1910 = vmatpush.msra.mxu0 %v3868_v19 }
 0x541   :  { %1825 = vmatpush.msrb.mxu2 %v3783_v12 }
 0x542   :  { %1921 = vmatpush.msra.mxu1 %v3783_v12  ;;  %1911 = vmatpush.msra.mxu0 %v3878_v31 }
 0x543   :  { %1826 = vmatpush.msrb.mxu2 %v3792_v45 }
 0x544   :  { %1922 = vmatpush.msra.mxu1 %v3792_v45  ;;  %1912 = vmatpush.msra.mxu0 %v3888_v43 }
 0x545   :  { %1827 = vmatpush.msrb.mxu2 %v3802_v17 }
 0x546   :  { %1923 = vmatpush.msra.mxu1 %v3802_v17  ;;  %1913 = vmatpush.msra.mxu0 %v3900_v49 }
 0x547   :  { %1828 = vmatpush.msrb.mxu2 %v3812_v48 }
 0x548   :  { %1924 = vmatpush.msra.mxu1 %v3812_v48  ;;  %1914 = vmatpush.msra.mxu0 %v3911_v35 }
 0x549   :  { %1829 = vmatpush.msrb.mxu2 %v3822_v7 }
 0x54a   :  { %1925 = vmatpush.msra.mxu1 %v3822_v7  ;;  %1915 = vmatpush.msra.mxu0 %v3921_v55 }
 0x54b   :  { %1830 = vmatpush.msrb.mxu2 %v3833_v13 }
 0x54c   :  { %1926 = vmatpush.msra.mxu1 %v3833_v13  ;;  %1916 = vmatpush.msra.mxu0 %v3931_v57 }
 0x5a7   :  { %v1616_v0 = vpop.f32.mrf.mxu0 }
 0x5a8   :  { %v1642_v30 = vrot.slane %v1616_v0, 1 }
 0x5aa   :  { %v1646_v41 = vadd.f32 %v1642_v30, %v4460_v29  ;;  %v3843_v29 = vld [vmem:[#allocation5 + $0x2c0] sm:$0xff] }
 0x5ab   :  { %1727 = vmatpush.msra.mxu3 %v3843_v29  ;;  %1831 = vmatpush.msrb.mxu2 %v3843_v29 }
 0x5ac   :  { %v2555_v44 = vmul.f32 -1.442695, %v1646_v41  ;;  %1927 = vmatpush.msra.mxu1 %v3843_v29 }
 0x5ad   :  { %v1596_v20 = vpop.f32.mrf.mxu3  ;;  %1728 = vmatpush.msra.mxu3 %v3853_v6  ;;  %1832 = vmatpush.msrb.mxu2 %v3853_v6 }
 0x5ae   :  { %2643 = vpow2.f32 %v2555_v44  ;;  %v1641_v1 = vrot.slane %v1596_v20, 1  ;;  %1928 = vmatpush.msra.mxu1 %v3853_v6 }
 0x5af   :  { %1729 = vmatpush.msra.mxu3 %v3862_v4  ;;  %1833 = vmatpush.msrb.mxu2 %v3862_v4 }
 0x5b0   :  { %v1645_v26 = vadd.f32 %v1641_v1, %v4459_v25  ;;  %v3880_v25 = vld [vmem:[#allocation5 + $0x260] sm:$0xff]  ;;  %v1636_v1 = vpop.f32.mrf.mxu1  ;;  %1929 = vmatpush.msra.mxu1 %v3862_v4 }
 0x5b1   :  { %1730 = vmatpush.msra.mxu3 %v3870_v24  ;;  %1834 = vmatpush.msrb.mxu2 %v3870_v24 }
 0x5b2   :  { %v2554_v28 = vmul.f32 -1.442695, %v1645_v26  ;;  %1930 = vmatpush.msra.mxu1 %v3870_v24 }
 0x5b3   :  { %1731 = vmatpush.msra.mxu3 %v3880_v25  ;;  %1835 = vmatpush.msrb.mxu2 %v3880_v25 }
 0x5b4   :  { %v2644_v23 = vpop.eup %2643  ;;  %2645 = vpow2.f32 %v2554_v28  ;;  %1931 = vmatpush.msra.mxu1 %v3880_v25 }
 0x5b5   :  { %v3893_v46 = vadd.f32 1.0, %v2644_v23  ;;  %1732 = vmatpush.msra.mxu3 %v3890_v32  ;;  %v1685_v23 = vadd.f32 %v3760_v37, %v1636_v1  ;;  %1836 = vmatpush.msrb.mxu2 %v3890_v32 }
 0x5b6   :  { %1932 = vmatpush.msra.mxu1 %v3890_v32 }
 0x5b7   :  { %2647 = vrcp.f32 %v3893_v46  ;;  %1733 = vmatpush.msra.mxu3 %v3902_v34  ;;  %v1687_v1 = vrot.slane %v1685_v23, 1  ;;  %vm1675_vm15 = vweird.f32 %v3893_v46  ;;  %1837 = vmatpush.msrb.mxu2 %v3902_v34 }
 0x5b8   :  { %1933 = vmatpush.msra.mxu1 %v3902_v34 }
 0x5b9   :  { %1734 = vmatpush.msra.mxu3 %v3913_v53  ;;  %1838 = vmatpush.msrb.mxu2 %v3913_v53 }
 0x5ba   :  { %v2646_v39 = vpop.eup %2645  ;;  %1934 = vmatpush.msra.mxu1 %v3913_v53 }
 0x5bb   :  { %v1653_v56 = vadd.f32 1.0, %v2646_v39  ;;  %1735 = vmatpush.msra.mxu3 %v3923_v10  ;;  %1839 = vmatpush.msrb.mxu2 %v3923_v10 }
 0x5bc   :  { %1935 = vmatpush.msra.mxu1 %v3923_v10 }
 0x5bd   :  { %2649 = vrcp.f32 %v1653_v56  ;;  %v3940_v0 = vpop.eup %2647  ;;  %1736 = vmatpush.msra.mxu3 %v3933_v5  ;;  %v1666_v28 = vand.u32 2147483648, %v1653_v56  ;;  %vm1660_vm7 = vweird.f32 %v1653_v56  ;;  %1840 = vmatpush.msrb.mxu2 %v3933_v5 }
 0x5be   :  { %v1671_v30 = vmul.f32 %v3940_v0, %v3893_v46  ;;  %vm1676_vm13 = vweird.f32 %v3940_v0  ;;  %1936 = vmatpush.msra.mxu1 %v3933_v5 }
 0x5bf   :  { %1845 = vmatpush.msrb.mxu3 %v3785_v50  ;;  %v1667_v37 = vor.u32 1.1754944e-38, %v1666_v28  ;;  %v1681_v28 = vand.u32 2147483648, %v3893_v46  ;;  %vm1677_vm0 = vmor %vm1675_vm15, %vm1676_vm13 }
 0x5c0   :  { %v1672_v20 = vsub.f32 1.0, %v1671_v30  ;;  %v1664_v30 = vand.u32 2147483647, %v1653_v56 }
 0x5c1   :  { %1846 = vmatpush.msrb.mxu3 %v3794_v11 }
 0x5c2   :  { %vm1665_vm12 = vcmp.eq.f32.partialorder %v1664_v30, 8.507059e+37  ;;  %v1682_v30 = vor.u32 1.1754944e-38, %v1681_v28  ;;  %v4074_v28 = vld [vmem:[#allocation7 + $0x2] ss:$4 sm:$0x7] }
 0x5c3   :  { %v2650_v41 = vpop.eup %2649  ;;  %1847 = vmatpush.msrb.mxu3 %v3804_v21  ;;  %4470 = vst [vmem:[#allocation23_spill] sm:$0xff] %v4074_v28 }
 0x5c4   :  { %v1656_v44 = vmul.f32 %v2650_v41, %v1653_v56  ;;  %vm1661_vm6 = vweird.f32 %v2650_v41 }
 0x5c5   :  { %1848 = vmatpush.msrb.mxu3 %v3814_v8  ;;  %vm1662_vm11 = vmor %vm1660_vm7, %vm1661_vm6 }
 0x5c6   :  { %v1657_v26 = vsub.f32 1.0, %v1656_v44  ;;  %v1673_v44 = vmul.f32 %v3940_v0, %v1672_v20 }
 0x5c7   :  { %1849 = vmatpush.msrb.mxu3 %v3824_v42 }
 0x5c8   :  { %v1658_v39 = vmul.f32 %v2650_v41, %v1657_v26  ;;  %v1674_v20 = vadd.f32 %v3940_v0, %v1673_v44 }
 0x5c9   :  { %1850 = vmatpush.msrb.mxu3 %v3835_v16 }
 0x5ca   :  { %v1659_v15 = vadd.f32 %v2650_v41, %v1658_v39  ;;  %v1678_v23 = vsel %vm1677_vm0, %v3940_v0, %v1674_v20  ;;  %v1694_v0 = vrot.slane %v3773_v58, 7 }
 0x5cb   :  { %1851 = vmatpush.msrb.mxu3 %v3845_v60 }
 0x5cc   :  { %v1663_v26 = vsel %vm1662_vm11, %v2650_v41, %v1659_v15  ;;  %v1679_v15 = vand.u32 2147483647, %v3893_v46 }
 0x5cd   :  { %v1668_v56 = vsel %vm1665_vm12, %v1667_v37, %v1663_v26  ;;  %1852 = vmatpush.msrb.mxu3 %v3855_v52 }
 0x5ce   :  { %v1689_v39 = vmul.f32 %v1687_v1, %v1668_v56  ;;  %vm1680_vm1 = vcmp.eq.f32.partialorder %v1679_v15, 8.507059e+37 }
 0x5cf   :  { %1853 = vmatpush.msrb.mxu3 %v3864_v47 }
 0x5d0   :  { %v1690_v41 = vadd.f32 %v1689_v39, %v3397_v40  ;;  %v1683_v40 = vsel %vm1680_vm1, %v1682_v30, %v1678_v23 }
 0x5d1   :  { %1854 = vmatpush.msrb.mxu3 %v3875_v9  ;;  %v1692_v46 = vsub.f32 1.0, %v1683_v40  ;;  %v1696_v1 = vmul.f32 %v1694_v0, %v1683_v40 }
 0x5d2   :  { %2651 = vtanh.f32 %v1690_v41 }
 0x5d3   :  { %1855 = vmatpush.msrb.mxu3 %v3885_v2 }
 0x5d5   :  { %1856 = vmatpush.msrb.mxu3 %v3897_v33 }
 0x5d7   :  { %1857 = vmatpush.msrb.mxu3 %v3907_v51 }
 0x5d8   :  { %v2652_v44 = vpop.eup %2651 }
 0x5d9   :  { %v1693_v37 = vmul.f32 %v2652_v44, %v1692_v46  ;;  %1858 = vmatpush.msrb.mxu3 %v3918_v54 }
 0x5db   :  { %v1697_v58 = vadd.f32 %v1696_v1, %v1693_v37  ;;  %1859 = vmatpush.msrb.mxu3 %v3928_v61 }
 0x5dd   :  { %v1699_v26 = vrot.slane %v1697_v58, 7  ;;  %1799 = vst [vmem:[#allocation1] sm:$0xff] %v1697_v58  ;;  %v2510_v56 = vsel %vm2509_vm2, %v3779_v59, %v1697_v58  ;;  %1860 = vmatpush.msrb.mxu3 %v3938_v3  ;;  %v4469_v59 = vld [vmem:[#allocation12_spill] sm:$0xff] }
 0x5de   :  { %2518 = vst [vmem:[#allocation8] sm:$0xff] %v2510_v56  ;;  %v4078_v56 = vld [vmem:[#allocation7 + $0xb] sm:$0x1] }
 0x5df   :  { %1717 = vmatmul.f32.vlgmr.msra.gmra.mxu2 %v1699_v26  ;;  %1737 = vmatmul.f32.vlgmr.msra.gmra.mxu3 %v1699_v26 }
 0x5e0   :  { %1757 = vmatmul.f32.vlgmr.msrb.gmra.mxu0 %v1699_v26  ;;  %1941 = vmatpush.msra.mxu2 %v3785_v50 }
 0x5e1   :  { %1997 = vmatpush.msra.mxu3 %v3781_v63  ;;  %2017 = vmatpush.msrb.mxu0 %v3783_v12 }
 0x5e2   :  { %1942 = vmatpush.msra.mxu2 %v3794_v11 }
 0x5e3   :  { %1998 = vmatpush.msra.mxu3 %v3790_v14  ;;  %2018 = vmatpush.msrb.mxu0 %v3792_v45 }
 0x5e4   :  { %1943 = vmatpush.msra.mxu2 %v3804_v21 }
 0x5e5   :  { %1999 = vmatpush.msra.mxu3 %v4469_v59  ;;  %2019 = vmatpush.msrb.mxu0 %v3802_v17 }
 0x5e6   :  { %1944 = vmatpush.msra.mxu2 %v3814_v8 }
 0x5e7   :  { %2000 = vmatpush.msra.mxu3 %v3810_v22  ;;  %2020 = vmatpush.msrb.mxu0 %v3812_v48 }
 0x5e8   :  { %1945 = vmatpush.msra.mxu2 %v3824_v42 }
 0x5e9   :  { %2001 = vmatpush.msra.mxu3 %v3820_v18  ;;  %2021 = vmatpush.msrb.mxu0 %v3822_v7 }
 0x5ea   :  { %1946 = vmatpush.msra.mxu2 %v3835_v16 }
 0x5eb   :  { %2002 = vmatpush.msra.mxu3 %v3831_v27  ;;  %2022 = vmatpush.msrb.mxu0 %v3833_v13 }
 0x5ec   :  { %1947 = vmatpush.msra.mxu2 %v3845_v60 }
 0x5ed   :  { %2003 = vmatpush.msra.mxu3 %v3841_v62  ;;  %2023 = vmatpush.msrb.mxu0 %v3843_v29 }
 0x5ee   :  { %1948 = vmatpush.msra.mxu2 %v3855_v52 }
 0x5ef   :  { %2004 = vmatpush.msra.mxu3 %v3851_v38  ;;  %2024 = vmatpush.msrb.mxu0 %v3853_v6 }
 0x5f0   :  { %1949 = vmatpush.msra.mxu2 %v3864_v47 }
 0x5f1   :  { %2005 = vmatpush.msra.mxu3 %v3860_v36  ;;  %2025 = vmatpush.msrb.mxu0 %v3862_v4 }
 0x5f2   :  { %1950 = vmatpush.msra.mxu2 %v3875_v9 }
 0x5f3   :  { %2006 = vmatpush.msra.mxu3 %v3868_v19  ;;  %2026 = vmatpush.msrb.mxu0 %v3870_v24 }
 0x5f4   :  { %1951 = vmatpush.msra.mxu2 %v3885_v2 }
 0x5f5   :  { %2007 = vmatpush.msra.mxu3 %v3878_v31  ;;  %2027 = vmatpush.msrb.mxu0 %v3880_v25 }
 0x5f6   :  { %1952 = vmatpush.msra.mxu2 %v3897_v33 }
 0x5f7   :  { %2008 = vmatpush.msra.mxu3 %v3888_v43  ;;  %2028 = vmatpush.msrb.mxu0 %v3890_v32 }
 0x5f8   :  { %1953 = vmatpush.msra.mxu2 %v3907_v51 }
 0x5f9   :  { %2009 = vmatpush.msra.mxu3 %v3900_v49  ;;  %2029 = vmatpush.msrb.mxu0 %v3902_v34 }
 0x5fa   :  { %1954 = vmatpush.msra.mxu2 %v3918_v54 }
 0x5fb   :  { %2010 = vmatpush.msra.mxu3 %v3911_v35  ;;  %2030 = vmatpush.msrb.mxu0 %v3913_v53 }
 0x5fc   :  { %1955 = vmatpush.msra.mxu2 %v3928_v61 }
 0x5fd   :  { %2011 = vmatpush.msra.mxu3 %v3921_v55  ;;  %2031 = vmatpush.msrb.mxu0 %v3923_v10  ;;  %v1801_v10 = vld [vmem:[#allocation1 + $0x7] ss:$9 sm:$0xff] }
 0x5fe   :  { %1956 = vmatpush.msra.mxu2 %v3938_v3 }
 0x5ff   :  { %2012 = vmatpush.msra.mxu3 %v3931_v57  ;;  %2032 = vmatpush.msrb.mxu0 %v3933_v5 }
 0x662   :  { %v1738_v20 = vpop.f32.mrf.mxu3  ;;  %v1718_v15 = vpop.f32.mrf.mxu2 }
 0x663   :  { %v1763_v39 = vrot.slane %v1738_v20, 7  ;;  %v1758_v20 = vpop.f32.mrf.mxu0 }
 0x665   :  { %v1765_v41 = vsel %vm1764_vm9, %v1718_v15, %v1763_v39  ;;  %v1787_v15 = vadd.f32 %v1758_v20, %v4078_v56 }
 0x666   :  { %v1767_v23 = vadd.f32 %v1765_v41, %v4074_v28  ;;  %v4082_v41 = vrot.slane %v4074_v28, 2 }
 0x668   :  { %v2556_v30 = vmul.f32 -1.442695, %v1767_v23 }
 0x66a   :  { %2653 = vpow2.f32 %v2556_v30 }
 0x670   :  { %v2654_v40 = vpop.eup %2653 }
 0x671   :  { %v1771_v46 = vadd.f32 1.0, %v2654_v40 }
 0x673   :  { %2655 = vrcp.f32 %v1771_v46  ;;  %v1783_v1 = vand.u32 2147483648, %v1771_v46  ;;  %v1781_v26 = vand.u32 2147483647, %v1771_v46  ;;  %vm1777_vm6 = vweird.f32 %v1771_v46 }
 0x675   :  { %v1784_v39 = vor.u32 1.1754944e-38, %v1783_v1  ;;  %vm1782_vm11 = vcmp.eq.f32.partialorder %v1781_v26, 8.507059e+37 }
 0x679   :  { %v2656_v0 = vpop.eup %2655 }
 0x67a   :  { %v1773_v44 = vmul.f32 %v2656_v0, %v1771_v46  ;;  %vm1778_vm4 = vweird.f32 %v2656_v0 }
 0x67b   :  { %vm1779_vm7 = vmor %vm1777_vm6, %vm1778_vm4 }
 0x67c   :  { %v1774_v37 = vsub.f32 1.0, %v1773_v44 }
 0x67e   :  { %v1775_v58 = vmul.f32 %v2656_v0, %v1774_v37 }
 0x680   :  { %v1776_v5 = vadd.f32 %v2656_v0, %v1775_v58 }
 0x682   :  { %v1780_v23 = vsel %vm1779_vm7, %v2656_v0, %v1776_v5  ;;  %v4474_v5 = vld [vmem:[#allocation15_spill] sm:$0xff]  ;;  %v4476_v0 = vld [vmem:[#allocation16_spill] sm:$0xff] }
 0x683   :  { %v1785_v30 = vsel %vm1782_vm11, %v1784_v39, %v1780_v23 }
 0x684   :  { %v1788_v40 = vmul.f32 %v1787_v15, %v1785_v30  ;;  %v1795_v37 = vrot.slane %v1785_v30, 1 }
 0x686   :  { %v1792_v44 = vadd.f32 %v4082_v41, %v1788_v40  ;;  %v1797_v57 = vsub.f32 1.0, %v1795_v37  ;;  %v1803_v58 = vmul.f32 %v1801_v10, %v1795_v37  ;;  %v4472_v10 = vld [vmem:[#allocation21_spill] sm:$0xff] }
 0x688   :  { %2657 = vtanh.f32 %v1792_v44 }
 0x68e   :  { %v2658_v3 = vpop.eup %2657 }
 0x68f   :  { %v1798_v46 = vmul.f32 %v2658_v3, %v1797_v57  ;;  %v4473_v57 = vld [vmem:[#allocation14_spill] sm:$0xff] }
 0x690   :  { %v4475_v3 = vld [vmem:[#allocation22_spill] sm:$0xff] }
 0x691   :  { %v4085_v55 = vadd.f32 %v1803_v58, %v1798_v46 }
 0x693   :  { %4471 = vst [vmem:[#allocation18_spill] sm:$0xff] %v4085_v55  ;;  %1821 = vmatmul.f32.vlgmr.msrb.gmra.mxu1 %v4085_v55  ;;  %1841 = vmatmul.f32.vlgmr.msrb.gmra.mxu2 %v4085_v55 }
 0x694   :  { %1861 = vmatmul.f32.vlgmr.msrb.gmra.mxu3 %v4085_v55  ;;  %2037 = vmatpush.msrb.mxu1 %v3785_v50 }
 0x695   :  { %2093 = vmatpush.msrb.mxu2 %v3781_v63  ;;  %2113 = vmatpush.msrb.mxu3 %v3783_v12 }
 0x696   :  { %2038 = vmatpush.msrb.mxu1 %v3794_v11 }
 0x697   :  { %2094 = vmatpush.msrb.mxu2 %v3790_v14  ;;  %2114 = vmatpush.msrb.mxu3 %v3792_v45 }
 0x698   :  { %2039 = vmatpush.msrb.mxu1 %v3804_v21 }
 0x699   :  { %2095 = vmatpush.msrb.mxu2 %v4469_v59  ;;  %2115 = vmatpush.msrb.mxu3 %v3802_v17 }
 0x69a   :  { %2040 = vmatpush.msrb.mxu1 %v3814_v8 }
 0x69b   :  { %2096 = vmatpush.msrb.mxu2 %v3810_v22  ;;  %2116 = vmatpush.msrb.mxu3 %v3812_v48 }
 0x69c   :  { %2041 = vmatpush.msrb.mxu1 %v3824_v42 }
 0x69d   :  { %2097 = vmatpush.msrb.mxu2 %v3820_v18  ;;  %2117 = vmatpush.msrb.mxu3 %v3822_v7 }
 0x69e   :  { %2042 = vmatpush.msrb.mxu1 %v3835_v16 }
 0x69f   :  { %2098 = vmatpush.msrb.mxu2 %v3831_v27  ;;  %2118 = vmatpush.msrb.mxu3 %v3833_v13 }
 0x6a0   :  { %2043 = vmatpush.msrb.mxu1 %v3845_v60 }
 0x6a1   :  { %2099 = vmatpush.msrb.mxu2 %v3841_v62  ;;  %2119 = vmatpush.msrb.mxu3 %v3843_v29 }
 0x6a2   :  { %2044 = vmatpush.msrb.mxu1 %v3855_v52 }
 0x6a3   :  { %2100 = vmatpush.msrb.mxu2 %v3851_v38  ;;  %2120 = vmatpush.msrb.mxu3 %v3853_v6 }
 0x6a4   :  { %2045 = vmatpush.msrb.mxu1 %v3864_v47 }
 0x6a5   :  { %2101 = vmatpush.msrb.mxu2 %v3860_v36  ;;  %2121 = vmatpush.msrb.mxu3 %v3862_v4 }
 0x6a6   :  { %2046 = vmatpush.msrb.mxu1 %v3875_v9 }
 0x6a7   :  { %2102 = vmatpush.msrb.mxu2 %v3868_v19  ;;  %2122 = vmatpush.msrb.mxu3 %v3870_v24 }
 0x6a8   :  { %2047 = vmatpush.msrb.mxu1 %v3885_v2 }
 0x6a9   :  { %2103 = vmatpush.msrb.mxu2 %v3878_v31  ;;  %2123 = vmatpush.msrb.mxu3 %v3880_v25 }
 0x6aa   :  { %2048 = vmatpush.msrb.mxu1 %v3897_v33 }
 0x6ab   :  { %2104 = vmatpush.msrb.mxu2 %v3888_v43  ;;  %2124 = vmatpush.msrb.mxu3 %v3890_v32 }
 0x6ac   :  { %2049 = vmatpush.msrb.mxu1 %v3907_v51 }
 0x6ad   :  { %2105 = vmatpush.msrb.mxu2 %v3900_v49  ;;  %2125 = vmatpush.msrb.mxu3 %v3902_v34 }
 0x6ae   :  { %2050 = vmatpush.msrb.mxu1 %v3918_v54 }
 0x6af   :  { %2106 = vmatpush.msrb.mxu2 %v3911_v35  ;;  %2126 = vmatpush.msrb.mxu3 %v3913_v53 }
 0x6b0   :  { %2051 = vmatpush.msrb.mxu1 %v3928_v61 }
 0x6b1   :  { %2107 = vmatpush.msrb.mxu2 %v4472_v10  ;;  %2127 = vmatpush.msrb.mxu3 %v4473_v57 }
 0x6b2   :  { %2052 = vmatpush.msrb.mxu1 %v4474_v5 }
 0x6b3   :  { %2108 = vmatpush.msrb.mxu2 %v4475_v3  ;;  %2128 = vmatpush.msrb.mxu3 %v4476_v0 }
 0x710   :  { %v1822_v20 = vpop.f32.mrf.mxu1 }
 0x716   :  { %v1842_v1 = vpop.f32.mrf.mxu2 }
 0x717   :  { %v1867_v26 = vrot.slane %v1842_v1, 7  ;;  %v1862_v0 = vpop.f32.mrf.mxu3 }
 0x719   :  { %v1868_v39 = vsel %vm1764_vm9, %v1822_v20, %v1867_v26  ;;  %v1890_v20 = vadd.f32 %v1862_v0, %v4078_v56  ;;  %v4482_v0 = vld [vmem:[#allocation16_spill] sm:$0xff] }
 0x71a   :  { %v1870_v15 = vadd.f32 %v1868_v39, %v4074_v28 }
 0x71c   :  { %v2557_v23 = vmul.f32 -1.442695, %v1870_v15 }
 0x71e   :  { %2659 = vpow2.f32 %v2557_v23 }
 0x724   :  { %v2660_v30 = vpop.eup %2659 }
 0x725   :  { %v1874_v40 = vadd.f32 1.0, %v2660_v30 }
 0x727   :  { %2661 = vrcp.f32 %v1874_v40  ;;  %v1886_v58 = vand.u32 2147483648, %v1874_v40  ;;  %v1884_v3 = vand.u32 2147483647, %v1874_v40  ;;  %vm1880_vm13 = vweird.f32 %v1874_v40 }
 0x729   :  { %v1887_v1 = vor.u32 1.1754944e-38, %v1886_v58  ;;  %vm1885_vm0 = vcmp.eq.f32.partialorder %v1884_v3, 8.507059e+37  ;;  %v4481_v3 = vld [vmem:[#allocation22_spill] sm:$0xff] }
 0x72d   :  { %v2662_v44 = vpop.eup %2661 }
 0x72e   :  { %v1876_v37 = vmul.f32 %v2662_v44, %v1874_v40  ;;  %vm1881_vm12 = vweird.f32 %v2662_v44 }
 0x72f   :  { %vm1882_vm15 = vmor %vm1880_vm13, %vm1881_vm12 }
 0x730   :  { %v1877_v46 = vsub.f32 1.0, %v1876_v37 }
 0x732   :  { %v1878_v5 = vmul.f32 %v2662_v44, %v1877_v46 }
 0x734   :  { %v1879_v57 = vadd.f32 %v2662_v44, %v1878_v5  ;;  %v4480_v5 = vld [vmem:[#allocation15_spill] sm:$0xff] }
 0x736   :  { %v1883_v26 = vsel %vm1882_vm15, %v2662_v44, %v1879_v57  ;;  %v4479_v57 = vld [vmem:[#allocation14_spill] sm:$0xff] }
 0x737   :  { %v1888_v39 = vsel %vm1885_vm0, %v1887_v1, %v1883_v26  ;;  %v4483_v26 = vld [vmem:[#allocation23_spill] sm:$0xff] }
 0x738   :  { %v1891_v15 = vmul.f32 %v1890_v20, %v1888_v39  ;;  %v1895_v30 = vrot.slane %v1888_v39, 1 }
 0x73a   :  { %v1892_v23 = vadd.f32 %v1891_v15, %v4082_v41  ;;  %v1897_v37 = vsub.f32 1.0, %v1895_v30  ;;  %v1899_v10 = vmul.f32 %v1895_v30, %v4085_v55 }
 0x73c   :  { %2663 = vtanh.f32 %v1892_v23 }
 0x742   :  { %v2664_v28 = vpop.eup %2663 }
 0x743   :  { %v1898_v46 = vmul.f32 %v2664_v28, %v1897_v37  ;;  %v4477_v28 = vld [vmem:[#allocation13_spill] sm:$0xff] }
 0x745   :  { %v4143_v61 = vadd.f32 %v1899_v10, %v1898_v46  ;;  %v4478_v10 = vld [vmem:[#allocation21_spill] sm:$0xff] }
 0x747   :  { %1917 = vmatmul.f32.vlgmr.msra.gmra.mxu0 %v4143_v61  ;;  %1937 = vmatmul.f32.vlgmr.msra.gmra.mxu1 %v4143_v61 }
 0x748   :  { %1957 = vmatmul.f32.vlgmr.msra.gmra.mxu2 %v4143_v61  ;;  %2133 = vmatpush.msra.mxu0 %v3785_v50 }
 0x749   :  { %2189 = vmatpush.msra.mxu1 %v3781_v63  ;;  %2209 = vmatpush.msra.mxu2 %v3783_v12 }
 0x74a   :  { %2134 = vmatpush.msra.mxu0 %v3794_v11 }
 0x74b   :  { %2190 = vmatpush.msra.mxu1 %v3790_v14  ;;  %2210 = vmatpush.msra.mxu2 %v3792_v45 }
 0x74c   :  { %2135 = vmatpush.msra.mxu0 %v3804_v21 }
 0x74d   :  { %2191 = vmatpush.msra.mxu1 %v4469_v59  ;;  %2211 = vmatpush.msra.mxu2 %v3802_v17 }
 0x74e   :  { %2136 = vmatpush.msra.mxu0 %v3814_v8 }
 0x74f   :  { %2192 = vmatpush.msra.mxu1 %v3810_v22  ;;  %2212 = vmatpush.msra.mxu2 %v3812_v48 }
 0x750   :  { %2137 = vmatpush.msra.mxu0 %v3824_v42 }
 0x751   :  { %2193 = vmatpush.msra.mxu1 %v3820_v18  ;;  %2213 = vmatpush.msra.mxu2 %v3822_v7 }
 0x752   :  { %2138 = vmatpush.msra.mxu0 %v3835_v16 }
 0x753   :  { %2194 = vmatpush.msra.mxu1 %v3831_v27  ;;  %2214 = vmatpush.msra.mxu2 %v3833_v13 }
 0x754   :  { %2139 = vmatpush.msra.mxu0 %v3845_v60 }
 0x755   :  { %2195 = vmatpush.msra.mxu1 %v3841_v62  ;;  %2215 = vmatpush.msra.mxu2 %v3843_v29 }
 0x756   :  { %2140 = vmatpush.msra.mxu0 %v3855_v52 }
 0x757   :  { %2196 = vmatpush.msra.mxu1 %v3851_v38  ;;  %2216 = vmatpush.msra.mxu2 %v3853_v6 }
 0x758   :  { %2141 = vmatpush.msra.mxu0 %v3864_v47 }
 0x759   :  { %2197 = vmatpush.msra.mxu1 %v3860_v36  ;;  %2217 = vmatpush.msra.mxu2 %v3862_v4 }
 0x75a   :  { %2142 = vmatpush.msra.mxu0 %v3875_v9 }
 0x75b   :  { %2198 = vmatpush.msra.mxu1 %v3868_v19  ;;  %2218 = vmatpush.msra.mxu2 %v3870_v24 }
 0x75c   :  { %2143 = vmatpush.msra.mxu0 %v3885_v2 }
 0x75d   :  { %2199 = vmatpush.msra.mxu1 %v3878_v31  ;;  %2219 = vmatpush.msra.mxu2 %v3880_v25 }
 0x75e   :  { %2144 = vmatpush.msra.mxu0 %v3897_v33 }
 0x75f   :  { %2200 = vmatpush.msra.mxu1 %v3888_v43  ;;  %2220 = vmatpush.msra.mxu2 %v3890_v32 }
 0x760   :  { %2145 = vmatpush.msra.mxu0 %v3907_v51 }
 0x761   :  { %2201 = vmatpush.msra.mxu1 %v3900_v49  ;;  %2221 = vmatpush.msra.mxu2 %v3902_v34 }
 0x762   :  { %2146 = vmatpush.msra.mxu0 %v3918_v54 }
 0x763   :  { %2202 = vmatpush.msra.mxu1 %v3911_v35  ;;  %2222 = vmatpush.msra.mxu2 %v3913_v53 }
 0x764   :  { %2147 = vmatpush.msra.mxu0 %v4477_v28 }
 0x765   :  { %2203 = vmatpush.msra.mxu1 %v4478_v10  ;;  %2223 = vmatpush.msra.mxu2 %v4479_v57 }
 0x766   :  { %2148 = vmatpush.msra.mxu0 %v4480_v5 }
 0x767   :  { %2204 = vmatpush.msra.mxu1 %v4481_v3  ;;  %2224 = vmatpush.msra.mxu2 %v4482_v0 }
 0x7c4   :  { %v1938_v40 = vpop.f32.mrf.mxu1  ;;  %v1918_v58 = vpop.f32.mrf.mxu0 }
 0x7c5   :  { %v1963_v44 = vrot.slane %v1938_v40, 7 }
 0x7c7   :  { %v1964_v1 = vsel %vm1764_vm9, %v1918_v58, %v1963_v44 }
 0x7c8   :  { %v1966_v20 = vadd.f32 %v1964_v1, %v4483_v26 }
 0x7ca   :  { %v2558_v39 = vmul.f32 -1.442695, %v1966_v20 }
 0x7cb   :  { %v1958_v0 = vpop.f32.mrf.mxu2 }
 0x7cc   :  { %2665 = vpow2.f32 %v2558_v39  ;;  %v1986_v58 = vadd.f32 %v1958_v0, %v4078_v56  ;;  %v4276_v0 = vld [vmem:[#allocation5 + $0x2f8] sm:$0xff] }
 0x7d2   :  { %v2666_v15 = vpop.eup %2665 }
 0x7d3   :  { %v1970_v23 = vadd.f32 1.0, %v2666_v15 }
 0x7d5   :  { %2667 = vrcp.f32 %v1970_v23  ;;  %v1982_v55 = vand.u32 2147483648, %v1970_v23  ;;  %v1980_v3 = vand.u32 2147483647, %v1970_v23  ;;  %vm1976_vm4 = vweird.f32 %v1970_v23 }
 0x7d7   :  { %v1983_v40 = vor.u32 1.1754944e-38, %v1982_v55  ;;  %vm1981_vm7 = vcmp.eq.f32.partialorder %v1980_v3, 8.507059e+37  ;;  %v4270_v55 = vld [vmem:[#allocation5 + $0x328] sm:$0xff] }
 0x7d8   :  { %v2761_v3 = vld [vmem:[#allocation5 + $0x308] sm:$0xff] }
 0x7db   :  { %v2668_v30 = vpop.eup %2667 }
 0x7dc   :  { %v1972_v37 = vmul.f32 %v2668_v30, %v1970_v23  ;;  %vm1977_vm1 = vweird.f32 %v2668_v30  ;;  %v2764_v23 = vld [vmem:[#allocation5 + $0x2f0] sm:$0xff] }
 0x7dd   :  { %vm1978_vm6 = vmor %vm1976_vm4, %vm1977_vm1 }
 0x7de   :  { %v1973_v46 = vsub.f32 1.0, %v1972_v37 }
 0x7e0   :  { %v1974_v5 = vmul.f32 %v2668_v30, %v1973_v46 }
 0x7e2   :  { %v1975_v57 = vadd.f32 %v2668_v30, %v1974_v5  ;;  %v2760_v5 = vld [vmem:[#allocation5 + $0x300] sm:$0xff] }
 0x7e4   :  { %v1979_v44 = vsel %vm1978_vm6, %v2668_v30, %v1975_v57  ;;  %v4273_v57 = vld [vmem:[#allocation5 + $0x310] sm:$0xff]  ;;  %v4279_v30 = vld [vmem:[#allocation5 + $0x2e0] sm:$0xff] }
 0x7e5   :  { %v1984_v1 = vsel %vm1981_vm7, %v1983_v40, %v1979_v44  ;;  %v2766_v40 = vld [vmem:[#allocation5 + $0x2d0] sm:$0xff]  ;;  %v2767_v44 = vld [vmem:[#allocation5 + $0x2d8] sm:$0xff] }
 0x7e6   :  { %v1987_v20 = vmul.f32 %v1986_v58, %v1984_v1  ;;  %v1991_v15 = vrot.slane %v1984_v1, 1  ;;  %v4282_v58 = vld [vmem:[#allocation5 + $0x2c8] sm:$0xff]  ;;  %v2769_v1 = vld [vmem:[#allocation5 + $0x2b8] sm:$0xff] }
 0x7e8   :  { %v1988_v39 = vadd.f32 %v1987_v20, %v4082_v41  ;;  %v1993_v37 = vsub.f32 1.0, %v1991_v15  ;;  %v1995_v10 = vmul.f32 %v1991_v15, %v4143_v61  ;;  %v2770_v20 = vld [vmem:[#allocation5 + $0x2c0] sm:$0xff] }
 0x7e9   :  { %v2772_v15 = vld [vmem:[#allocation5 + $0x2a0] sm:$0xff] }
 0x7ea   :  { %2669 = vtanh.f32 %v1988_v39  ;;  %v4285_v39 = vld [vmem:[#allocation5 + $0x2b0] sm:$0xff] }
 0x7f0   :  { %v2670_v26 = vpop.eup %2669 }
 0x7f1   :  { %v1994_v46 = vmul.f32 %v2670_v26, %v1993_v37  ;;  %v2763_v26 = vld [vmem:[#allocation5 + $0x2e8] sm:$0xff] }
 0x7f2   :  { %v2773_v37 = vld [vmem:[#allocation5 + $0x2a8] sm:$0xff] }
 0x7f3   :  { %v4201_v28 = vadd.f32 %v1995_v10, %v1994_v46  ;;  %v2758_v10 = vld [vmem:[#allocation5 + $0x320] sm:$0xff]  ;;  %v4288_v46 = vld [vmem:[#allocation5 + $0x298] sm:$0xff] }
 0x7f5   :  { %2013 = vmatmul.f32.vlgmr.msra.gmra.mxu3 %v4201_v28  ;;  %2033 = vmatmul.f32.vlgmr.msrb.gmra.mxu0 %v4201_v28 }
 0x7f6   :  { %2053 = vmatmul.f32.vlgmr.msrb.gmra.mxu1 %v4201_v28  ;;  %2229 = vmatpush.msra.mxu3 %v3785_v50  ;;  %v4486_v50 = vld [vmem:[#allocation14_spill] sm:$0xff] }
 0x7f7   :  { %2285 = vmatpush.msrb.mxu0 %v3781_v63  ;;  %2305 = vmatpush.msrb.mxu1 %v3783_v12  ;;  %v4484_v63 = vld [vmem:[#allocation13_spill] sm:$0xff] }
 0x7f8   :  { %2230 = vmatpush.msra.mxu3 %v3794_v11  ;;  %v4485_v12 = vld [vmem:[#allocation21_spill] sm:$0xff]  ;;  %v4489_v11 = vld [vmem:[#allocation16_spill] sm:$0xff] }
 0x7f9   :  { %2286 = vmatpush.msrb.mxu0 %v3790_v14  ;;  %2306 = vmatpush.msrb.mxu1 %v3792_v45  ;;  %v4487_v14 = vld [vmem:[#allocation15_spill] sm:$0xff]  ;;  %v4488_v45 = vld [vmem:[#allocation22_spill] sm:$0xff] }
 0x7fa   :  { %2231 = vmatpush.msra.mxu3 %v3804_v21 }
 0x7fb   :  { %2287 = vmatpush.msrb.mxu0 %v4469_v59  ;;  %2307 = vmatpush.msrb.mxu1 %v3802_v17  ;;  %v2757_v59 = vld [vmem:[#allocation5 + $0x318] sm:$0xff] }
 0x7fc   :  { %2232 = vmatpush.msra.mxu3 %v3814_v8  ;;  %v4490_v8 = vld [vmem:[#allocation23_spill] sm:$0xff] }
 0x7fd   :  { %2288 = vmatpush.msrb.mxu0 %v3810_v22  ;;  %2308 = vmatpush.msrb.mxu1 %v3812_v48 }
 0x7fe   :  { %2233 = vmatpush.msra.mxu3 %v3824_v42 }
 0x7ff   :  { %2289 = vmatpush.msrb.mxu0 %v3820_v18  ;;  %2309 = vmatpush.msrb.mxu1 %v3822_v7 }
 0x800   :  { %2234 = vmatpush.msra.mxu3 %v3835_v16 }
 0x801   :  { %2290 = vmatpush.msrb.mxu0 %v3831_v27  ;;  %2310 = vmatpush.msrb.mxu1 %v3833_v13 }
 0x802   :  { %2235 = vmatpush.msra.mxu3 %v3845_v60 }
 0x803   :  { %2291 = vmatpush.msrb.mxu0 %v3841_v62  ;;  %2311 = vmatpush.msrb.mxu1 %v3843_v29 }
 0x804   :  { %2236 = vmatpush.msra.mxu3 %v3855_v52 }
 0x805   :  { %2292 = vmatpush.msrb.mxu0 %v3851_v38  ;;  %2312 = vmatpush.msrb.mxu1 %v3853_v6 }
 0x806   :  { %2237 = vmatpush.msra.mxu3 %v3864_v47 }
 0x807   :  { %2293 = vmatpush.msrb.mxu0 %v3860_v36  ;;  %2313 = vmatpush.msrb.mxu1 %v3862_v4 }
 0x808   :  { %2238 = vmatpush.msra.mxu3 %v3875_v9 }
 0x809   :  { %2294 = vmatpush.msrb.mxu0 %v3868_v19  ;;  %2314 = vmatpush.msrb.mxu1 %v3870_v24 }
 0x80a   :  { %2239 = vmatpush.msra.mxu3 %v3885_v2 }
 0x80b   :  { %2295 = vmatpush.msrb.mxu0 %v3878_v31  ;;  %2315 = vmatpush.msrb.mxu1 %v3880_v25 }
 0x80c   :  { %2240 = vmatpush.msra.mxu3 %v3897_v33 }
 0x80d   :  { %2296 = vmatpush.msrb.mxu0 %v3888_v43  ;;  %2316 = vmatpush.msrb.mxu1 %v3890_v32 }
 0x80e   :  { %2241 = vmatpush.msra.mxu3 %v3907_v51  ;;  %v2752_v51 = vld [vmem:[#allocation5 + $0x350] sm:$0xff] }
 0x80f   :  { %2297 = vmatpush.msrb.mxu0 %v3900_v49  ;;  %2317 = vmatpush.msrb.mxu1 %v3902_v34  ;;  %v4264_v49 = vld [vmem:[#allocation5 + $0x358] sm:$0xff]  ;;  %v2751_v34 = vld [vmem:[#allocation5 + $0x348] sm:$0xff] }
 0x810   :  { %2242 = vmatpush.msra.mxu3 %v3918_v54  ;;  %v2755_v54 = vld [vmem:[#allocation5 + $0x338] sm:$0xff] }
 0x811   :  { %2298 = vmatpush.msrb.mxu0 %v3911_v35  ;;  %2318 = vmatpush.msrb.mxu1 %v3913_v53  ;;  %v4267_v35 = vld [vmem:[#allocation5 + $0x340] sm:$0xff]  ;;  %v2754_v53 = vld [vmem:[#allocation5 + $0x330] sm:$0xff] }
 0x812   :  { %2243 = vmatpush.msra.mxu3 %v4484_v63  ;;  %v2775_v63 = vld [vmem:[#allocation5 + $0x288] sm:$0xff] }
 0x813   :  { %2299 = vmatpush.msrb.mxu0 %v4485_v12  ;;  %2319 = vmatpush.msrb.mxu1 %v4486_v50  ;;  %v2776_v12 = vld [vmem:[#allocation5 + $0x290] sm:$0xff]  ;;  %v4291_v50 = vld [vmem:[#allocation5 + $0x280] sm:$0xff] }
 0x814   :  { %2244 = vmatpush.msra.mxu3 %v4487_v14  ;;  %v2778_v14 = vld [vmem:[#allocation5 + $0x270] sm:$0xff] }
 0x815   :  { %2300 = vmatpush.msrb.mxu0 %v4488_v45  ;;  %2320 = vmatpush.msrb.mxu1 %v4489_v11  ;;  %v2779_v45 = vld [vmem:[#allocation5 + $0x278] sm:$0xff]  ;;  %v4294_v11 = vld [vmem:[#allocation5 + $0x268] sm:$0xff] }
 0x872   :  { %v2034_v17 = vpop.f32.mrf.mxu0 }
 0x873   :  { %v2059_v21 = vrot.slane %v2034_v17, 7  ;;  %v2054_v6 = vpop.f32.mrf.mxu1  ;;  %v2781_v17 = vld [vmem:[#allocation5 + $0x258] sm:$0xff] }
 0x874   :  { %v2082_v4 = vadd.f32 %v2054_v6, %v4078_v56  ;;  %v2795_v6 = vld [vmem:[#allocation5 + $0x1f0] sm:$0xff] }
 0x878   :  { %v2014_v22 = vpop.f32.mrf.mxu3 }
 0x879   :  { %v2060_v48 = vsel %vm1764_vm9, %v2014_v22, %v2059_v21  ;;  %v2782_v21 = vld [vmem:[#allocation5 + $0x260] sm:$0xff]  ;;  %v4297_v22 = vld [vmem:[#allocation5 + $0x250] sm:$0xff] }
 0x87a   :  { %v2062_v18 = vadd.f32 %v2060_v48, %v4490_v8  ;;  %v2784_v48 = vld [vmem:[#allocation5 + $0x240] sm:$0xff] }
 0x87c   :  { %v2559_v7 = vmul.f32 -1.442695, %v2062_v18  ;;  %v2785_v18 = vld [vmem:[#allocation5 + $0x248] sm:$0xff] }
 0x87e   :  { %2671 = vpow2.f32 %v2559_v7  ;;  %v4300_v7 = vld [vmem:[#allocation5 + $0x238] sm:$0xff] }
 0x884   :  { %v2672_v42 = vpop.eup %2671 }
 0x885   :  { %v2066_v27 = vadd.f32 1.0, %v2672_v42  ;;  %v2787_v42 = vld [vmem:[#allocation5 + $0x228] sm:$0xff] }
 0x887   :  { %2673 = vrcp.f32 %v2066_v27  ;;  %v2078_v29 = vand.u32 2147483648, %v2066_v27  ;;  %v2076_v38 = vand.u32 2147483647, %v2066_v27  ;;  %vm2072_vm12 = vweird.f32 %v2066_v27 }
 0x889   :  { %v2079_v36 = vor.u32 1.1754944e-38, %v2078_v29  ;;  %vm2077_vm15 = vcmp.eq.f32.partialorder %v2076_v38, 8.507059e+37  ;;  %v4306_v29 = vld [vmem:[#allocation5 + $0x208] sm:$0xff]  ;;  %v2794_v38 = vld [vmem:[#allocation5 + $0x200] sm:$0xff] }
 0x88d   :  { %v2674_v13 = vpop.eup %2673 }
 0x88e   :  { %v2068_v16 = vmul.f32 %v2674_v13, %v2066_v27  ;;  %vm2073_vm11 = vweird.f32 %v2674_v13  ;;  %v2788_v27 = vld [vmem:[#allocation5 + $0x230] sm:$0xff] }
 0x88f   :  { %vm2074_vm13 = vmor %vm2072_vm12, %vm2073_vm11 }
 0x890   :  { %v2069_v62 = vsub.f32 1.0, %v2068_v16  ;;  %v2790_v16 = vld [vmem:[#allocation5 + $0x210] sm:$0xff] }
 0x892   :  { %v2070_v60 = vmul.f32 %v2674_v13, %v2069_v62  ;;  %v2791_v62 = vld [vmem:[#allocation5 + $0x218] sm:$0xff] }
 0x894   :  { %v2071_v52 = vadd.f32 %v2674_v13, %v2070_v60  ;;  %v2793_v60 = vld [vmem:[#allocation5 + $0x1f8] sm:$0xff] }
 0x896   :  { %v2075_v47 = vsel %vm2074_vm13, %v2674_v13, %v2071_v52  ;;  %v4303_v13 = vld [vmem:[#allocation5 + $0x220] sm:$0xff] }
 0x897   :  { %v2080_v19 = vsel %vm2077_vm15, %v2079_v36, %v2075_v47  ;;  %v2796_v52 = vld [vmem:[#allocation5 + $0x1e0] sm:$0xff]  ;;  %v2797_v36 = vld [vmem:[#allocation5 + $0x1e8] sm:$0xff] }
 0x898   :  { %v2083_v24 = vmul.f32 %v2082_v4, %v2080_v19  ;;  %v2087_v31 = vrot.slane %v2080_v19, 1 }
 0x89a   :  { %v2084_v9 = vadd.f32 %v2083_v24, %v4082_v41  ;;  %v2089_v25 = vsub.f32 1.0, %v2087_v31  ;;  %v2091_v32 = vmul.f32 %v2087_v31, %v4201_v28 }
 0x89c   :  { %2675 = vtanh.f32 %v2084_v9 }
 0x8a2   :  { %v2676_v2 = vpop.eup %2675 }
 0x8a3   :  { %v2090_v43 = vmul.f32 %v2676_v2, %v2089_v25 }
 0x8a5   :  { %v4259_v33 = vadd.f32 %v2091_v32, %v2090_v43 }
 0x8a7   :  { %2109 = vmatmul.f32.vlgmr.msrb.gmra.mxu2 %v4259_v33  ;;  %2129 = vmatmul.f32.vlgmr.msrb.gmra.mxu3 %v4259_v33 }
 0x8a8   :  { %2149 = vmatmul.f32.vlgmr.msra.gmra.mxu0 %v4259_v33  ;;  %2325 = vmatpush.msrb.mxu2 %v4264_v49 }
 0x8a9   :  { %2381 = vmatpush.msrb.mxu3 %v2751_v34  ;;  %2401 = vmatpush.msra.mxu0 %v2752_v51 }
 0x8aa   :  { %2326 = vmatpush.msrb.mxu2 %v4267_v35 }
 0x8ab   :  { %2382 = vmatpush.msrb.mxu3 %v2754_v53  ;;  %2402 = vmatpush.msra.mxu0 %v2755_v54 }
 0x8ac   :  { %2327 = vmatpush.msrb.mxu2 %v4270_v55 }
 0x8ad   :  { %2383 = vmatpush.msrb.mxu3 %v2757_v59  ;;  %2403 = vmatpush.msra.mxu0 %v2758_v10 }
 0x8ae   :  { %2328 = vmatpush.msrb.mxu2 %v4273_v57 }
 0x8af   :  { %2384 = vmatpush.msrb.mxu3 %v2760_v5  ;;  %2404 = vmatpush.msra.mxu0 %v2761_v3 }
 0x8b0   :  { %2329 = vmatpush.msrb.mxu2 %v4276_v0 }
 0x8b1   :  { %2385 = vmatpush.msrb.mxu3 %v2763_v26  ;;  %2405 = vmatpush.msra.mxu0 %v2764_v23 }
 0x8b2   :  { %2330 = vmatpush.msrb.mxu2 %v4279_v30 }
 0x8b3   :  { %2386 = vmatpush.msrb.mxu3 %v2766_v40  ;;  %2406 = vmatpush.msra.mxu0 %v2767_v44 }
 0x8b4   :  { %2331 = vmatpush.msrb.mxu2 %v4282_v58 }
 0x8b5   :  { %2387 = vmatpush.msrb.mxu3 %v2769_v1  ;;  %2407 = vmatpush.msra.mxu0 %v2770_v20 }
 0x8b6   :  { %2332 = vmatpush.msrb.mxu2 %v4285_v39 }
 0x8b7   :  { %2388 = vmatpush.msrb.mxu3 %v2772_v15  ;;  %2408 = vmatpush.msra.mxu0 %v2773_v37 }
 0x8b8   :  { %2333 = vmatpush.msrb.mxu2 %v4288_v46 }
 0x8b9   :  { %2389 = vmatpush.msrb.mxu3 %v2775_v63  ;;  %2409 = vmatpush.msra.mxu0 %v2776_v12 }
 0x8ba   :  { %2334 = vmatpush.msrb.mxu2 %v4291_v50 }
 0x8bb   :  { %2390 = vmatpush.msrb.mxu3 %v2778_v14  ;;  %2410 = vmatpush.msra.mxu0 %v2779_v45 }
 0x8bc   :  { %2335 = vmatpush.msrb.mxu2 %v4294_v11 }
 0x8bd   :  { %2391 = vmatpush.msrb.mxu3 %v2781_v17  ;;  %2411 = vmatpush.msra.mxu0 %v2782_v21 }
 0x8be   :  { %2336 = vmatpush.msrb.mxu2 %v4297_v22 }
 0x8bf   :  { %2392 = vmatpush.msrb.mxu3 %v2784_v48  ;;  %2412 = vmatpush.msra.mxu0 %v2785_v18 }
 0x8c0   :  { %2337 = vmatpush.msrb.mxu2 %v4300_v7 }
 0x8c1   :  { %2393 = vmatpush.msrb.mxu3 %v2787_v42  ;;  %2413 = vmatpush.msra.mxu0 %v2788_v27 }
 0x8c2   :  { %2338 = vmatpush.msrb.mxu2 %v4303_v13 }
 0x8c3   :  { %2394 = vmatpush.msrb.mxu3 %v2790_v16  ;;  %2414 = vmatpush.msra.mxu0 %v2791_v62 }
 0x8c4   :  { %2339 = vmatpush.msrb.mxu2 %v4306_v29 }
 0x8c5   :  { %2395 = vmatpush.msrb.mxu3 %v2793_v60  ;;  %2415 = vmatpush.msra.mxu0 %v2794_v38 }
 0x8c6   :  { %2340 = vmatpush.msrb.mxu2 %v2795_v6 }
 0x8c7   :  { %2396 = vmatpush.msrb.mxu3 %v2796_v52  ;;  %2416 = vmatpush.msra.mxu0 %v2797_v36 }
 0x925   :  { %v2150_v59 = vpop.f32.mrf.mxu0 }
 0x926   :  { %v2178_v3 = vadd.f32 %v2150_v59, %v4078_v56 }
 0x92a   :  { %v2130_v4 = vpop.f32.mrf.mxu3  ;;  %v2110_v19 = vpop.f32.mrf.mxu2 }
 0x92b   :  { %v2155_v47 = vrot.slane %v2130_v4, 7 }
 0x92d   :  { %v2156_v24 = vsel %vm1764_vm9, %v2110_v19, %v2155_v47 }
 0x92e   :  { %v2158_v9 = vadd.f32 %v2156_v24, %v4490_v8 }
 0x930   :  { %v2560_v31 = vmul.f32 -1.442695, %v2158_v9 }
 0x932   :  { %2677 = vpow2.f32 %v2560_v31 }
 0x938   :  { %v2678_v25 = vpop.eup %2677 }
 0x939   :  { %v2162_v2 = vadd.f32 1.0, %v2678_v25 }
 0x93b   :  { %2679 = vrcp.f32 %v2162_v2  ;;  %v2174_v51 = vand.u32 2147483648, %v2162_v2  ;;  %v2172_v54 = vand.u32 2147483647, %v2162_v2  ;;  %vm2168_vm1 = vweird.f32 %v2162_v2 }
 0x93d   :  { %v2175_v5 = vor.u32 1.1754944e-38, %v2174_v51  ;;  %vm2173_vm6 = vcmp.eq.f32.partialorder %v2172_v54, 8.507059e+37 }
 0x941   :  { %v2680_v43 = vpop.eup %2679 }
 0x942   :  { %v2164_v32 = vmul.f32 %v2680_v43, %v2162_v2  ;;  %vm2169_vm0 = vweird.f32 %v2680_v43 }
 0x943   :  { %vm2170_vm4 = vmor %vm2168_vm1, %vm2169_vm0 }
 0x944   :  { %v2165_v34 = vsub.f32 1.0, %v2164_v32 }
 0x946   :  { %v2166_v53 = vmul.f32 %v2680_v43, %v2165_v34 }
 0x948   :  { %v2167_v10 = vadd.f32 %v2680_v43, %v2166_v53 }
 0x94a   :  { %v2171_v26 = vsel %vm2170_vm4, %v2680_v43, %v2167_v10 }
 0x94b   :  { %v2176_v23 = vsel %vm2173_vm6, %v2175_v5, %v2171_v26 }
 0x94c   :  { %v2179_v40 = vmul.f32 %v2178_v3, %v2176_v23  ;;  %v2183_v1 = vrot.slane %v2176_v23, 1 }
 0x94e   :  { %v2180_v44 = vadd.f32 %v2179_v40, %v4082_v41  ;;  %v2185_v20 = vsub.f32 1.0, %v2183_v1  ;;  %v2187_v63 = vmul.f32 %v2183_v1, %v4259_v33 }
 0x950   :  { %2681 = vtanh.f32 %v2180_v44 }
 0x956   :  { %v2682_v15 = vpop.eup %2681 }
 0x957   :  { %v2186_v37 = vmul.f32 %v2682_v15, %v2185_v20 }
 0x959   :  { %v4314_v12 = vadd.f32 %v2187_v63, %v2186_v37 }
 0x95b   :  { %2205 = vmatmul.f32.vlgmr.msra.gmra.mxu1 %v4314_v12  ;;  %2225 = vmatmul.f32.vlgmr.msra.gmra.mxu2 %v4314_v12 }
 0x95c   :  { %2245 = vmatmul.f32.vlgmr.msra.gmra.mxu3 %v4314_v12  ;;  %2421 = vmatpush.msra.mxu1 %v4264_v49 }
 0x95e   :  { %2422 = vmatpush.msra.mxu1 %v4267_v35 }
 0x960   :  { %2423 = vmatpush.msra.mxu1 %v4270_v55 }
 0x962   :  { %2424 = vmatpush.msra.mxu1 %v4273_v57 }
 0x964   :  { %2425 = vmatpush.msra.mxu1 %v4276_v0 }
 0x966   :  { %2426 = vmatpush.msra.mxu1 %v4279_v30 }
 0x968   :  { %2427 = vmatpush.msra.mxu1 %v4282_v58 }
 0x96a   :  { %2428 = vmatpush.msra.mxu1 %v4285_v39 }
 0x96c   :  { %2429 = vmatpush.msra.mxu1 %v4288_v46 }
 0x96e   :  { %2430 = vmatpush.msra.mxu1 %v4291_v50 }
 0x970   :  { %2431 = vmatpush.msra.mxu1 %v4294_v11 }
 0x972   :  { %2432 = vmatpush.msra.mxu1 %v4297_v22 }
 0x974   :  { %2433 = vmatpush.msra.mxu1 %v4300_v7 }
 0x976   :  { %2434 = vmatpush.msra.mxu1 %v4303_v13 }
 0x978   :  { %2435 = vmatpush.msra.mxu1 %v4306_v29 }
 0x97a   :  { %2436 = vmatpush.msra.mxu1 %v2795_v6 }
 0x9d8   :  { %v2206_v55 = vpop.f32.mrf.mxu1 }
 0x9de   :  { %v2226_v49 = vpop.f32.mrf.mxu2 }
 0x9df   :  { %v2251_v35 = vrot.slane %v2226_v49, 7  ;;  %v2246_v21 = vpop.f32.mrf.mxu3 }
 0x9e0   :  { %v2274_v7 = vadd.f32 %v2246_v21, %v4078_v56 }
 0x9e1   :  { %v2252_v57 = vsel %vm1764_vm9, %v2206_v55, %v2251_v35 }
 0x9e2   :  { %v2254_v0 = vadd.f32 %v2252_v57, %v4490_v8 }
 0x9e4   :  { %v2561_v30 = vmul.f32 -1.442695, %v2254_v0 }
 0x9e6   :  { %2683 = vpow2.f32 %v2561_v30 }
 0x9ec   :  { %v2684_v58 = vpop.eup %2683 }
 0x9ed   :  { %v2258_v39 = vadd.f32 1.0, %v2684_v58 }
 0x9ef   :  { %2685 = vrcp.f32 %v2258_v39  ;;  %v2270_v45 = vand.u32 2147483648, %v2258_v39  ;;  %v2268_v17 = vand.u32 2147483647, %v2258_v39  ;;  %vm2264_vm11 = vweird.f32 %v2258_v39 }
 0x9f1   :  { %v2271_v48 = vor.u32 1.1754944e-38, %v2270_v45  ;;  %vm2269_vm13 = vcmp.eq.f32.partialorder %v2268_v17, 8.507059e+37 }
 0x9f5   :  { %v2686_v46 = vpop.eup %2685 }
 0x9f6   :  { %v2260_v50 = vmul.f32 %v2686_v46, %v2258_v39  ;;  %vm2265_vm7 = vweird.f32 %v2686_v46 }
 0x9f7   :  { %vm2266_vm12 = vmor %vm2264_vm11, %vm2265_vm7 }
 0x9f8   :  { %v2261_v14 = vsub.f32 1.0, %v2260_v50 }
 0x9fa   :  { %v2262_v11 = vmul.f32 %v2686_v46, %v2261_v14 }
 0x9fc   :  { %v2263_v22 = vadd.f32 %v2686_v46, %v2262_v11 }
 0x9fe   :  { %v2267_v18 = vsel %vm2266_vm12, %v2686_v46, %v2263_v22 }
 0x9ff   :  { %v2272_v42 = vsel %vm2269_vm13, %v2271_v48, %v2267_v18 }
 0xa00   :  { %v2275_v27 = vmul.f32 %v2274_v7, %v2272_v42  ;;  %v2279_v16 = vrot.slane %v2272_v42, 1 }
 0xa02   :  { %v2276_v13 = vadd.f32 %v2275_v27, %v4082_v41  ;;  %v2281_v62 = vsub.f32 1.0, %v2279_v16  ;;  %v2283_v38 = vmul.f32 %v2279_v16, %v4314_v12 }
 0xa04   :  { %2687 = vtanh.f32 %v2276_v13 }
 0xa0a   :  { %v2688_v29 = vpop.eup %2687 }
 0xa0b   :  { %v2282_v60 = vmul.f32 %v2688_v29, %v2281_v62 }
 0xa0d   :  { %v4339_v6 = vadd.f32 %v2283_v38, %v2282_v60 }
 0xa0f   :  { %2301 = vmatmul.f32.vlgmr.msrb.gmra.mxu0 %v4339_v6  ;;  %2321 = vmatmul.f32.vlgmr.msrb.gmra.mxu1 %v4339_v6 }
 0xa10   :  { %2341 = vmatmul.f32.vlgmr.msrb.gmra.mxu2 %v4339_v6 }
 0xa8c   :  { %v2322_v52 = vpop.f32.mrf.mxu1  ;;  %v2302_v4 = vpop.f32.mrf.mxu0 }
 0xa8d   :  { %v2347_v36 = vrot.slane %v2322_v52, 7  ;;  %v2481_v52 = vperm.slane %v4339_v6, 0 }
 0xa8f   :  { %v2348_v47 = vsel %vm1764_vm9, %v2302_v4, %v2347_v36  ;;  %v2484_v36 = vperm.slane %v4314_v12, 0  ;;  %v2487_v4 = vperm.slane %v4259_v33, 0 }
 0xa90   :  { %v2350_v19 = vadd.f32 %v2348_v47, %v4490_v8 }
 0xa92   :  { %v2562_v24 = vmul.f32 -1.442695, %v2350_v19 }
 0xa93   :  { %v2342_v53 = vpop.f32.mrf.mxu2 }
 0xa94   :  { %2689 = vpow2.f32 %v2562_v24  ;;  %v2370_v5 = vadd.f32 %v2342_v53, %v4078_v56  ;;  %v4491_v24 = vld [vmem:[#allocation18_spill] sm:$0xff] }
 0xa9a   :  { %v2690_v9 = vpop.eup %2689 }
 0xa9b   :  { %v2354_v31 = vadd.f32 1.0, %v2690_v9  ;;  %v2496_v9 = vperm.slane %v4491_v24, 0 }
 0xa9d   :  { %2691 = vrcp.f32 %v2354_v31  ;;  %v2366_v32 = vand.u32 2147483648, %v2354_v31  ;;  %v2364_v51 = vand.u32 2147483647, %v2354_v31  ;;  %vm2360_vm0 = vweird.f32 %v2354_v31 }
 0xa9f   :  { %v2367_v59 = vor.u32 1.1754944e-38, %v2366_v32  ;;  %vm2365_vm4 = vcmp.eq.f32.partialorder %v2364_v51, 8.507059e+37 }
 0xaa3   :  { %v2692_v25 = vpop.eup %2691 }
 0xaa4   :  { %v2356_v2 = vmul.f32 %v2692_v25, %v2354_v31  ;;  %vm2361_vm15 = vweird.f32 %v2692_v25 }
 0xaa5   :  { %vm2362_vm1 = vmor %vm2360_vm0, %vm2361_vm15 }
 0xaa6   :  { %v2357_v43 = vsub.f32 1.0, %v2356_v2 }
 0xaa8   :  { %v2358_v34 = vmul.f32 %v2692_v25, %v2357_v43 }
 0xaaa   :  { %v2359_v54 = vadd.f32 %v2692_v25, %v2358_v34 }
 0xaac   :  { %v2363_v10 = vsel %vm2362_vm1, %v2692_v25, %v2359_v54 }
 0xaad   :  { %v2368_v3 = vsel %vm2365_vm4, %v2367_v59, %v2363_v10 }
 0xaae   :  { %v2371_v26 = vmul.f32 %v2370_v5, %v2368_v3  ;;  %v2375_v40 = vrot.slane %v2368_v3, 1 }
 0xab0   :  { %v2372_v23 = vadd.f32 %v2371_v26, %v4082_v41  ;;  %v2377_v44 = vsub.f32 1.0, %v2375_v40  ;;  %v2379_v15 = vmul.f32 %v2375_v40, %v4339_v6  ;;  %v2493_v6 = vperm.slane %v4143_v61, 0 }
 0xab2   :  { %2693 = vtanh.f32 %v2372_v23 }
 0xab8   :  { %v2694_v1 = vpop.eup %2693 }
 0xab9   :  { %v2378_v20 = vmul.f32 %v2694_v1, %v2377_v44 }
 0xabb   :  { %v2380_v37 = vadd.f32 %v2379_v15, %v2378_v20 }
 0xabd   :  { %2397 = vmatmul.f32.vlgmr.msrb.gmra.mxu3 %v2380_v37  ;;  %2417 = vmatmul.f32.vlgmr.msra.gmra.mxu0 %v2380_v37  ;;  %v2478_v60 = vperm.slane %v2380_v37, 0 }
 0xabe   :  { %2437 = vmatmul.f32.vlgmr.msra.gmra.mxu1 %v2380_v37 }
 0xb3a   :  { %v2418_v63 = vpop.f32.mrf.mxu0 }
 0xb3b   :  { %v2443_v49 = vrot.slane %v2418_v63, 7  ;;  %v2438_v17 = vpop.f32.mrf.mxu1 }
 0xb3c   :  { %v2466_v48 = vadd.f32 %v2438_v17, %v4078_v56 }
 0xb40   :  { %v2398_v35 = vpop.f32.mrf.mxu3 }
 0xb41   :  { %v2444_v55 = vsel %vm1764_vm9, %v2398_v35, %v2443_v49 }
 0xb42   :  { %v2446_v57 = vadd.f32 %v2444_v55, %v4490_v8 }
 0xb44   :  { %v2563_v0 = vmul.f32 -1.442695, %v2446_v57 }
 0xb46   :  { %2695 = vpow2.f32 %v2563_v0 }
 0xb4c   :  { %v2696_v30 = vpop.eup %2695 }
 0xb4d   :  { %v2450_v58 = vadd.f32 1.0, %v2696_v30 }
 0xb4f   :  { %2697 = vrcp.f32 %v2450_v58  ;;  %v2462_v14 = vand.u32 2147483648, %v2450_v58  ;;  %v2460_v11 = vand.u32 2147483647, %v2450_v58  ;;  %vm2456_vm7 = vweird.f32 %v2450_v58 }
 0xb51   :  { %v2463_v22 = vor.u32 1.1754944e-38, %v2462_v14  ;;  %vm2461_vm12 = vcmp.eq.f32.partialorder %v2460_v11, 8.507059e+37 }
 0xb55   :  { %v2698_v39 = vpop.eup %2697 }
 0xb56   :  { %v2452_v46 = vmul.f32 %v2698_v39, %v2450_v58  ;;  %vm2457_vm6 = vweird.f32 %v2698_v39 }
 0xb57   :  { %vm2458_vm11 = vmor %vm2456_vm7, %vm2457_vm6 }
 0xb58   :  { %v2453_v50 = vsub.f32 1.0, %v2452_v46 }
 0xb5a   :  { %v2454_v45 = vmul.f32 %v2698_v39, %v2453_v50 }
 0xb5c   :  { %v2455_v21 = vadd.f32 %v2698_v39, %v2454_v45 }
 0xb5e   :  { %v2459_v8 = vsel %vm2458_vm11, %v2698_v39, %v2455_v21 }
 0xb5f   :  { %v2464_v18 = vsel %vm2461_vm12, %v2463_v22, %v2459_v8 }
 0xb60   :  { %v2467_v7 = vmul.f32 %v2466_v48, %v2464_v18  ;;  %v2471_v27 = vrot.slane %v2464_v18, 1 }
 0xb62   :  { %v2468_v42 = vadd.f32 %v2467_v7, %v4082_v41  ;;  %v2473_v13 = vsub.f32 1.0, %v2471_v27  ;;  %v2475_v29 = vmul.f32 %v2471_v27, %v2380_v37  ;;  %v2490_v41 = vperm.slane %v4201_v28, 0 }
 0xb64   :  { %2699 = vtanh.f32 %v2468_v42 }
 0xb6a   :  { %v2700_v16 = vpop.eup %2699 }
 0xb6b   :  { %v2474_v62 = vmul.f32 %v2700_v16, %v2473_v13 }
 0xb6d   :  { %v2476_v38 = vadd.f32 %v2475_v29, %v2474_v62 }
 0xb6f   :  { %v2511_v56 = vsel %vm1764_vm9, %v2476_v38, %v2478_v60 }
 0xb70   :  { %v2512_v47 = vsel %vm2499_vm10, %v2511_v56, %v2481_v52 }
 0xb71   :  { %v2513_v19 = vsel %vm2501_vm3, %v2512_v47, %v2484_v36 }
 0xb72   :  { %v2514_v12 = vsel %vm2503_vm14, %v2513_v19, %v2487_v4 }
 0xb73   :  { %v2515_v33 = vsel %vm2505_vm8, %v2514_v12, %v2490_v41 }
 0xb74   :  { %v2516_v31 = vsel %vm2507_vm5, %v2515_v33, %v2493_v6 }
 0xb75   :  { %v2517_v25 = vsel %vm2509_vm2, %v2516_v31, %v2496_v9 }
 0xb76   :  { %2519 = vst [vmem:[#allocation8 + $0x8] sm:$0xff] %v2517_v25 }
 0xb77   :  { %2532 = dma.vmem_to_hbm [thread:$0]  %s2525_s2, 256, %s2527_s30, [#allocation4], %s2907_s3, %s2907_s3, %s2908_s4  }
 0xb78   :  { %2898 = dma.done.wait [#allocation4], 256  }
 0xb79   :  { %2899 = vsyncadd [#allocation4], 4294967040 }
 0xb7a   :  { %2537 = vsyncpa [#allocation3], 1 }
 0xb7b   :  { %2538 = vsyncpa [#allocation6], 1 }
 0xb7c   :  { %2539 = vsyncpa [#allocation4], 1 }

</bundles_post_ra>
